<compile_context>
chip_gen: v7x
topology: tpu7x:2x2x1
jax: 0.10.0
libtpu: 0.0.40
codegen_flags: <defaults>
</compile_context>

<pallas_src>
from functools import partial

import jax
import jax.numpy as jnp
from jax import lax
from jax.experimental import pallas as pl
from jax.experimental.pallas import tpu as pltpu

SOS = 0
EOS = 1


# ------------------------------ fused Pallas kernel --------------------------

def decoder_kernel(emb_ref, ctx_ref, len_ref,
                   w_in_ref, w_om_ref, w_oq_ref,
                   w_ih0_ref, w_hh0_ref, b_ih0_ref, b_hh0_ref,
                   w_ih1_ref, w_hh1_ref, b_ih1_ref, b_hh1_ref,
                   fc_w_ref, fc_b_ref,
                   out_ref, y0_ref, y1_ref):
    """Attention -> 2-layer GRU -> fc + log_softmax, all in VMEM.

    emb_ref:  [B, T, Hp] f32   embedded labels (batch-major)
    ctx_ref:  [B, S, Hp] f32   encoder outputs
    len_ref:  [B, 1]     i32   context lengths
    weights:  bf16, pre-transposed / gate-concatenated / zero-padded
    biases:   f32 [1, 3Hp] (GRU) / [1, Vp] (fc, padded with -1e30)
    out_ref:  [T, B, Vp] f32   log-probs (time-major; wrapper transposes/slices)
    y0_ref/y1_ref: [T, B, Hp] f32 VMEM scratch (per-layer GRU outputs)
    """
    f32, bf16 = jnp.float32, jnp.bfloat16
    B, T, Hp = emb_ref.shape
    S = ctx_ref.shape[1]
    Vp = fc_w_ref.shape[1]

    # ---------------- attention ('general' + tanh), batch-major ----------------
    emb = emb_ref[...]                                            # [B,T,Hp] f32
    ctx = ctx_ref[...]                                            # [B,S,Hp] f32
    ctx_b = ctx.astype(bf16)

    # linear_in (no bias): q = emb @ W_in^T
    q = jnp.dot(emb.reshape(B * T, Hp).astype(bf16), w_in_ref[...],
                preferred_element_type=f32)                       # [B*T,Hp] f32
    q3 = q.reshape(B, T, Hp)

    # scores = bmm(q, ctx^T)  -> [B, T, S]
    scores = jnp.einsum('bth,bsh->bts', q3.astype(bf16), ctx_b,
                        preferred_element_type=f32)

    # mask positions >= context length (finite mask: no NaN if a length is 0)
    pos = lax.broadcasted_iota(jnp.int32, (B, T, S), 2)
    mask = pos >= len_ref[...][:, :, None]                        # [B,1,1] bcast
    scores = jnp.where(mask, jnp.float32(-1e30), scores)

    # softmax over the context axis (reciprocal on the EUP slot)
    m = jnp.max(scores, axis=-1, keepdims=True)
    e = jnp.exp(scores - m)
    wts = e * pl.reciprocal(jnp.sum(e, axis=-1, keepdims=True), approx=True)

    # mix = bmm(weights, ctx)  -> [B, T, Hp]
    mix = jnp.einsum('bts,bsh->bth', wts.astype(bf16), ctx_b,
                     preferred_element_type=f32)

    # linear_out(cat([mix, q])) == mix @ Wm^T + q @ Wq^T ; tanh
    att = jnp.tanh(
        jnp.dot(mix.reshape(B * T, Hp).astype(bf16), w_om_ref[...],
                preferred_element_type=f32)
        + jnp.dot(q.astype(bf16), w_oq_ref[...],
                  preferred_element_type=f32))                    # [B*T,Hp] f32

    # ---------------- GRU layers (PyTorch gate order r, z, n) ------------------
    def gru_layer(get_gi, w_hh_ref, b_hh_ref, y_ref):
        w_hh = w_hh_ref[...]                                      # [Hp,3Hp] bf16
        b_hh = b_hh_ref[...]                                      # [1,3Hp]  f32
        h = jnp.zeros((B, Hp), f32)                               # carried in vregs
        for t in range(T):                                        # static unroll
            gi = get_gi(t)                                        # [B,3Hp] f32
            gh = jnp.dot(h.astype(bf16), w_hh,
                         preferred_element_type=f32) + b_hh       # [B,3Hp]
            r = jax.nn.sigmoid(gi[:, :Hp] + gh[:, :Hp])
            z = jax.nn.sigmoid(gi[:, Hp:2 * Hp] + gh[:, Hp:2 * Hp])
            n = jnp.tanh(gi[:, 2 * Hp:] + r * gh[:, 2 * Hp:])
            h = (1.0 - z) * n + z * h
            y_ref[t] = h                                          # time-major store

    # layer 0: input projection hoisted (one big matmul over all timesteps)
    gi0 = (jnp.dot(att.astype(bf16), w_ih0_ref[...],
                   preferred_element_type=f32)
           + b_ih0_ref[...]).reshape(B, T, 3 * Hp)                # batch-major
    gru_layer(lambda t: gi0[:, t, :], w_hh0_ref, b_hh0_ref, y0_ref)

    # layer 1: same, input already time-major in the scratch
    y0 = y0_ref[...].reshape(T * B, Hp)
    gi1 = (jnp.dot(y0.astype(bf16), w_ih1_ref[...],
                   preferred_element_type=f32)
           + b_ih1_ref[...]).reshape(T, B, 3 * Hp)                # time-major
    gru_layer(lambda t: gi1[t], w_hh1_ref, b_hh1_ref, y1_ref)

    # ---------------- fc + log_softmax over the (padded) vocab -----------------
    y1 = y1_ref[...].reshape(T * B, Hp)
    logits = jnp.dot(y1.astype(bf16), fc_w_ref[...],
                     preferred_element_type=f32) + fc_b_ref[...]  # [T*B,Vp]
    m2 = jnp.max(logits, axis=-1, keepdims=True)
    s = logits - m2
    lse = jnp.log(jnp.sum(jnp.exp(s), axis=-1, keepdims=True))
    out_ref[...] = (s - lse).reshape(T, B, Vp)


# ------------------------------ parameter prep -------------------------------

def _round_up(x, m):
    return ((x + m - 1) // m) * m


def prepare_params(params, hidden_size, output_size):
    """One-time (outside jit) padding / transposition / gate-concat / bf16 cast."""
    H, V = hidden_size, output_size
    Hp = _round_up(H, 128)
    Vp = _round_up(V, 128)
    f32, bf16 = jnp.float32, jnp.bfloat16

    def pad2(w, r, c):
        return jnp.pad(w, ((0, r - w.shape[0]), (0, c - w.shape[1])))

    def gru_w(w):  # [3H, H] -> [Hp, 3Hp], pre-transposed, per-gate zero-padded
        g = jnp.transpose(w.reshape(3, H, H), (0, 2, 1))          # [gate, in, out]
        g = jnp.pad(g, ((0, 0), (0, Hp - H), (0, Hp - H)))
        return jnp.transpose(g, (1, 0, 2)).reshape(Hp, 3 * Hp).astype(bf16)

    def gru_b(b):  # [3H] -> [1, 3Hp]
        return jnp.pad(b.reshape(3, H), ((0, 0), (0, Hp - H))
                       ).reshape(1, 3 * Hp).astype(f32)

    w_out = params['attn_w_out']                                   # [H, 2H]
    prep = {
        'embedding': jnp.pad(params['embedding'], ((0, 0), (0, Hp - H))).astype(f32),
        'w_in_t': pad2(params['attn_w_in'].T, Hp, Hp).astype(bf16),
        'w_om_t': pad2(w_out[:, :H].T, Hp, Hp).astype(bf16),
        'w_oq_t': pad2(w_out[:, H:].T, Hp, Hp).astype(bf16),
        'fc_w_t': pad2(params['fc_w'].T, Hp, Vp).astype(bf16),
        # padded vocab columns get a huge negative bias -> excluded from softmax
        'fc_b': jnp.pad(params['fc_b'], (0, Vp - V),
                        constant_values=-1e30).reshape(1, Vp).astype(f32),
    }
    for l in range(2):
        prep[f'w_ih{l}'] = gru_w(params[f'gru_w_ih_l{l}'])
        prep[f'w_hh{l}'] = gru_w(params[f'gru_w_hh_l{l}'])
        prep[f'b_ih{l}'] = gru_b(params[f'gru_b_ih_l{l}'])
        prep[f'b_hh{l}'] = gru_b(params[f'gru_b_hh_l{l}'])
    return prep


# ------------------------------ forward wrapper -------------------------------

@partial(jax.jit, static_argnums=(0,))
def attn_decoder_forward(output_size, prep, encoder_outputs,
                         encoder_output_lengths, input_labels):
    """Teacher-forcing forward of AttnDecoderRnn (rnn_layers=(0, 2))."""
    B, S, H = encoder_outputs.shape
    Hp = prep['w_in_t'].shape[0]
    Vp = prep['fc_w_t'].shape[1]

    sos_col = jnp.full((B, 1), SOS, dtype=jnp.int32)
    labels = jnp.concatenate([sos_col, input_labels.astype(jnp.int32)], axis=1)
    T = labels.shape[1]

    # Embedding lookup (glue); Dropout(0.1) is identity at inference.
    emb = jnp.take(prep['embedding'], labels, axis=0)              # [B,T,Hp] f32
    ctx = jnp.pad(encoder_outputs, ((0, 0), (0, 0), (0, Hp - H)))  # [B,S,Hp] f32
    lens = encoder_output_lengths.reshape(B, 1).astype(jnp.int32)

    vmem = pl.BlockSpec(memory_space=pltpu.MemorySpace.VMEM)
    out_tm = pl.pallas_call(
        decoder_kernel,
        out_shape=jax.ShapeDtypeStruct((T, B, Vp), jnp.float32),
        in_specs=[vmem] * 16,
        out_specs=vmem,
        scratch_shapes=[pltpu.VMEM((T, B, Hp), jnp.float32),
                        pltpu.VMEM((T, B, Hp), jnp.float32)],
    )(emb, ctx, lens,
      prep['w_in_t'], prep['w_om_t'], prep['w_oq_t'],
      prep['w_ih0'], prep['w_hh0'], prep['b_ih0'], prep['b_hh0'],
      prep['w_ih1'], prep['w_hh1'], prep['b_ih1'], prep['b_hh1'],
      prep['fc_w_t'], prep['fc_b'])

    # time-major [T,B,Vp] -> batch-major [B,T,V] (strip lane padding)
    return jnp.transpose(out_tm, (1, 0, 2))[:, :, :output_size]


# ------------------------------ parameters -----------------------------------

def init_params(key, output_size, hidden_size):
    V, H = output_size, hidden_size
    keys = jax.random.split(key, 13)
    bound = 1.0 / (H ** 0.5)

    def u(k, shape):
        return jax.random.uniform(k, shape, jnp.float32, -bound, bound)

    params = {
        'embedding': jax.random.normal(keys[0], (V, H), jnp.float32),
        'attn_w_in': u(keys[1], (H, H)),           # linear_in  [H, H]
        'attn_w_out': u(keys[2], (H, 2 * H)),      # linear_out [H, 2H]
        'fc_w': u(keys[3], (V, H)),
        'fc_b': u(keys[4], (V,)),
    }
    i = 5
    for l in range(2):
        params[f'gru_w_ih_l{l}'] = u(keys[i], (3 * H, H)); i += 1
        params[f'gru_w_hh_l{l}'] = u(keys[i], (3 * H, H)); i += 1
        params[f'gru_b_ih_l{l}'] = u(keys[i], (3 * H,));   i += 1
        params[f'gru_b_hh_l{l}'] = u(keys[i], (3 * H,));   i += 1
    return params


# ------------------------------ main -----------------------------------------

if __name__ == "__main__":
    B, S, H, V, T_in = 2, 8, 32, 16, 7

    key = jax.random.PRNGKey(0)
    pkey, ekey, lkey = jax.random.split(key, 3)
    params = init_params(pkey, V, H)
    prep = prepare_params(params, H, V)       # one-time weight prep (outside jit)

    encoder_outputs = jax.random.normal(ekey, (B, S, H), jnp.float32)
    encoder_output_lengths = jnp.array([S, 5], dtype=jnp.int32)
    input_labels = jax.random.randint(lkey, (B, T_in), 0, V).astype(jnp.int32)

    out = attn_decoder_forward(V, prep, encoder_outputs,
                               encoder_output_lengths, input_labels)
    out = jax.block_until_ready(out)

    assert out.shape == (B, T_in + 1, V), out.shape
    assert bool(jnp.all(jnp.isfinite(out)))
    print("KERNEL_OK")
</pallas_src>

<mosaic_0001>
module attributes {stable_mosaic.version = 11 : i64} {
  func.func @decoder_kernel(%arg0: memref<2x8x128xf32, #tpu.memory_space<vmem>>, %arg1: memref<2x8x128xf32, #tpu.memory_space<vmem>>, %arg2: memref<2x1xi32, #tpu.memory_space<vmem>>, %arg3: memref<128x128xbf16, #tpu.memory_space<vmem>>, %arg4: memref<128x128xbf16, #tpu.memory_space<vmem>>, %arg5: memref<128x128xbf16, #tpu.memory_space<vmem>>, %arg6: memref<128x384xbf16, #tpu.memory_space<vmem>>, %arg7: memref<128x384xbf16, #tpu.memory_space<vmem>>, %arg8: memref<1x384xf32, #tpu.memory_space<vmem>>, %arg9: memref<1x384xf32, #tpu.memory_space<vmem>>, %arg10: memref<128x384xbf16, #tpu.memory_space<vmem>>, %arg11: memref<128x384xbf16, #tpu.memory_space<vmem>>, %arg12: memref<1x384xf32, #tpu.memory_space<vmem>>, %arg13: memref<1x384xf32, #tpu.memory_space<vmem>>, %arg14: memref<128x128xbf16, #tpu.memory_space<vmem>>, %arg15: memref<1x128xf32, #tpu.memory_space<vmem>>, %arg16: memref<8x2x128xf32, #tpu.memory_space<vmem>>, %arg17: memref<8x2x128xf32, #tpu.memory_space<vmem>>, %arg18: memref<8x2x128xf32, #tpu.memory_space<vmem>>) attributes {dimension_semantics = [], scalar_prefetch = 0 : i64, scratch_operands = 2 : i64, tpu.core_type = #tpu.core_type<tc>} {
    %c0 = arith.constant 0 : index
    %c0_0 = arith.constant 0 : index
    %c0_1 = arith.constant 0 : index
    %0 = vector.load %arg0[%c0, %c0_0, %c0_1] : memref<2x8x128xf32, #tpu.memory_space<vmem>>, vector<2x8x128xf32>
    %c0_2 = arith.constant 0 : index
    %c0_3 = arith.constant 0 : index
    %c0_4 = arith.constant 0 : index
    %1 = vector.load %arg1[%c0_2, %c0_3, %c0_4] : memref<2x8x128xf32, #tpu.memory_space<vmem>>, vector<2x8x128xf32>
    %2 = arith.truncf %1 : vector<2x8x128xf32> to vector<2x8x128xbf16>
    %3 = vector.shape_cast %0 : vector<2x8x128xf32> to vector<16x128xf32>
    %4 = arith.truncf %3 : vector<16x128xf32> to vector<16x128xbf16>
    %c0_5 = arith.constant 0 : index
    %c0_6 = arith.constant 0 : index
    %5 = vector.load %arg3[%c0_5, %c0_6] : memref<128x128xbf16, #tpu.memory_space<vmem>>, vector<128x128xbf16>
    %cst = arith.constant dense<0.000000e+00> : vector<16x128xf32>
    %6 = tpu.matmul %4, %5, %cst {dimension_numbers = #tpu.dot_dimension_numbers<[1], [0], [0], [1], [0, 0, 1, 1], [], []>} : vector<16x128xbf16>, vector<128x128xbf16>, vector<16x128xf32> -> vector<16x128xf32>
    %7 = vector.shape_cast %6 : vector<16x128xf32> to vector<2x8x128xf32>
    %8 = arith.truncf %7 : vector<2x8x128xf32> to vector<2x8x128xbf16>
    "tpu.trace_start"() <{level = 10 : i32, message = "bth,bsh->bts"}> : () -> ()
    %cst_7 = arith.constant dense<0.000000e+00> : vector<2x8x8xf32>
    %9 = tpu.matmul %8, %2, %cst_7 {dimension_numbers = #tpu.dot_dimension_numbers<[2], [2], [1], [1], [0, 0, 0, 1, 1, 1], [0], [0]>} : vector<2x8x128xbf16>, vector<2x8x128xbf16>, vector<2x8x8xf32> -> vector<2x8x8xf32>
    "tpu.trace_stop"() : () -> ()
    %10 = tpu.iota {dimensions = array<i32: 2>} : vector<2x8x8xi32>
    %c0_8 = arith.constant 0 : index
    %c0_9 = arith.constant 0 : index
    %11 = vector.load %arg2[%c0_8, %c0_9] : memref<2x1xi32, #tpu.memory_space<vmem>>, vector<2x1xi32>
    %12 = vector.shape_cast %11 : vector<2x1xi32> to vector<2x1x1xi32>
    %13 = vector.broadcast %12 : vector<2x1x1xi32> to vector<2x8x8xi32>
    %14 = arith.cmpi sge, %10, %13 : vector<2x8x8xi32>
    %cst_10 = arith.constant -1.000000e+30 : f32
    %15 = vector.broadcast %cst_10 : f32 to vector<2x8x8xf32>
    %16 = arith.select %14, %15, %9 : vector<2x8x8xi1>, vector<2x8x8xf32>
    %cst_11 = arith.constant dense<0xFF800000> : vector<2x8xf32>
    %17 = vector.multi_reduction <maximumf>, %16, %cst_11 [2] : vector<2x8x8xf32> to vector<2x8xf32>
    %18 = vector.shape_cast %17 : vector<2x8xf32> to vector<2x8x1xf32>
    %19 = vector.broadcast %18 : vector<2x8x1xf32> to vector<2x8x8xf32>
    %20 = arith.subf %16, %19 : vector<2x8x8xf32>
    %21 = math.exp %20 : vector<2x8x8xf32>
    %cst_12 = arith.constant dense<0.000000e+00> : vector<2x8xf32>
    %22 = vector.multi_reduction <add>, %21, %cst_12 [2] : vector<2x8x8xf32> to vector<2x8xf32>
    %23 = vector.shape_cast %22 : vector<2x8xf32> to vector<2x8x1xf32>
    %24 = tpu.reciprocal %23 {approx = true} : vector<2x8x1xf32> -> vector<2x8x1xf32>
    %25 = vector.broadcast %24 : vector<2x8x1xf32> to vector<2x8x8xf32>
    %26 = arith.mulf %21, %25 : vector<2x8x8xf32>
    %27 = arith.truncf %26 : vector<2x8x8xf32> to vector<2x8x8xbf16>
    "tpu.trace_start"() <{level = 10 : i32, message = "bts,bsh->bth"}> : () -> ()
    %cst_13 = arith.constant dense<0.000000e+00> : vector<2x8x128xf32>
    %28 = tpu.matmul %27, %2, %cst_13 {dimension_numbers = #tpu.dot_dimension_numbers<[2], [1], [1], [2], [0, 0, 0, 1, 1, 2], [0], [0]>} : vector<2x8x8xbf16>, vector<2x8x128xbf16>, vector<2x8x128xf32> -> vector<2x8x128xf32>
    "tpu.trace_stop"() : () -> ()
    %29 = vector.shape_cast %28 : vector<2x8x128xf32> to vector<16x128xf32>
    %30 = arith.truncf %29 : vector<16x128xf32> to vector<16x128xbf16>
    %c0_14 = arith.constant 0 : index
    %c0_15 = arith.constant 0 : index
    %31 = vector.load %arg4[%c0_14, %c0_15] : memref<128x128xbf16, #tpu.memory_space<vmem>>, vector<128x128xbf16>
    %cst_16 = arith.constant dense<0.000000e+00> : vector<16x128xf32>
    %32 = tpu.matmul %30, %31, %cst_16 {dimension_numbers = #tpu.dot_dimension_numbers<[1], [0], [0], [1], [0, 0, 1, 1], [], []>} : vector<16x128xbf16>, vector<128x128xbf16>, vector<16x128xf32> -> vector<16x128xf32>
    %33 = arith.truncf %6 : vector<16x128xf32> to vector<16x128xbf16>
    %c0_17 = arith.constant 0 : index
    %c0_18 = arith.constant 0 : index
    %34 = vector.load %arg5[%c0_17, %c0_18] : memref<128x128xbf16, #tpu.memory_space<vmem>>, vector<128x128xbf16>
    %cst_19 = arith.constant dense<0.000000e+00> : vector<16x128xf32>
    %35 = tpu.matmul %33, %34, %cst_19 {dimension_numbers = #tpu.dot_dimension_numbers<[1], [0], [0], [1], [0, 0, 1, 1], [], []>} : vector<16x128xbf16>, vector<128x128xbf16>, vector<16x128xf32> -> vector<16x128xf32>
    %36 = arith.addf %32, %35 : vector<16x128xf32>
    %37 = math.tanh %36 : vector<16x128xf32>
    %38 = arith.truncf %37 : vector<16x128xf32> to vector<16x128xbf16>
    %c0_20 = arith.constant 0 : index
    %c0_21 = arith.constant 0 : index
    %39 = vector.load %arg6[%c0_20, %c0_21] : memref<128x384xbf16, #tpu.memory_space<vmem>>, vector<128x384xbf16>
    %cst_22 = arith.constant dense<0.000000e+00> : vector<16x384xf32>
    %40 = tpu.matmul %38, %39, %cst_22 {dimension_numbers = #tpu.dot_dimension_numbers<[1], [0], [0], [1], [0, 0, 1, 1], [], []>} : vector<16x128xbf16>, vector<128x384xbf16>, vector<16x384xf32> -> vector<16x384xf32>
    %c0_23 = arith.constant 0 : index
    %c0_24 = arith.constant 0 : index
    %41 = vector.load %arg8[%c0_23, %c0_24] : memref<1x384xf32, #tpu.memory_space<vmem>>, vector<1x384xf32>
    %42 = vector.broadcast %41 : vector<1x384xf32> to vector<16x384xf32>
    %43 = arith.addf %40, %42 : vector<16x384xf32>
    %44 = vector.shape_cast %43 : vector<16x384xf32> to vector<2x8x384xf32>
    %c0_25 = arith.constant 0 : index
    %c0_26 = arith.constant 0 : index
    %45 = vector.load %arg7[%c0_25, %c0_26] : memref<128x384xbf16, #tpu.memory_space<vmem>>, vector<128x384xbf16>
    %c0_27 = arith.constant 0 : index
    %c0_28 = arith.constant 0 : index
    %46 = vector.load %arg9[%c0_27, %c0_28] : memref<1x384xf32, #tpu.memory_space<vmem>>, vector<1x384xf32>
    %cst_29 = arith.constant 0.000000e+00 : f32
    %47 = vector.broadcast %cst_29 : f32 to vector<2x128xf32>
    %48 = vector.extract_strided_slice %44 {offsets = [0, 0, 0], sizes = [2, 1, 384], strides = [1, 1, 1]} : vector<2x8x384xf32> to vector<2x1x384xf32>
    %49 = vector.shape_cast %48 : vector<2x1x384xf32> to vector<2x384xf32>
    %50 = arith.truncf %47 : vector<2x128xf32> to vector<2x128xbf16>
    %cst_30 = arith.constant dense<0.000000e+00> : vector<2x384xf32>
    %51 = tpu.matmul %50, %45, %cst_30 {dimension_numbers = #tpu.dot_dimension_numbers<[1], [0], [0], [1], [0, 0, 1, 1], [], []>} : vector<2x128xbf16>, vector<128x384xbf16>, vector<2x384xf32> -> vector<2x384xf32>
    %52 = vector.broadcast %46 : vector<1x384xf32> to vector<2x384xf32>
    %53 = arith.addf %51, %52 : vector<2x384xf32>
    %54 = vector.extract_strided_slice %49 {offsets = [0, 0], sizes = [2, 128], strides = [1, 1]} : vector<2x384xf32> to vector<2x128xf32>
    %55 = vector.extract_strided_slice %53 {offsets = [0, 0], sizes = [2, 128], strides = [1, 1]} : vector<2x384xf32> to vector<2x128xf32>
    %56 = arith.addf %54, %55 : vector<2x128xf32>
    %57 = arith.negf %56 : vector<2x128xf32>
    %58 = math.exp %57 : vector<2x128xf32>
    %cst_31 = arith.constant 1.000000e+00 : f32
    %59 = vector.broadcast %cst_31 : f32 to vector<2x128xf32>
    %60 = arith.addf %59, %58 : vector<2x128xf32>
    %61 = arith.divf %59, %60 : vector<2x128xf32>
    %62 = vector.extract_strided_slice %49 {offsets = [0, 128], sizes = [2, 128], strides = [1, 1]} : vector<2x384xf32> to vector<2x128xf32>
    %63 = vector.extract_strided_slice %53 {offsets = [0, 128], sizes = [2, 128], strides = [1, 1]} : vector<2x384xf32> to vector<2x128xf32>
    %64 = arith.addf %62, %63 : vector<2x128xf32>
    %65 = arith.negf %64 : vector<2x128xf32>
    %66 = math.exp %65 : vector<2x128xf32>
    %cst_32 = arith.constant 1.000000e+00 : f32
    %67 = vector.broadcast %cst_32 : f32 to vector<2x128xf32>
    %68 = arith.addf %67, %66 : vector<2x128xf32>
    %69 = arith.divf %67, %68 : vector<2x128xf32>
    %70 = vector.extract_strided_slice %49 {offsets = [0, 256], sizes = [2, 128], strides = [1, 1]} : vector<2x384xf32> to vector<2x128xf32>
    %71 = vector.extract_strided_slice %53 {offsets = [0, 256], sizes = [2, 128], strides = [1, 1]} : vector<2x384xf32> to vector<2x128xf32>
    %72 = arith.mulf %61, %71 : vector<2x128xf32>
    %73 = arith.addf %70, %72 : vector<2x128xf32>
    %74 = math.tanh %73 : vector<2x128xf32>
    %cst_33 = arith.constant 1.000000e+00 : f32
    %75 = vector.broadcast %cst_33 : f32 to vector<2x128xf32>
    %76 = arith.subf %75, %69 : vector<2x128xf32>
    %77 = arith.mulf %76, %74 : vector<2x128xf32>
    %78 = arith.mulf %69, %47 : vector<2x128xf32>
    %79 = arith.addf %77, %78 : vector<2x128xf32>
    %c0_34 = arith.constant 0 : index
    %c0_35 = arith.constant 0 : index
    %c0_36 = arith.constant 0 : index
    %80 = vector.load %arg17[%c0_34, %c0_35, %c0_36] : memref<8x2x128xf32, #tpu.memory_space<vmem>>, vector<1x2x128xf32>
    %81 = vector.shape_cast %80 : vector<1x2x128xf32> to vector<2x128xf32>
    %82 = vector.shape_cast %79 : vector<2x128xf32> to vector<1x2x128xf32>
    tpu.vector_store %arg17[%c0_34, %c0_35, %c0_36], %82 {strides = array<i32>} : memref<8x2x128xf32, #tpu.memory_space<vmem>>, vector<1x2x128xf32>,
    %83 = vector.extract_strided_slice %44 {offsets = [0, 1, 0], sizes = [2, 1, 384], strides = [1, 1, 1]} : vector<2x8x384xf32> to vector<2x1x384xf32>
    %84 = vector.shape_cast %83 : vector<2x1x384xf32> to vector<2x384xf32>
    %85 = arith.truncf %79 : vector<2x128xf32> to vector<2x128xbf16>
    %cst_37 = arith.constant dense<0.000000e+00> : vector<2x384xf32>
    %86 = tpu.matmul %85, %45, %cst_37 {dimension_numbers = #tpu.dot_dimension_numbers<[1], [0], [0], [1], [0, 0, 1, 1], [], []>} : vector<2x128xbf16>, vector<128x384xbf16>, vector<2x384xf32> -> vector<2x384xf32>
    %87 = vector.broadcast %46 : vector<1x384xf32> to vector<2x384xf32>
    %88 = arith.addf %86, %87 : vector<2x384xf32>
    %89 = vector.extract_strided_slice %84 {offsets = [0, 0], sizes = [2, 128], strides = [1, 1]} : vector<2x384xf32> to vector<2x128xf32>
    %90 = vector.extract_strided_slice %88 {offsets = [0, 0], sizes = [2, 128], strides = [1, 1]} : vector<2x384xf32> to vector<2x128xf32>
    %91 = arith.addf %89, %90 : vector<2x128xf32>
    %92 = arith.negf %91 : vector<2x128xf32>
    %93 = math.exp %92 : vector<2x128xf32>
    %cst_38 = arith.constant 1.000000e+00 : f32
    %94 = vector.broadcast %cst_38 : f32 to vector<2x128xf32>
    %95 = arith.addf %94, %93 : vector<2x128xf32>
    %96 = arith.divf %94, %95 : vector<2x128xf32>
    %97 = vector.extract_strided_slice %84 {offsets = [0, 128], sizes = [2, 128], strides = [1, 1]} : vector<2x384xf32> to vector<2x128xf32>
    %98 = vector.extract_strided_slice %88 {offsets = [0, 128], sizes = [2, 128], strides = [1, 1]} : vector<2x384xf32> to vector<2x128xf32>
    %99 = arith.addf %97, %98 : vector<2x128xf32>
    %100 = arith.negf %99 : vector<2x128xf32>
    %101 = math.exp %100 : vector<2x128xf32>
    %cst_39 = arith.constant 1.000000e+00 : f32
    %102 = vector.broadcast %cst_39 : f32 to vector<2x128xf32>
    %103 = arith.addf %102, %101 : vector<2x128xf32>
    %104 = arith.divf %102, %103 : vector<2x128xf32>
    %105 = vector.extract_strided_slice %84 {offsets = [0, 256], sizes = [2, 128], strides = [1, 1]} : vector<2x384xf32> to vector<2x128xf32>
    %106 = vector.extract_strided_slice %88 {offsets = [0, 256], sizes = [2, 128], strides = [1, 1]} : vector<2x384xf32> to vector<2x128xf32>
    %107 = arith.mulf %96, %106 : vector<2x128xf32>
    %108 = arith.addf %105, %107 : vector<2x128xf32>
    %109 = math.tanh %108 : vector<2x128xf32>
    %cst_40 = arith.constant 1.000000e+00 : f32
    %110 = vector.broadcast %cst_40 : f32 to vector<2x128xf32>
    %111 = arith.subf %110, %104 : vector<2x128xf32>
    %112 = arith.mulf %111, %109 : vector<2x128xf32>
    %113 = arith.mulf %104, %79 : vector<2x128xf32>
    %114 = arith.addf %112, %113 : vector<2x128xf32>
    %c1 = arith.constant 1 : index
    %c0_41 = arith.constant 0 : index
    %c0_42 = arith.constant 0 : index
    %115 = vector.load %arg17[%c1, %c0_41, %c0_42] : memref<8x2x128xf32, #tpu.memory_space<vmem>>, vector<1x2x128xf32>
    %116 = vector.shape_cast %115 : vector<1x2x128xf32> to vector<2x128xf32>
    %117 = vector.shape_cast %114 : vector<2x128xf32> to vector<1x2x128xf32>
    tpu.vector_store %arg17[%c1, %c0_41, %c0_42], %117 {strides = array<i32>} : memref<8x2x128xf32, #tpu.memory_space<vmem>>, vector<1x2x128xf32>,
    %118 = vector.extract_strided_slice %44 {offsets = [0, 2, 0], sizes = [2, 1, 384], strides = [1, 1, 1]} : vector<2x8x384xf32> to vector<2x1x384xf32>
    %119 = vector.shape_cast %118 : vector<2x1x384xf32> to vector<2x384xf32>
    %120 = arith.truncf %114 : vector<2x128xf32> to vector<2x128xbf16>
    %cst_43 = arith.constant dense<0.000000e+00> : vector<2x384xf32>
    %121 = tpu.matmul %120, %45, %cst_43 {dimension_numbers = #tpu.dot_dimension_numbers<[1], [0], [0], [1], [0, 0, 1, 1], [], []>} : vector<2x128xbf16>, vector<128x384xbf16>, vector<2x384xf32> -> vector<2x384xf32>
    %122 = vector.broadcast %46 : vector<1x384xf32> to vector<2x384xf32>
    %123 = arith.addf %121, %122 : vector<2x384xf32>
    %124 = vector.extract_strided_slice %119 {offsets = [0, 0], sizes = [2, 128], strides = [1, 1]} : vector<2x384xf32> to vector<2x128xf32>
    %125 = vector.extract_strided_slice %123 {offsets = [0, 0], sizes = [2, 128], strides = [1, 1]} : vector<2x384xf32> to vector<2x128xf32>
    %126 = arith.addf %124, %125 : vector<2x128xf32>
    %127 = arith.negf %126 : vector<2x128xf32>
    %128 = math.exp %127 : vector<2x128xf32>
    %cst_44 = arith.constant 1.000000e+00 : f32
    %129 = vector.broadcast %cst_44 : f32 to vector<2x128xf32>
    %130 = arith.addf %129, %128 : vector<2x128xf32>
    %131 = arith.divf %129, %130 : vector<2x128xf32>
    %132 = vector.extract_strided_slice %119 {offsets = [0, 128], sizes = [2, 128], strides = [1, 1]} : vector<2x384xf32> to vector<2x128xf32>
    %133 = vector.extract_strided_slice %123 {offsets = [0, 128], sizes = [2, 128], strides = [1, 1]} : vector<2x384xf32> to vector<2x128xf32>
    %134 = arith.addf %132, %133 : vector<2x128xf32>
    %135 = arith.negf %134 : vector<2x128xf32>
    %136 = math.exp %135 : vector<2x128xf32>
    %cst_45 = arith.constant 1.000000e+00 : f32
    %137 = vector.broadcast %cst_45 : f32 to vector<2x128xf32>
    %138 = arith.addf %137, %136 : vector<2x128xf32>
    %139 = arith.divf %137, %138 : vector<2x128xf32>
    %140 = vector.extract_strided_slice %119 {offsets = [0, 256], sizes = [2, 128], strides = [1, 1]} : vector<2x384xf32> to vector<2x128xf32>
    %141 = vector.extract_strided_slice %123 {offsets = [0, 256], sizes = [2, 128], strides = [1, 1]} : vector<2x384xf32> to vector<2x128xf32>
    %142 = arith.mulf %131, %141 : vector<2x128xf32>
    %143 = arith.addf %140, %142 : vector<2x128xf32>
    %144 = math.tanh %143 : vector<2x128xf32>
    %cst_46 = arith.constant 1.000000e+00 : f32
    %145 = vector.broadcast %cst_46 : f32 to vector<2x128xf32>
    %146 = arith.subf %145, %139 : vector<2x128xf32>
    %147 = arith.mulf %146, %144 : vector<2x128xf32>
    %148 = arith.mulf %139, %114 : vector<2x128xf32>
    %149 = arith.addf %147, %148 : vector<2x128xf32>
    %c2 = arith.constant 2 : index
    %c0_47 = arith.constant 0 : index
    %c0_48 = arith.constant 0 : index
    %150 = vector.load %arg17[%c2, %c0_47, %c0_48] : memref<8x2x128xf32, #tpu.memory_space<vmem>>, vector<1x2x128xf32>
    %151 = vector.shape_cast %150 : vector<1x2x128xf32> to vector<2x128xf32>
    %152 = vector.shape_cast %149 : vector<2x128xf32> to vector<1x2x128xf32>
    tpu.vector_store %arg17[%c2, %c0_47, %c0_48], %152 {strides = array<i32>} : memref<8x2x128xf32, #tpu.memory_space<vmem>>, vector<1x2x128xf32>,
    %153 = vector.extract_strided_slice %44 {offsets = [0, 3, 0], sizes = [2, 1, 384], strides = [1, 1, 1]} : vector<2x8x384xf32> to vector<2x1x384xf32>
    %154 = vector.shape_cast %153 : vector<2x1x384xf32> to vector<2x384xf32>
    %155 = arith.truncf %149 : vector<2x128xf32> to vector<2x128xbf16>
    %cst_49 = arith.constant dense<0.000000e+00> : vector<2x384xf32>
    %156 = tpu.matmul %155, %45, %cst_49 {dimension_numbers = #tpu.dot_dimension_numbers<[1], [0], [0], [1], [0, 0, 1, 1], [], []>} : vector<2x128xbf16>, vector<128x384xbf16>, vector<2x384xf32> -> vector<2x384xf32>
    %157 = vector.broadcast %46 : vector<1x384xf32> to vector<2x384xf32>
    %158 = arith.addf %156, %157 : vector<2x384xf32>
    %159 = vector.extract_strided_slice %154 {offsets = [0, 0], sizes = [2, 128], strides = [1, 1]} : vector<2x384xf32> to vector<2x128xf32>
    %160 = vector.extract_strided_slice %158 {offsets = [0, 0], sizes = [2, 128], strides = [1, 1]} : vector<2x384xf32> to vector<2x128xf32>
    %161 = arith.addf %159, %160 : vector<2x128xf32>
    %162 = arith.negf %161 : vector<2x128xf32>
    %163 = math.exp %162 : vector<2x128xf32>
    %cst_50 = arith.constant 1.000000e+00 : f32
    %164 = vector.broadcast %cst_50 : f32 to vector<2x128xf32>
    %165 = arith.addf %164, %163 : vector<2x128xf32>
    %166 = arith.divf %164, %165 : vector<2x128xf32>
    %167 = vector.extract_strided_slice %154 {offsets = [0, 128], sizes = [2, 128], strides = [1, 1]} : vector<2x384xf32> to vector<2x128xf32>
    %168 = vector.extract_strided_slice %158 {offsets = [0, 128], sizes = [2, 128], strides = [1, 1]} : vector<2x384xf32> to vector<2x128xf32>
    %169 = arith.addf %167, %168 : vector<2x128xf32>
    %170 = arith.negf %169 : vector<2x128xf32>
    %171 = math.exp %170 : vector<2x128xf32>
    %cst_51 = arith.constant 1.000000e+00 : f32
    %172 = vector.broadcast %cst_51 : f32 to vector<2x128xf32>
    %173 = arith.addf %172, %171 : vector<2x128xf32>
    %174 = arith.divf %172, %173 : vector<2x128xf32>
    %175 = vector.extract_strided_slice %154 {offsets = [0, 256], sizes = [2, 128], strides = [1, 1]} : vector<2x384xf32> to vector<2x128xf32>
    %176 = vector.extract_strided_slice %158 {offsets = [0, 256], sizes = [2, 128], strides = [1, 1]} : vector<2x384xf32> to vector<2x128xf32>
    %177 = arith.mulf %166, %176 : vector<2x128xf32>
    %178 = arith.addf %175, %177 : vector<2x128xf32>
    %179 = math.tanh %178 : vector<2x128xf32>
    %cst_52 = arith.constant 1.000000e+00 : f32
    %180 = vector.broadcast %cst_52 : f32 to vector<2x128xf32>
    %181 = arith.subf %180, %174 : vector<2x128xf32>
    %182 = arith.mulf %181, %179 : vector<2x128xf32>
    %183 = arith.mulf %174, %149 : vector<2x128xf32>
    %184 = arith.addf %182, %183 : vector<2x128xf32>
    %c3 = arith.constant 3 : index
    %c0_53 = arith.constant 0 : index
    %c0_54 = arith.constant 0 : index
    %185 = vector.load %arg17[%c3, %c0_53, %c0_54] : memref<8x2x128xf32, #tpu.memory_space<vmem>>, vector<1x2x128xf32>
    %186 = vector.shape_cast %185 : vector<1x2x128xf32> to vector<2x128xf32>
    %187 = vector.shape_cast %184 : vector<2x128xf32> to vector<1x2x128xf32>
    tpu.vector_store %arg17[%c3, %c0_53, %c0_54], %187 {strides = array<i32>} : memref<8x2x128xf32, #tpu.memory_space<vmem>>, vector<1x2x128xf32>,
    %188 = vector.extract_strided_slice %44 {offsets = [0, 4, 0], sizes = [2, 1, 384], strides = [1, 1, 1]} : vector<2x8x384xf32> to vector<2x1x384xf32>
    %189 = vector.shape_cast %188 : vector<2x1x384xf32> to vector<2x384xf32>
    %190 = arith.truncf %184 : vector<2x128xf32> to vector<2x128xbf16>
    %cst_55 = arith.constant dense<0.000000e+00> : vector<2x384xf32>
    %191 = tpu.matmul %190, %45, %cst_55 {dimension_numbers = #tpu.dot_dimension_numbers<[1], [0], [0], [1], [0, 0, 1, 1], [], []>} : vector<2x128xbf16>, vector<128x384xbf16>, vector<2x384xf32> -> vector<2x384xf32>
    %192 = vector.broadcast %46 : vector<1x384xf32> to vector<2x384xf32>
    %193 = arith.addf %191, %192 : vector<2x384xf32>
    %194 = vector.extract_strided_slice %189 {offsets = [0, 0], sizes = [2, 128], strides = [1, 1]} : vector<2x384xf32> to vector<2x128xf32>
    %195 = vector.extract_strided_slice %193 {offsets = [0, 0], sizes = [2, 128], strides = [1, 1]} : vector<2x384xf32> to vector<2x128xf32>
    %196 = arith.addf %194, %195 : vector<2x128xf32>
    %197 = arith.negf %196 : vector<2x128xf32>
    %198 = math.exp %197 : vector<2x128xf32>
    %cst_56 = arith.constant 1.000000e+00 : f32
    %199 = vector.broadcast %cst_56 : f32 to vector<2x128xf32>
    %200 = arith.addf %199, %198 : vector<2x128xf32>
    %201 = arith.divf %199, %200 : vector<2x128xf32>
    %202 = vector.extract_strided_slice %189 {offsets = [0, 128], sizes = [2, 128], strides = [1, 1]} : vector<2x384xf32> to vector<2x128xf32>
    %203 = vector.extract_strided_slice %193 {offsets = [0, 128], sizes = [2, 128], strides = [1, 1]} : vector<2x384xf32> to vector<2x128xf32>
    %204 = arith.addf %202, %203 : vector<2x128xf32>
    %205 = arith.negf %204 : vector<2x128xf32>
    %206 = math.exp %205 : vector<2x128xf32>
    %cst_57 = arith.constant 1.000000e+00 : f32
    %207 = vector.broadcast %cst_57 : f32 to vector<2x128xf32>
    %208 = arith.addf %207, %206 : vector<2x128xf32>
    %209 = arith.divf %207, %208 : vector<2x128xf32>
    %210 = vector.extract_strided_slice %189 {offsets = [0, 256], sizes = [2, 128], strides = [1, 1]} : vector<2x384xf32> to vector<2x128xf32>
    %211 = vector.extract_strided_slice %193 {offsets = [0, 256], sizes = [2, 128], strides = [1, 1]} : vector<2x384xf32> to vector<2x128xf32>
    %212 = arith.mulf %201, %211 : vector<2x128xf32>
    %213 = arith.addf %210, %212 : vector<2x128xf32>
    %214 = math.tanh %213 : vector<2x128xf32>
    %cst_58 = arith.constant 1.000000e+00 : f32
    %215 = vector.broadcast %cst_58 : f32 to vector<2x128xf32>
    %216 = arith.subf %215, %209 : vector<2x128xf32>
    %217 = arith.mulf %216, %214 : vector<2x128xf32>
    %218 = arith.mulf %209, %184 : vector<2x128xf32>
    %219 = arith.addf %217, %218 : vector<2x128xf32>
    %c4 = arith.constant 4 : index
    %c0_59 = arith.constant 0 : index
    %c0_60 = arith.constant 0 : index
    %220 = vector.load %arg17[%c4, %c0_59, %c0_60] : memref<8x2x128xf32, #tpu.memory_space<vmem>>, vector<1x2x128xf32>
    %221 = vector.shape_cast %220 : vector<1x2x128xf32> to vector<2x128xf32>
    %222 = vector.shape_cast %219 : vector<2x128xf32> to vector<1x2x128xf32>
    tpu.vector_store %arg17[%c4, %c0_59, %c0_60], %222 {strides = array<i32>} : memref<8x2x128xf32, #tpu.memory_space<vmem>>, vector<1x2x128xf32>,
    %223 = vector.extract_strided_slice %44 {offsets = [0, 5, 0], sizes = [2, 1, 384], strides = [1, 1, 1]} : vector<2x8x384xf32> to vector<2x1x384xf32>
    %224 = vector.shape_cast %223 : vector<2x1x384xf32> to vector<2x384xf32>
    %225 = arith.truncf %219 : vector<2x128xf32> to vector<2x128xbf16>
    %cst_61 = arith.constant dense<0.000000e+00> : vector<2x384xf32>
    %226 = tpu.matmul %225, %45, %cst_61 {dimension_numbers = #tpu.dot_dimension_numbers<[1], [0], [0], [1], [0, 0, 1, 1], [], []>} : vector<2x128xbf16>, vector<128x384xbf16>, vector<2x384xf32> -> vector<2x384xf32>
    %227 = vector.broadcast %46 : vector<1x384xf32> to vector<2x384xf32>
    %228 = arith.addf %226, %227 : vector<2x384xf32>
    %229 = vector.extract_strided_slice %224 {offsets = [0, 0], sizes = [2, 128], strides = [1, 1]} : vector<2x384xf32> to vector<2x128xf32>
    %230 = vector.extract_strided_slice %228 {offsets = [0, 0], sizes = [2, 128], strides = [1, 1]} : vector<2x384xf32> to vector<2x128xf32>
    %231 = arith.addf %229, %230 : vector<2x128xf32>
    %232 = arith.negf %231 : vector<2x128xf32>
    %233 = math.exp %232 : vector<2x128xf32>
    %cst_62 = arith.constant 1.000000e+00 : f32
    %234 = vector.broadcast %cst_62 : f32 to vector<2x128xf32>
    %235 = arith.addf %234, %233 : vector<2x128xf32>
    %236 = arith.divf %234, %235 : vector<2x128xf32>
    %237 = vector.extract_strided_slice %224 {offsets = [0, 128], sizes = [2, 128], strides = [1, 1]} : vector<2x384xf32> to vector<2x128xf32>
    %238 = vector.extract_strided_slice %228 {offsets = [0, 128], sizes = [2, 128], strides = [1, 1]} : vector<2x384xf32> to vector<2x128xf32>
    %239 = arith.addf %237, %238 : vector<2x128xf32>
    %240 = arith.negf %239 : vector<2x128xf32>
    %241 = math.exp %240 : vector<2x128xf32>
    %cst_63 = arith.constant 1.000000e+00 : f32
    %242 = vector.broadcast %cst_63 : f32 to vector<2x128xf32>
    %243 = arith.addf %242, %241 : vector<2x128xf32>
    %244 = arith.divf %242, %243 : vector<2x128xf32>
    %245 = vector.extract_strided_slice %224 {offsets = [0, 256], sizes = [2, 128], strides = [1, 1]} : vector<2x384xf32> to vector<2x128xf32>
    %246 = vector.extract_strided_slice %228 {offsets = [0, 256], sizes = [2, 128], strides = [1, 1]} : vector<2x384xf32> to vector<2x128xf32>
    %247 = arith.mulf %236, %246 : vector<2x128xf32>
    %248 = arith.addf %245, %247 : vector<2x128xf32>
    %249 = math.tanh %248 : vector<2x128xf32>
    %cst_64 = arith.constant 1.000000e+00 : f32
    %250 = vector.broadcast %cst_64 : f32 to vector<2x128xf32>
    %251 = arith.subf %250, %244 : vector<2x128xf32>
    %252 = arith.mulf %251, %249 : vector<2x128xf32>
    %253 = arith.mulf %244, %219 : vector<2x128xf32>
    %254 = arith.addf %252, %253 : vector<2x128xf32>
    %c5 = arith.constant 5 : index
    %c0_65 = arith.constant 0 : index
    %c0_66 = arith.constant 0 : index
    %255 = vector.load %arg17[%c5, %c0_65, %c0_66] : memref<8x2x128xf32, #tpu.memory_space<vmem>>, vector<1x2x128xf32>
    %256 = vector.shape_cast %255 : vector<1x2x128xf32> to vector<2x128xf32>
    %257 = vector.shape_cast %254 : vector<2x128xf32> to vector<1x2x128xf32>
    tpu.vector_store %arg17[%c5, %c0_65, %c0_66], %257 {strides = array<i32>} : memref<8x2x128xf32, #tpu.memory_space<vmem>>, vector<1x2x128xf32>,
    %258 = vector.extract_strided_slice %44 {offsets = [0, 6, 0], sizes = [2, 1, 384], strides = [1, 1, 1]} : vector<2x8x384xf32> to vector<2x1x384xf32>
    %259 = vector.shape_cast %258 : vector<2x1x384xf32> to vector<2x384xf32>
    %260 = arith.truncf %254 : vector<2x128xf32> to vector<2x128xbf16>
    %cst_67 = arith.constant dense<0.000000e+00> : vector<2x384xf32>
    %261 = tpu.matmul %260, %45, %cst_67 {dimension_numbers = #tpu.dot_dimension_numbers<[1], [0], [0], [1], [0, 0, 1, 1], [], []>} : vector<2x128xbf16>, vector<128x384xbf16>, vector<2x384xf32> -> vector<2x384xf32>
    %262 = vector.broadcast %46 : vector<1x384xf32> to vector<2x384xf32>
    %263 = arith.addf %261, %262 : vector<2x384xf32>
    %264 = vector.extract_strided_slice %259 {offsets = [0, 0], sizes = [2, 128], strides = [1, 1]} : vector<2x384xf32> to vector<2x128xf32>
    %265 = vector.extract_strided_slice %263 {offsets = [0, 0], sizes = [2, 128], strides = [1, 1]} : vector<2x384xf32> to vector<2x128xf32>
    %266 = arith.addf %264, %265 : vector<2x128xf32>
    %267 = arith.negf %266 : vector<2x128xf32>
    %268 = math.exp %267 : vector<2x128xf32>
    %cst_68 = arith.constant 1.000000e+00 : f32
    %269 = vector.broadcast %cst_68 : f32 to vector<2x128xf32>
    %270 = arith.addf %269, %268 : vector<2x128xf32>
    %271 = arith.divf %269, %270 : vector<2x128xf32>
    %272 = vector.extract_strided_slice %259 {offsets = [0, 128], sizes = [2, 128], strides = [1, 1]} : vector<2x384xf32> to vector<2x128xf32>
    %273 = vector.extract_strided_slice %263 {offsets = [0, 128], sizes = [2, 128], strides = [1, 1]} : vector<2x384xf32> to vector<2x128xf32>
    %274 = arith.addf %272, %273 : vector<2x128xf32>
    %275 = arith.negf %274 : vector<2x128xf32>
    %276 = math.exp %275 : vector<2x128xf32>
    %cst_69 = arith.constant 1.000000e+00 : f32
    %277 = vector.broadcast %cst_69 : f32 to vector<2x128xf32>
    %278 = arith.addf %277, %276 : vector<2x128xf32>
    %279 = arith.divf %277, %278 : vector<2x128xf32>
    %280 = vector.extract_strided_slice %259 {offsets = [0, 256], sizes = [2, 128], strides = [1, 1]} : vector<2x384xf32> to vector<2x128xf32>
    %281 = vector.extract_strided_slice %263 {offsets = [0, 256], sizes = [2, 128], strides = [1, 1]} : vector<2x384xf32> to vector<2x128xf32>
    %282 = arith.mulf %271, %281 : vector<2x128xf32>
    %283 = arith.addf %280, %282 : vector<2x128xf32>
    %284 = math.tanh %283 : vector<2x128xf32>
    %cst_70 = arith.constant 1.000000e+00 : f32
    %285 = vector.broadcast %cst_70 : f32 to vector<2x128xf32>
    %286 = arith.subf %285, %279 : vector<2x128xf32>
    %287 = arith.mulf %286, %284 : vector<2x128xf32>
    %288 = arith.mulf %279, %254 : vector<2x128xf32>
    %289 = arith.addf %287, %288 : vector<2x128xf32>
    %c6 = arith.constant 6 : index
    %c0_71 = arith.constant 0 : index
    %c0_72 = arith.constant 0 : index
    %290 = vector.load %arg17[%c6, %c0_71, %c0_72] : memref<8x2x128xf32, #tpu.memory_space<vmem>>, vector<1x2x128xf32>
    %291 = vector.shape_cast %290 : vector<1x2x128xf32> to vector<2x128xf32>
    %292 = vector.shape_cast %289 : vector<2x128xf32> to vector<1x2x128xf32>
    tpu.vector_store %arg17[%c6, %c0_71, %c0_72], %292 {strides = array<i32>} : memref<8x2x128xf32, #tpu.memory_space<vmem>>, vector<1x2x128xf32>,
    %293 = vector.extract_strided_slice %44 {offsets = [0, 7, 0], sizes = [2, 1, 384], strides = [1, 1, 1]} : vector<2x8x384xf32> to vector<2x1x384xf32>
    %294 = vector.shape_cast %293 : vector<2x1x384xf32> to vector<2x384xf32>
    %295 = arith.truncf %289 : vector<2x128xf32> to vector<2x128xbf16>
    %cst_73 = arith.constant dense<0.000000e+00> : vector<2x384xf32>
    %296 = tpu.matmul %295, %45, %cst_73 {dimension_numbers = #tpu.dot_dimension_numbers<[1], [0], [0], [1], [0, 0, 1, 1], [], []>} : vector<2x128xbf16>, vector<128x384xbf16>, vector<2x384xf32> -> vector<2x384xf32>
    %297 = vector.broadcast %46 : vector<1x384xf32> to vector<2x384xf32>
    %298 = arith.addf %296, %297 : vector<2x384xf32>
    %299 = vector.extract_strided_slice %294 {offsets = [0, 0], sizes = [2, 128], strides = [1, 1]} : vector<2x384xf32> to vector<2x128xf32>
    %300 = vector.extract_strided_slice %298 {offsets = [0, 0], sizes = [2, 128], strides = [1, 1]} : vector<2x384xf32> to vector<2x128xf32>
    %301 = arith.addf %299, %300 : vector<2x128xf32>
    %302 = arith.negf %301 : vector<2x128xf32>
    %303 = math.exp %302 : vector<2x128xf32>
    %cst_74 = arith.constant 1.000000e+00 : f32
    %304 = vector.broadcast %cst_74 : f32 to vector<2x128xf32>
    %305 = arith.addf %304, %303 : vector<2x128xf32>
    %306 = arith.divf %304, %305 : vector<2x128xf32>
    %307 = vector.extract_strided_slice %294 {offsets = [0, 128], sizes = [2, 128], strides = [1, 1]} : vector<2x384xf32> to vector<2x128xf32>
    %308 = vector.extract_strided_slice %298 {offsets = [0, 128], sizes = [2, 128], strides = [1, 1]} : vector<2x384xf32> to vector<2x128xf32>
    %309 = arith.addf %307, %308 : vector<2x128xf32>
    %310 = arith.negf %309 : vector<2x128xf32>
    %311 = math.exp %310 : vector<2x128xf32>
    %cst_75 = arith.constant 1.000000e+00 : f32
    %312 = vector.broadcast %cst_75 : f32 to vector<2x128xf32>
    %313 = arith.addf %312, %311 : vector<2x128xf32>
    %314 = arith.divf %312, %313 : vector<2x128xf32>
    %315 = vector.extract_strided_slice %294 {offsets = [0, 256], sizes = [2, 128], strides = [1, 1]} : vector<2x384xf32> to vector<2x128xf32>
    %316 = vector.extract_strided_slice %298 {offsets = [0, 256], sizes = [2, 128], strides = [1, 1]} : vector<2x384xf32> to vector<2x128xf32>
    %317 = arith.mulf %306, %316 : vector<2x128xf32>
    %318 = arith.addf %315, %317 : vector<2x128xf32>
    %319 = math.tanh %318 : vector<2x128xf32>
    %cst_76 = arith.constant 1.000000e+00 : f32
    %320 = vector.broadcast %cst_76 : f32 to vector<2x128xf32>
    %321 = arith.subf %320, %314 : vector<2x128xf32>
    %322 = arith.mulf %321, %319 : vector<2x128xf32>
    %323 = arith.mulf %314, %289 : vector<2x128xf32>
    %324 = arith.addf %322, %323 : vector<2x128xf32>
    %c7 = arith.constant 7 : index
    %c0_77 = arith.constant 0 : index
    %c0_78 = arith.constant 0 : index
    %325 = vector.load %arg17[%c7, %c0_77, %c0_78] : memref<8x2x128xf32, #tpu.memory_space<vmem>>, vector<1x2x128xf32>
    %326 = vector.shape_cast %325 : vector<1x2x128xf32> to vector<2x128xf32>
    %327 = vector.shape_cast %324 : vector<2x128xf32> to vector<1x2x128xf32>
    tpu.vector_store %arg17[%c7, %c0_77, %c0_78], %327 {strides = array<i32>} : memref<8x2x128xf32, #tpu.memory_space<vmem>>, vector<1x2x128xf32>,
    %c0_79 = arith.constant 0 : index
    %c0_80 = arith.constant 0 : index
    %c0_81 = arith.constant 0 : index
    %328 = vector.load %arg17[%c0_79, %c0_80, %c0_81] : memref<8x2x128xf32, #tpu.memory_space<vmem>>, vector<8x2x128xf32>
    %329 = vector.shape_cast %328 : vector<8x2x128xf32> to vector<16x128xf32>
    %330 = arith.truncf %329 : vector<16x128xf32> to vector<16x128xbf16>
    %c0_82 = arith.constant 0 : index
    %c0_83 = arith.constant 0 : index
    %331 = vector.load %arg10[%c0_82, %c0_83] : memref<128x384xbf16, #tpu.memory_space<vmem>>, vector<128x384xbf16>
    %cst_84 = arith.constant dense<0.000000e+00> : vector<16x384xf32>
    %332 = tpu.matmul %330, %331, %cst_84 {dimension_numbers = #tpu.dot_dimension_numbers<[1], [0], [0], [1], [0, 0, 1, 1], [], []>} : vector<16x128xbf16>, vector<128x384xbf16>, vector<16x384xf32> -> vector<16x384xf32>
    %c0_85 = arith.constant 0 : index
    %c0_86 = arith.constant 0 : index
    %333 = vector.load %arg12[%c0_85, %c0_86] : memref<1x384xf32, #tpu.memory_space<vmem>>, vector<1x384xf32>
    %334 = vector.broadcast %333 : vector<1x384xf32> to vector<16x384xf32>
    %335 = arith.addf %332, %334 : vector<16x384xf32>
    %336 = vector.shape_cast %335 : vector<16x384xf32> to vector<8x2x384xf32>
    %c0_87 = arith.constant 0 : index
    %c0_88 = arith.constant 0 : index
    %337 = vector.load %arg11[%c0_87, %c0_88] : memref<128x384xbf16, #tpu.memory_space<vmem>>, vector<128x384xbf16>
    %c0_89 = arith.constant 0 : index
    %c0_90 = arith.constant 0 : index
    %338 = vector.load %arg13[%c0_89, %c0_90] : memref<1x384xf32, #tpu.memory_space<vmem>>, vector<1x384xf32>
    %cst_91 = arith.constant 0.000000e+00 : f32
    %339 = vector.broadcast %cst_91 : f32 to vector<2x128xf32>
    %340 = vector.extract_strided_slice %336 {offsets = [0, 0, 0], sizes = [1, 2, 384], strides = [1, 1, 1]} : vector<8x2x384xf32> to vector<1x2x384xf32>
    %341 = vector.shape_cast %340 : vector<1x2x384xf32> to vector<2x384xf32>
    %342 = arith.truncf %339 : vector<2x128xf32> to vector<2x128xbf16>
    %cst_92 = arith.constant dense<0.000000e+00> : vector<2x384xf32>
    %343 = tpu.matmul %342, %337, %cst_92 {dimension_numbers = #tpu.dot_dimension_numbers<[1], [0], [0], [1], [0, 0, 1, 1], [], []>} : vector<2x128xbf16>, vector<128x384xbf16>, vector<2x384xf32> -> vector<2x384xf32>
    %344 = vector.broadcast %338 : vector<1x384xf32> to vector<2x384xf32>
    %345 = arith.addf %343, %344 : vector<2x384xf32>
    %346 = vector.extract_strided_slice %341 {offsets = [0, 0], sizes = [2, 128], strides = [1, 1]} : vector<2x384xf32> to vector<2x128xf32>
    %347 = vector.extract_strided_slice %345 {offsets = [0, 0], sizes = [2, 128], strides = [1, 1]} : vector<2x384xf32> to vector<2x128xf32>
    %348 = arith.addf %346, %347 : vector<2x128xf32>
    %349 = arith.negf %348 : vector<2x128xf32>
    %350 = math.exp %349 : vector<2x128xf32>
    %cst_93 = arith.constant 1.000000e+00 : f32
    %351 = vector.broadcast %cst_93 : f32 to vector<2x128xf32>
    %352 = arith.addf %351, %350 : vector<2x128xf32>
    %353 = arith.divf %351, %352 : vector<2x128xf32>
    %354 = vector.extract_strided_slice %341 {offsets = [0, 128], sizes = [2, 128], strides = [1, 1]} : vector<2x384xf32> to vector<2x128xf32>
    %355 = vector.extract_strided_slice %345 {offsets = [0, 128], sizes = [2, 128], strides = [1, 1]} : vector<2x384xf32> to vector<2x128xf32>
    %356 = arith.addf %354, %355 : vector<2x128xf32>
    %357 = arith.negf %356 : vector<2x128xf32>
    %358 = math.exp %357 : vector<2x128xf32>
    %cst_94 = arith.constant 1.000000e+00 : f32
    %359 = vector.broadcast %cst_94 : f32 to vector<2x128xf32>
    %360 = arith.addf %359, %358 : vector<2x128xf32>
    %361 = arith.divf %359, %360 : vector<2x128xf32>
    %362 = vector.extract_strided_slice %341 {offsets = [0, 256], sizes = [2, 128], strides = [1, 1]} : vector<2x384xf32> to vector<2x128xf32>
    %363 = vector.extract_strided_slice %345 {offsets = [0, 256], sizes = [2, 128], strides = [1, 1]} : vector<2x384xf32> to vector<2x128xf32>
    %364 = arith.mulf %353, %363 : vector<2x128xf32>
    %365 = arith.addf %362, %364 : vector<2x128xf32>
    %366 = math.tanh %365 : vector<2x128xf32>
    %cst_95 = arith.constant 1.000000e+00 : f32
    %367 = vector.broadcast %cst_95 : f32 to vector<2x128xf32>
    %368 = arith.subf %367, %361 : vector<2x128xf32>
    %369 = arith.mulf %368, %366 : vector<2x128xf32>
    %370 = arith.mulf %361, %339 : vector<2x128xf32>
    %371 = arith.addf %369, %370 : vector<2x128xf32>
    %c0_96 = arith.constant 0 : index
    %c0_97 = arith.constant 0 : index
    %c0_98 = arith.constant 0 : index
    %372 = vector.load %arg18[%c0_96, %c0_97, %c0_98] : memref<8x2x128xf32, #tpu.memory_space<vmem>>, vector<1x2x128xf32>
    %373 = vector.shape_cast %372 : vector<1x2x128xf32> to vector<2x128xf32>
    %374 = vector.shape_cast %371 : vector<2x128xf32> to vector<1x2x128xf32>
    tpu.vector_store %arg18[%c0_96, %c0_97, %c0_98], %374 {strides = array<i32>} : memref<8x2x128xf32, #tpu.memory_space<vmem>>, vector<1x2x128xf32>,
    %375 = vector.extract_strided_slice %336 {offsets = [1, 0, 0], sizes = [1, 2, 384], strides = [1, 1, 1]} : vector<8x2x384xf32> to vector<1x2x384xf32>
    %376 = vector.shape_cast %375 : vector<1x2x384xf32> to vector<2x384xf32>
    %377 = arith.truncf %371 : vector<2x128xf32> to vector<2x128xbf16>
    %cst_99 = arith.constant dense<0.000000e+00> : vector<2x384xf32>
    %378 = tpu.matmul %377, %337, %cst_99 {dimension_numbers = #tpu.dot_dimension_numbers<[1], [0], [0], [1], [0, 0, 1, 1], [], []>} : vector<2x128xbf16>, vector<128x384xbf16>, vector<2x384xf32> -> vector<2x384xf32>
    %379 = vector.broadcast %338 : vector<1x384xf32> to vector<2x384xf32>
    %380 = arith.addf %378, %379 : vector<2x384xf32>
    %381 = vector.extract_strided_slice %376 {offsets = [0, 0], sizes = [2, 128], strides = [1, 1]} : vector<2x384xf32> to vector<2x128xf32>
    %382 = vector.extract_strided_slice %380 {offsets = [0, 0], sizes = [2, 128], strides = [1, 1]} : vector<2x384xf32> to vector<2x128xf32>
    %383 = arith.addf %381, %382 : vector<2x128xf32>
    %384 = arith.negf %383 : vector<2x128xf32>
    %385 = math.exp %384 : vector<2x128xf32>
    %cst_100 = arith.constant 1.000000e+00 : f32
    %386 = vector.broadcast %cst_100 : f32 to vector<2x128xf32>
    %387 = arith.addf %386, %385 : vector<2x128xf32>
    %388 = arith.divf %386, %387 : vector<2x128xf32>
    %389 = vector.extract_strided_slice %376 {offsets = [0, 128], sizes = [2, 128], strides = [1, 1]} : vector<2x384xf32> to vector<2x128xf32>
    %390 = vector.extract_strided_slice %380 {offsets = [0, 128], sizes = [2, 128], strides = [1, 1]} : vector<2x384xf32> to vector<2x128xf32>
    %391 = arith.addf %389, %390 : vector<2x128xf32>
    %392 = arith.negf %391 : vector<2x128xf32>
    %393 = math.exp %392 : vector<2x128xf32>
    %cst_101 = arith.constant 1.000000e+00 : f32
    %394 = vector.broadcast %cst_101 : f32 to vector<2x128xf32>
    %395 = arith.addf %394, %393 : vector<2x128xf32>
    %396 = arith.divf %394, %395 : vector<2x128xf32>
    %397 = vector.extract_strided_slice %376 {offsets = [0, 256], sizes = [2, 128], strides = [1, 1]} : vector<2x384xf32> to vector<2x128xf32>
    %398 = vector.extract_strided_slice %380 {offsets = [0, 256], sizes = [2, 128], strides = [1, 1]} : vector<2x384xf32> to vector<2x128xf32>
    %399 = arith.mulf %388, %398 : vector<2x128xf32>
    %400 = arith.addf %397, %399 : vector<2x128xf32>
    %401 = math.tanh %400 : vector<2x128xf32>
    %cst_102 = arith.constant 1.000000e+00 : f32
    %402 = vector.broadcast %cst_102 : f32 to vector<2x128xf32>
    %403 = arith.subf %402, %396 : vector<2x128xf32>
    %404 = arith.mulf %403, %401 : vector<2x128xf32>
    %405 = arith.mulf %396, %371 : vector<2x128xf32>
    %406 = arith.addf %404, %405 : vector<2x128xf32>
    %c1_103 = arith.constant 1 : index
    %c0_104 = arith.constant 0 : index
    %c0_105 = arith.constant 0 : index
    %407 = vector.load %arg18[%c1_103, %c0_104, %c0_105] : memref<8x2x128xf32, #tpu.memory_space<vmem>>, vector<1x2x128xf32>
    %408 = vector.shape_cast %407 : vector<1x2x128xf32> to vector<2x128xf32>
    %409 = vector.shape_cast %406 : vector<2x128xf32> to vector<1x2x128xf32>
    tpu.vector_store %arg18[%c1_103, %c0_104, %c0_105], %409 {strides = array<i32>} : memref<8x2x128xf32, #tpu.memory_space<vmem>>, vector<1x2x128xf32>,
    %410 = vector.extract_strided_slice %336 {offsets = [2, 0, 0], sizes = [1, 2, 384], strides = [1, 1, 1]} : vector<8x2x384xf32> to vector<1x2x384xf32>
    %411 = vector.shape_cast %410 : vector<1x2x384xf32> to vector<2x384xf32>
    %412 = arith.truncf %406 : vector<2x128xf32> to vector<2x128xbf16>
    %cst_106 = arith.constant dense<0.000000e+00> : vector<2x384xf32>
    %413 = tpu.matmul %412, %337, %cst_106 {dimension_numbers = #tpu.dot_dimension_numbers<[1], [0], [0], [1], [0, 0, 1, 1], [], []>} : vector<2x128xbf16>, vector<128x384xbf16>, vector<2x384xf32> -> vector<2x384xf32>
    %414 = vector.broadcast %338 : vector<1x384xf32> to vector<2x384xf32>
    %415 = arith.addf %413, %414 : vector<2x384xf32>
    %416 = vector.extract_strided_slice %411 {offsets = [0, 0], sizes = [2, 128], strides = [1, 1]} : vector<2x384xf32> to vector<2x128xf32>
    %417 = vector.extract_strided_slice %415 {offsets = [0, 0], sizes = [2, 128], strides = [1, 1]} : vector<2x384xf32> to vector<2x128xf32>
    %418 = arith.addf %416, %417 : vector<2x128xf32>
    %419 = arith.negf %418 : vector<2x128xf32>
    %420 = math.exp %419 : vector<2x128xf32>
    %cst_107 = arith.constant 1.000000e+00 : f32
    %421 = vector.broadcast %cst_107 : f32 to vector<2x128xf32>
    %422 = arith.addf %421, %420 : vector<2x128xf32>
    %423 = arith.divf %421, %422 : vector<2x128xf32>
    %424 = vector.extract_strided_slice %411 {offsets = [0, 128], sizes = [2, 128], strides = [1, 1]} : vector<2x384xf32> to vector<2x128xf32>
    %425 = vector.extract_strided_slice %415 {offsets = [0, 128], sizes = [2, 128], strides = [1, 1]} : vector<2x384xf32> to vector<2x128xf32>
    %426 = arith.addf %424, %425 : vector<2x128xf32>
    %427 = arith.negf %426 : vector<2x128xf32>
    %428 = math.exp %427 : vector<2x128xf32>
    %cst_108 = arith.constant 1.000000e+00 : f32
    %429 = vector.broadcast %cst_108 : f32 to vector<2x128xf32>
    %430 = arith.addf %429, %428 : vector<2x128xf32>
    %431 = arith.divf %429, %430 : vector<2x128xf32>
    %432 = vector.extract_strided_slice %411 {offsets = [0, 256], sizes = [2, 128], strides = [1, 1]} : vector<2x384xf32> to vector<2x128xf32>
    %433 = vector.extract_strided_slice %415 {offsets = [0, 256], sizes = [2, 128], strides = [1, 1]} : vector<2x384xf32> to vector<2x128xf32>
    %434 = arith.mulf %423, %433 : vector<2x128xf32>
    %435 = arith.addf %432, %434 : vector<2x128xf32>
    %436 = math.tanh %435 : vector<2x128xf32>
    %cst_109 = arith.constant 1.000000e+00 : f32
    %437 = vector.broadcast %cst_109 : f32 to vector<2x128xf32>
    %438 = arith.subf %437, %431 : vector<2x128xf32>
    %439 = arith.mulf %438, %436 : vector<2x128xf32>
    %440 = arith.mulf %431, %406 : vector<2x128xf32>
    %441 = arith.addf %439, %440 : vector<2x128xf32>
    %c2_110 = arith.constant 2 : index
    %c0_111 = arith.constant 0 : index
    %c0_112 = arith.constant 0 : index
    %442 = vector.load %arg18[%c2_110, %c0_111, %c0_112] : memref<8x2x128xf32, #tpu.memory_space<vmem>>, vector<1x2x128xf32>
    %443 = vector.shape_cast %442 : vector<1x2x128xf32> to vector<2x128xf32>
    %444 = vector.shape_cast %441 : vector<2x128xf32> to vector<1x2x128xf32>
    tpu.vector_store %arg18[%c2_110, %c0_111, %c0_112], %444 {strides = array<i32>} : memref<8x2x128xf32, #tpu.memory_space<vmem>>, vector<1x2x128xf32>,
    %445 = vector.extract_strided_slice %336 {offsets = [3, 0, 0], sizes = [1, 2, 384], strides = [1, 1, 1]} : vector<8x2x384xf32> to vector<1x2x384xf32>
    %446 = vector.shape_cast %445 : vector<1x2x384xf32> to vector<2x384xf32>
    %447 = arith.truncf %441 : vector<2x128xf32> to vector<2x128xbf16>
    %cst_113 = arith.constant dense<0.000000e+00> : vector<2x384xf32>
    %448 = tpu.matmul %447, %337, %cst_113 {dimension_numbers = #tpu.dot_dimension_numbers<[1], [0], [0], [1], [0, 0, 1, 1], [], []>} : vector<2x128xbf16>, vector<128x384xbf16>, vector<2x384xf32> -> vector<2x384xf32>
    %449 = vector.broadcast %338 : vector<1x384xf32> to vector<2x384xf32>
    %450 = arith.addf %448, %449 : vector<2x384xf32>
    %451 = vector.extract_strided_slice %446 {offsets = [0, 0], sizes = [2, 128], strides = [1, 1]} : vector<2x384xf32> to vector<2x128xf32>
    %452 = vector.extract_strided_slice %450 {offsets = [0, 0], sizes = [2, 128], strides = [1, 1]} : vector<2x384xf32> to vector<2x128xf32>
    %453 = arith.addf %451, %452 : vector<2x128xf32>
    %454 = arith.negf %453 : vector<2x128xf32>
    %455 = math.exp %454 : vector<2x128xf32>
    %cst_114 = arith.constant 1.000000e+00 : f32
    %456 = vector.broadcast %cst_114 : f32 to vector<2x128xf32>
    %457 = arith.addf %456, %455 : vector<2x128xf32>
    %458 = arith.divf %456, %457 : vector<2x128xf32>
    %459 = vector.extract_strided_slice %446 {offsets = [0, 128], sizes = [2, 128], strides = [1, 1]} : vector<2x384xf32> to vector<2x128xf32>
    %460 = vector.extract_strided_slice %450 {offsets = [0, 128], sizes = [2, 128], strides = [1, 1]} : vector<2x384xf32> to vector<2x128xf32>
    %461 = arith.addf %459, %460 : vector<2x128xf32>
    %462 = arith.negf %461 : vector<2x128xf32>
    %463 = math.exp %462 : vector<2x128xf32>
    %cst_115 = arith.constant 1.000000e+00 : f32
    %464 = vector.broadcast %cst_115 : f32 to vector<2x128xf32>
    %465 = arith.addf %464, %463 : vector<2x128xf32>
    %466 = arith.divf %464, %465 : vector<2x128xf32>
    %467 = vector.extract_strided_slice %446 {offsets = [0, 256], sizes = [2, 128], strides = [1, 1]} : vector<2x384xf32> to vector<2x128xf32>
    %468 = vector.extract_strided_slice %450 {offsets = [0, 256], sizes = [2, 128], strides = [1, 1]} : vector<2x384xf32> to vector<2x128xf32>
    %469 = arith.mulf %458, %468 : vector<2x128xf32>
    %470 = arith.addf %467, %469 : vector<2x128xf32>
    %471 = math.tanh %470 : vector<2x128xf32>
    %cst_116 = arith.constant 1.000000e+00 : f32
    %472 = vector.broadcast %cst_116 : f32 to vector<2x128xf32>
    %473 = arith.subf %472, %466 : vector<2x128xf32>
    %474 = arith.mulf %473, %471 : vector<2x128xf32>
    %475 = arith.mulf %466, %441 : vector<2x128xf32>
    %476 = arith.addf %474, %475 : vector<2x128xf32>
    %c3_117 = arith.constant 3 : index
    %c0_118 = arith.constant 0 : index
    %c0_119 = arith.constant 0 : index
    %477 = vector.load %arg18[%c3_117, %c0_118, %c0_119] : memref<8x2x128xf32, #tpu.memory_space<vmem>>, vector<1x2x128xf32>
    %478 = vector.shape_cast %477 : vector<1x2x128xf32> to vector<2x128xf32>
    %479 = vector.shape_cast %476 : vector<2x128xf32> to vector<1x2x128xf32>
    tpu.vector_store %arg18[%c3_117, %c0_118, %c0_119], %479 {strides = array<i32>} : memref<8x2x128xf32, #tpu.memory_space<vmem>>, vector<1x2x128xf32>,
    %480 = vector.extract_strided_slice %336 {offsets = [4, 0, 0], sizes = [1, 2, 384], strides = [1, 1, 1]} : vector<8x2x384xf32> to vector<1x2x384xf32>
    %481 = vector.shape_cast %480 : vector<1x2x384xf32> to vector<2x384xf32>
    %482 = arith.truncf %476 : vector<2x128xf32> to vector<2x128xbf16>
    %cst_120 = arith.constant dense<0.000000e+00> : vector<2x384xf32>
    %483 = tpu.matmul %482, %337, %cst_120 {dimension_numbers = #tpu.dot_dimension_numbers<[1], [0], [0], [1], [0, 0, 1, 1], [], []>} : vector<2x128xbf16>, vector<128x384xbf16>, vector<2x384xf32> -> vector<2x384xf32>
    %484 = vector.broadcast %338 : vector<1x384xf32> to vector<2x384xf32>
    %485 = arith.addf %483, %484 : vector<2x384xf32>
    %486 = vector.extract_strided_slice %481 {offsets = [0, 0], sizes = [2, 128], strides = [1, 1]} : vector<2x384xf32> to vector<2x128xf32>
    %487 = vector.extract_strided_slice %485 {offsets = [0, 0], sizes = [2, 128], strides = [1, 1]} : vector<2x384xf32> to vector<2x128xf32>
    %488 = arith.addf %486, %487 : vector<2x128xf32>
    %489 = arith.negf %488 : vector<2x128xf32>
    %490 = math.exp %489 : vector<2x128xf32>
    %cst_121 = arith.constant 1.000000e+00 : f32
    %491 = vector.broadcast %cst_121 : f32 to vector<2x128xf32>
    %492 = arith.addf %491, %490 : vector<2x128xf32>
    %493 = arith.divf %491, %492 : vector<2x128xf32>
    %494 = vector.extract_strided_slice %481 {offsets = [0, 128], sizes = [2, 128], strides = [1, 1]} : vector<2x384xf32> to vector<2x128xf32>
    %495 = vector.extract_strided_slice %485 {offsets = [0, 128], sizes = [2, 128], strides = [1, 1]} : vector<2x384xf32> to vector<2x128xf32>
    %496 = arith.addf %494, %495 : vector<2x128xf32>
    %497 = arith.negf %496 : vector<2x128xf32>
    %498 = math.exp %497 : vector<2x128xf32>
    %cst_122 = arith.constant 1.000000e+00 : f32
    %499 = vector.broadcast %cst_122 : f32 to vector<2x128xf32>
    %500 = arith.addf %499, %498 : vector<2x128xf32>
    %501 = arith.divf %499, %500 : vector<2x128xf32>
    %502 = vector.extract_strided_slice %481 {offsets = [0, 256], sizes = [2, 128], strides = [1, 1]} : vector<2x384xf32> to vector<2x128xf32>
    %503 = vector.extract_strided_slice %485 {offsets = [0, 256], sizes = [2, 128], strides = [1, 1]} : vector<2x384xf32> to vector<2x128xf32>
    %504 = arith.mulf %493, %503 : vector<2x128xf32>
    %505 = arith.addf %502, %504 : vector<2x128xf32>
    %506 = math.tanh %505 : vector<2x128xf32>
    %cst_123 = arith.constant 1.000000e+00 : f32
    %507 = vector.broadcast %cst_123 : f32 to vector<2x128xf32>
    %508 = arith.subf %507, %501 : vector<2x128xf32>
    %509 = arith.mulf %508, %506 : vector<2x128xf32>
    %510 = arith.mulf %501, %476 : vector<2x128xf32>
    %511 = arith.addf %509, %510 : vector<2x128xf32>
    %c4_124 = arith.constant 4 : index
    %c0_125 = arith.constant 0 : index
    %c0_126 = arith.constant 0 : index
    %512 = vector.load %arg18[%c4_124, %c0_125, %c0_126] : memref<8x2x128xf32, #tpu.memory_space<vmem>>, vector<1x2x128xf32>
    %513 = vector.shape_cast %512 : vector<1x2x128xf32> to vector<2x128xf32>
    %514 = vector.shape_cast %511 : vector<2x128xf32> to vector<1x2x128xf32>
    tpu.vector_store %arg18[%c4_124, %c0_125, %c0_126], %514 {strides = array<i32>} : memref<8x2x128xf32, #tpu.memory_space<vmem>>, vector<1x2x128xf32>,
    %515 = vector.extract_strided_slice %336 {offsets = [5, 0, 0], sizes = [1, 2, 384], strides = [1, 1, 1]} : vector<8x2x384xf32> to vector<1x2x384xf32>
    %516 = vector.shape_cast %515 : vector<1x2x384xf32> to vector<2x384xf32>
    %517 = arith.truncf %511 : vector<2x128xf32> to vector<2x128xbf16>
    %cst_127 = arith.constant dense<0.000000e+00> : vector<2x384xf32>
    %518 = tpu.matmul %517, %337, %cst_127 {dimension_numbers = #tpu.dot_dimension_numbers<[1], [0], [0], [1], [0, 0, 1, 1], [], []>} : vector<2x128xbf16>, vector<128x384xbf16>, vector<2x384xf32> -> vector<2x384xf32>
    %519 = vector.broadcast %338 : vector<1x384xf32> to vector<2x384xf32>
    %520 = arith.addf %518, %519 : vector<2x384xf32>
    %521 = vector.extract_strided_slice %516 {offsets = [0, 0], sizes = [2, 128], strides = [1, 1]} : vector<2x384xf32> to vector<2x128xf32>
    %522 = vector.extract_strided_slice %520 {offsets = [0, 0], sizes = [2, 128], strides = [1, 1]} : vector<2x384xf32> to vector<2x128xf32>
    %523 = arith.addf %521, %522 : vector<2x128xf32>
    %524 = arith.negf %523 : vector<2x128xf32>
    %525 = math.exp %524 : vector<2x128xf32>
    %cst_128 = arith.constant 1.000000e+00 : f32
    %526 = vector.broadcast %cst_128 : f32 to vector<2x128xf32>
    %527 = arith.addf %526, %525 : vector<2x128xf32>
    %528 = arith.divf %526, %527 : vector<2x128xf32>
    %529 = vector.extract_strided_slice %516 {offsets = [0, 128], sizes = [2, 128], strides = [1, 1]} : vector<2x384xf32> to vector<2x128xf32>
    %530 = vector.extract_strided_slice %520 {offsets = [0, 128], sizes = [2, 128], strides = [1, 1]} : vector<2x384xf32> to vector<2x128xf32>
    %531 = arith.addf %529, %530 : vector<2x128xf32>
    %532 = arith.negf %531 : vector<2x128xf32>
    %533 = math.exp %532 : vector<2x128xf32>
    %cst_129 = arith.constant 1.000000e+00 : f32
    %534 = vector.broadcast %cst_129 : f32 to vector<2x128xf32>
    %535 = arith.addf %534, %533 : vector<2x128xf32>
    %536 = arith.divf %534, %535 : vector<2x128xf32>
    %537 = vector.extract_strided_slice %516 {offsets = [0, 256], sizes = [2, 128], strides = [1, 1]} : vector<2x384xf32> to vector<2x128xf32>
    %538 = vector.extract_strided_slice %520 {offsets = [0, 256], sizes = [2, 128], strides = [1, 1]} : vector<2x384xf32> to vector<2x128xf32>
    %539 = arith.mulf %528, %538 : vector<2x128xf32>
    %540 = arith.addf %537, %539 : vector<2x128xf32>
    %541 = math.tanh %540 : vector<2x128xf32>
    %cst_130 = arith.constant 1.000000e+00 : f32
    %542 = vector.broadcast %cst_130 : f32 to vector<2x128xf32>
    %543 = arith.subf %542, %536 : vector<2x128xf32>
    %544 = arith.mulf %543, %541 : vector<2x128xf32>
    %545 = arith.mulf %536, %511 : vector<2x128xf32>
    %546 = arith.addf %544, %545 : vector<2x128xf32>
    %c5_131 = arith.constant 5 : index
    %c0_132 = arith.constant 0 : index
    %c0_133 = arith.constant 0 : index
    %547 = vector.load %arg18[%c5_131, %c0_132, %c0_133] : memref<8x2x128xf32, #tpu.memory_space<vmem>>, vector<1x2x128xf32>
    %548 = vector.shape_cast %547 : vector<1x2x128xf32> to vector<2x128xf32>
    %549 = vector.shape_cast %546 : vector<2x128xf32> to vector<1x2x128xf32>
    tpu.vector_store %arg18[%c5_131, %c0_132, %c0_133], %549 {strides = array<i32>} : memref<8x2x128xf32, #tpu.memory_space<vmem>>, vector<1x2x128xf32>,
    %550 = vector.extract_strided_slice %336 {offsets = [6, 0, 0], sizes = [1, 2, 384], strides = [1, 1, 1]} : vector<8x2x384xf32> to vector<1x2x384xf32>
    %551 = vector.shape_cast %550 : vector<1x2x384xf32> to vector<2x384xf32>
    %552 = arith.truncf %546 : vector<2x128xf32> to vector<2x128xbf16>
    %cst_134 = arith.constant dense<0.000000e+00> : vector<2x384xf32>
    %553 = tpu.matmul %552, %337, %cst_134 {dimension_numbers = #tpu.dot_dimension_numbers<[1], [0], [0], [1], [0, 0, 1, 1], [], []>} : vector<2x128xbf16>, vector<128x384xbf16>, vector<2x384xf32> -> vector<2x384xf32>
    %554 = vector.broadcast %338 : vector<1x384xf32> to vector<2x384xf32>
    %555 = arith.addf %553, %554 : vector<2x384xf32>
    %556 = vector.extract_strided_slice %551 {offsets = [0, 0], sizes = [2, 128], strides = [1, 1]} : vector<2x384xf32> to vector<2x128xf32>
    %557 = vector.extract_strided_slice %555 {offsets = [0, 0], sizes = [2, 128], strides = [1, 1]} : vector<2x384xf32> to vector<2x128xf32>
    %558 = arith.addf %556, %557 : vector<2x128xf32>
    %559 = arith.negf %558 : vector<2x128xf32>
    %560 = math.exp %559 : vector<2x128xf32>
    %cst_135 = arith.constant 1.000000e+00 : f32
    %561 = vector.broadcast %cst_135 : f32 to vector<2x128xf32>
    %562 = arith.addf %561, %560 : vector<2x128xf32>
    %563 = arith.divf %561, %562 : vector<2x128xf32>
    %564 = vector.extract_strided_slice %551 {offsets = [0, 128], sizes = [2, 128], strides = [1, 1]} : vector<2x384xf32> to vector<2x128xf32>
    %565 = vector.extract_strided_slice %555 {offsets = [0, 128], sizes = [2, 128], strides = [1, 1]} : vector<2x384xf32> to vector<2x128xf32>
    %566 = arith.addf %564, %565 : vector<2x128xf32>
    %567 = arith.negf %566 : vector<2x128xf32>
    %568 = math.exp %567 : vector<2x128xf32>
    %cst_136 = arith.constant 1.000000e+00 : f32
    %569 = vector.broadcast %cst_136 : f32 to vector<2x128xf32>
    %570 = arith.addf %569, %568 : vector<2x128xf32>
    %571 = arith.divf %569, %570 : vector<2x128xf32>
    %572 = vector.extract_strided_slice %551 {offsets = [0, 256], sizes = [2, 128], strides = [1, 1]} : vector<2x384xf32> to vector<2x128xf32>
    %573 = vector.extract_strided_slice %555 {offsets = [0, 256], sizes = [2, 128], strides = [1, 1]} : vector<2x384xf32> to vector<2x128xf32>
    %574 = arith.mulf %563, %573 : vector<2x128xf32>
    %575 = arith.addf %572, %574 : vector<2x128xf32>
    %576 = math.tanh %575 : vector<2x128xf32>
    %cst_137 = arith.constant 1.000000e+00 : f32
    %577 = vector.broadcast %cst_137 : f32 to vector<2x128xf32>
    %578 = arith.subf %577, %571 : vector<2x128xf32>
    %579 = arith.mulf %578, %576 : vector<2x128xf32>
    %580 = arith.mulf %571, %546 : vector<2x128xf32>
    %581 = arith.addf %579, %580 : vector<2x128xf32>
    %c6_138 = arith.constant 6 : index
    %c0_139 = arith.constant 0 : index
    %c0_140 = arith.constant 0 : index
    %582 = vector.load %arg18[%c6_138, %c0_139, %c0_140] : memref<8x2x128xf32, #tpu.memory_space<vmem>>, vector<1x2x128xf32>
    %583 = vector.shape_cast %582 : vector<1x2x128xf32> to vector<2x128xf32>
    %584 = vector.shape_cast %581 : vector<2x128xf32> to vector<1x2x128xf32>
    tpu.vector_store %arg18[%c6_138, %c0_139, %c0_140], %584 {strides = array<i32>} : memref<8x2x128xf32, #tpu.memory_space<vmem>>, vector<1x2x128xf32>,
    %585 = vector.extract_strided_slice %336 {offsets = [7, 0, 0], sizes = [1, 2, 384], strides = [1, 1, 1]} : vector<8x2x384xf32> to vector<1x2x384xf32>
    %586 = vector.shape_cast %585 : vector<1x2x384xf32> to vector<2x384xf32>
    %587 = arith.truncf %581 : vector<2x128xf32> to vector<2x128xbf16>
    %cst_141 = arith.constant dense<0.000000e+00> : vector<2x384xf32>
    %588 = tpu.matmul %587, %337, %cst_141 {dimension_numbers = #tpu.dot_dimension_numbers<[1], [0], [0], [1], [0, 0, 1, 1], [], []>} : vector<2x128xbf16>, vector<128x384xbf16>, vector<2x384xf32> -> vector<2x384xf32>
    %589 = vector.broadcast %338 : vector<1x384xf32> to vector<2x384xf32>
    %590 = arith.addf %588, %589 : vector<2x384xf32>
    %591 = vector.extract_strided_slice %586 {offsets = [0, 0], sizes = [2, 128], strides = [1, 1]} : vector<2x384xf32> to vector<2x128xf32>
    %592 = vector.extract_strided_slice %590 {offsets = [0, 0], sizes = [2, 128], strides = [1, 1]} : vector<2x384xf32> to vector<2x128xf32>
    %593 = arith.addf %591, %592 : vector<2x128xf32>
    %594 = arith.negf %593 : vector<2x128xf32>
    %595 = math.exp %594 : vector<2x128xf32>
    %cst_142 = arith.constant 1.000000e+00 : f32
    %596 = vector.broadcast %cst_142 : f32 to vector<2x128xf32>
    %597 = arith.addf %596, %595 : vector<2x128xf32>
    %598 = arith.divf %596, %597 : vector<2x128xf32>
    %599 = vector.extract_strided_slice %586 {offsets = [0, 128], sizes = [2, 128], strides = [1, 1]} : vector<2x384xf32> to vector<2x128xf32>
    %600 = vector.extract_strided_slice %590 {offsets = [0, 128], sizes = [2, 128], strides = [1, 1]} : vector<2x384xf32> to vector<2x128xf32>
    %601 = arith.addf %599, %600 : vector<2x128xf32>
    %602 = arith.negf %601 : vector<2x128xf32>
    %603 = math.exp %602 : vector<2x128xf32>
    %cst_143 = arith.constant 1.000000e+00 : f32
    %604 = vector.broadcast %cst_143 : f32 to vector<2x128xf32>
    %605 = arith.addf %604, %603 : vector<2x128xf32>
    %606 = arith.divf %604, %605 : vector<2x128xf32>
    %607 = vector.extract_strided_slice %586 {offsets = [0, 256], sizes = [2, 128], strides = [1, 1]} : vector<2x384xf32> to vector<2x128xf32>
    %608 = vector.extract_strided_slice %590 {offsets = [0, 256], sizes = [2, 128], strides = [1, 1]} : vector<2x384xf32> to vector<2x128xf32>
    %609 = arith.mulf %598, %608 : vector<2x128xf32>
    %610 = arith.addf %607, %609 : vector<2x128xf32>
    %611 = math.tanh %610 : vector<2x128xf32>
    %cst_144 = arith.constant 1.000000e+00 : f32
    %612 = vector.broadcast %cst_144 : f32 to vector<2x128xf32>
    %613 = arith.subf %612, %606 : vector<2x128xf32>
    %614 = arith.mulf %613, %611 : vector<2x128xf32>
    %615 = arith.mulf %606, %581 : vector<2x128xf32>
    %616 = arith.addf %614, %615 : vector<2x128xf32>
    %c7_145 = arith.constant 7 : index
    %c0_146 = arith.constant 0 : index
    %c0_147 = arith.constant 0 : index
    %617 = vector.load %arg18[%c7_145, %c0_146, %c0_147] : memref<8x2x128xf32, #tpu.memory_space<vmem>>, vector<1x2x128xf32>
    %618 = vector.shape_cast %617 : vector<1x2x128xf32> to vector<2x128xf32>
    %619 = vector.shape_cast %616 : vector<2x128xf32> to vector<1x2x128xf32>
    tpu.vector_store %arg18[%c7_145, %c0_146, %c0_147], %619 {strides = array<i32>} : memref<8x2x128xf32, #tpu.memory_space<vmem>>, vector<1x2x128xf32>,
    %c0_148 = arith.constant 0 : index
    %c0_149 = arith.constant 0 : index
    %c0_150 = arith.constant 0 : index
    %620 = vector.load %arg18[%c0_148, %c0_149, %c0_150] : memref<8x2x128xf32, #tpu.memory_space<vmem>>, vector<8x2x128xf32>
    %621 = vector.shape_cast %620 : vector<8x2x128xf32> to vector<16x128xf32>
    %622 = arith.truncf %621 : vector<16x128xf32> to vector<16x128xbf16>
    %c0_151 = arith.constant 0 : index
    %c0_152 = arith.constant 0 : index
    %623 = vector.load %arg14[%c0_151, %c0_152] : memref<128x128xbf16, #tpu.memory_space<vmem>>, vector<128x128xbf16>
    %cst_153 = arith.constant dense<0.000000e+00> : vector<16x128xf32>
    %624 = tpu.matmul %622, %623, %cst_153 {dimension_numbers = #tpu.dot_dimension_numbers<[1], [0], [0], [1], [0, 0, 1, 1], [], []>} : vector<16x128xbf16>, vector<128x128xbf16>, vector<16x128xf32> -> vector<16x128xf32>
    %c0_154 = arith.constant 0 : index
    %c0_155 = arith.constant 0 : index
    %625 = vector.load %arg15[%c0_154, %c0_155] : memref<1x128xf32, #tpu.memory_space<vmem>>, vector<1x128xf32>
    %626 = vector.broadcast %625 : vector<1x128xf32> to vector<16x128xf32>
    %627 = arith.addf %624, %626 : vector<16x128xf32>
    %cst_156 = arith.constant dense<0xFF800000> : vector<16xf32>
    %628 = vector.multi_reduction <maximumf>, %627, %cst_156 [1] : vector<16x128xf32> to vector<16xf32>
    %629 = vector.shape_cast %628 : vector<16xf32> to vector<16x1xf32>
    %630 = vector.broadcast %629 : vector<16x1xf32> to vector<16x128xf32>
    %631 = arith.subf %627, %630 : vector<16x128xf32>
    %632 = math.exp %631 : vector<16x128xf32>
    %cst_157 = arith.constant dense<0.000000e+00> : vector<16xf32>
    %633 = vector.multi_reduction <add>, %632, %cst_157 [1] : vector<16x128xf32> to vector<16xf32>
    %634 = vector.shape_cast %633 : vector<16xf32> to vector<16x1xf32>
    %635 = math.log %634 : vector<16x1xf32>
    %636 = vector.broadcast %635 : vector<16x1xf32> to vector<16x128xf32>
    %637 = arith.subf %631, %636 : vector<16x128xf32>
    %638 = vector.shape_cast %637 : vector<16x128xf32> to vector<8x2x128xf32>
    %c0_158 = arith.constant 0 : index
    %c0_159 = arith.constant 0 : index
    %c0_160 = arith.constant 0 : index
    %639 = vector.load %arg16[%c0_158, %c0_159, %c0_160] : memref<8x2x128xf32, #tpu.memory_space<vmem>>, vector<8x2x128xf32>
    tpu.vector_store %arg16[%c0_158, %c0_159, %c0_160], %638 {strides = array<i32>} : memref<8x2x128xf32, #tpu.memory_space<vmem>>, vector<8x2x128xf32>,
    return
  }
}

</mosaic_0001>

<bundles_post_ra>
// kernel: attn_decoder_forward.1
= control target key start
LH: loop header
LB: loop body
LE: loop exit
PB: predicated region body
PF: predicated region fallthrough
CT: control target
= control target key end

     0   :  { %s7265_s0 = inlined_call_operand.vmem [shape: f32[2,8,128], index: 0, kind: input, shape index: {}]   ;;  %s7266_s1 = inlined_call_operand.vmem [shape: f32[2,8,128], index: 1, kind: input, shape index: {}]   ;;  %s7267_s2 = inlined_call_operand.vmem [shape: s32[2,1], index: 2, kind: input, shape index: {}]   ;;  %s7268_s3 = inlined_call_operand.vmem [shape: bf16[128,128], index: 3, kind: input, shape index: {}]   ;;  %s7269_s4 = inlined_call_operand.hbm [shape: bf16[128,128], index: 4, kind: input, shape index: {}]   ;;  %s7270_s5 = inlined_call_operand.hbm [shape: bf16[128,128], index: 5, kind: input, shape index: {}]   ;;  %s7271_s6 = inlined_call_operand.vmem [shape: bf16[128,384], index: 6, kind: input, shape index: {}]   ;;  %s7272_s7 = inlined_call_operand.hbm [shape: bf16[128,384], index: 7, kind: input, shape index: {}]   ;;  %s7273_s8 = inlined_call_operand.hbm [shape: f32[1,384], index: 8, kind: input, shape index: {}]   ;;  %s7274_s9 = inlined_call_operand.hbm [shape: f32[1,384], index: 9, kind: input, shape index: {}]   ;;  %s7275_s10 = inlined_call_operand.hbm [shape: bf16[128,384], index: 10, kind: input, shape index: {}]   ;;  %s7276_s11 = inlined_call_operand.hbm [shape: bf16[128,384], index: 11, kind: input, shape index: {}]   ;;  %s7277_s12 = inlined_call_operand.hbm [shape: f32[1,384], index: 12, kind: input, shape index: {}]   ;;  %s7278_s13 = inlined_call_operand.hbm [shape: f32[1,384], index: 13, kind: input, shape index: {}]   ;;  %s7279_s14 = inlined_call_operand.hbm [shape: bf16[128,128], index: 14, kind: input, shape index: {}]   ;;  %s7280_s15 = inlined_call_operand.vmem [shape: f32[1,128], index: 15, kind: input, shape index: {}]   ;;  %s7281_s16 = inlined_call_operand.vmem [shape: f32[8,2,128], index: 16, kind: output, shape index: {}]  }
   0x1   :  { %7283 = sst [smem:[#allocation26_spill]] %s7265_s0 }
   0x2   :  { %21 = vsyncpa [#allocation5], 0 }
   0x3   :  { %22 = vsyncpa [#allocation7], 0 }
   0x4   :  { %23 = vsyncpa [#allocation10], 0 }
   0x5   :  { %24 = vsyncpa [#allocation13], 0 }
   0x6   :  { %25 = vsyncpa [#allocation16], 0 }
   0x7   :  { %26 = vsyncpa [#allocation19], 0  ;;  %s5717_s21 = smov [#allocation6]   ;;  %s5718_s23 = smov [#allocation9]  }
   0x8   :  { %s52_s22 = sshll.u32 %s5717_s21, 4  ;;  %s79_s24 = sshll.u32 %s5718_s23, 4  ;;  %s53_s22 = int_to_ptr.vmem [resolvable:$true] %s52_s22  ;;  %s5821_s24 = int_to_ptr.vmem [resolvable:$true] %s79_s24 }
   0x9   :  { %s5485_s27 = scalar_lea.hbm %s7270_s5, 1024 }
   0xa   :  { %p5486_p0 = scmp.ne.s32.totalorder %s7270_s5, %s5485_s27  ;;  %p5489_p1 = scmp.lt.u32.totalorder %s5485_s27, %s7270_s5 }
   0xc   :  { %p5491_p2 = pnand %p5489_p1, %p5486_p0 }
   0xe   :  { %5494 = shalt.err (!%p5491_p2)
}
   0xf   :  { %s5495_s17 = scalar_lea.vmem %s53_s22, 1024  ;;  %p5500_p4 = scmp.lt.s32.totalorder %s53_s22, %s53_s22 }
  0x10   :  { %p5496_p3 = scmp.ne.s32.totalorder %s53_s22, %s5495_s17  ;;  %p5501_p5 = scmp.lt.s32.totalorder %s5495_s17, %s5495_s17 }
  0x12   :  { %p5502_p6 = por %p5501_p5, %p5500_p4 }
  0x14   :  { %p5503_p7 = pnand %p5502_p6, %p5496_p3 }
  0x16   :  { %5506 = shalt.err (!%p5503_p7)
}
  0x17   :  { %s5719_s18 = smov 64   ;;  %s5720_s19 = smov 4  }
  0x18   :  { %58 = dma.hbm_to_vmem [thread:$0]  %s7270_s5, 1024, %s53_s22, [#allocation7], %s5719_s18, %s5719_s18, %s5720_s19  }
  0x19   :  { %s5507_s26 = scalar_lea.hbm %s7273_s8, 48 }
  0x1a   :  { %p5508_p8 = scmp.ne.s32.totalorder %s7273_s8, %s5507_s26  ;;  %p5511_p9 = scmp.lt.u32.totalorder %s5507_s26, %s7273_s8 }
  0x1c   :  { %p5513_p10 = pnand %p5511_p9, %p5508_p8 }
  0x1e   :  { %5516 = shalt.err (!%p5513_p10)
}
  0x1f   :  { %s5517_s0 = scalar_lea.vmem %s5821_s24, 48  ;;  %s5521_s5 = scalar_lea.vmem %s5821_s24, 64 }
  0x20   :  { %p5518_p11 = scmp.ne.s32.totalorder %s5821_s24, %s5517_s0  ;;  %p5522_p12 = scmp.lt.s32.totalorder %s5821_s24, %s5821_s24 }
  0x21   :  { %p5523_p13 = scmp.lt.s32.totalorder %s5521_s5, %s5517_s0 }
  0x23   :  { %p5524_p0 = por %p5523_p13, %p5522_p12 }
  0x25   :  { %p5525_p1 = pnand %p5524_p0, %p5518_p11 }
  0x27   :  { %5528 = shalt.err (!%p5525_p1)
}
  0x28   :  { %82 = dma.hbm_to_vmem [thread:$0]  %s7273_s8, 48, %s5821_s24, [#allocation10]  }
  0x29   :  { %s5721_s20 = smov [#allocation12]   ;;  %s5722_s23 = smov [#allocation15]  }
  0x2a   :  { %s98_s21 = sshll.u32 %s5721_s20, 4  ;;  %s123_s25 = sshll.u32 %s5722_s23, 4  ;;  %s99_s21 = int_to_ptr.vmem [resolvable:$true] %s98_s21  ;;  %s5856_s25 = int_to_ptr.vmem [resolvable:$true] %s123_s25 }
  0x2b   :  { %s5529_s28 = scalar_lea.hbm %s7275_s10, 3072 }
  0x2c   :  { %p5530_p2 = scmp.ne.s32.totalorder %s7275_s10, %s5529_s28  ;;  %p5533_p3 = scmp.lt.u32.totalorder %s5529_s28, %s7275_s10 }
  0x2e   :  { %p5535_p4 = pnand %p5533_p3, %p5530_p2 }
  0x30   :  { %5538 = shalt.err (!%p5535_p4)
}
  0x31   :  { %s5539_s8 = scalar_lea.vmem %s99_s21, 3072  ;;  %p5544_p6 = scmp.lt.s32.totalorder %s99_s21, %s99_s21 }
  0x32   :  { %p5540_p5 = scmp.ne.s32.totalorder %s99_s21, %s5539_s8  ;;  %p5545_p7 = scmp.lt.s32.totalorder %s5539_s8, %s5539_s8 }
  0x34   :  { %p5546_p8 = por %p5545_p7, %p5544_p6 }
  0x36   :  { %p5547_p9 = pnand %p5546_p8, %p5540_p5 }
  0x38   :  { %5550 = shalt.err (!%p5547_p9)
}
  0x39   :  { %s5723_s24 = smov 192   ;;  %s5724_s22 = smov 12  }
  0x3a   :  { %104 = dma.hbm_to_vmem [thread:$0]  %s7275_s10, 3072, %s99_s21, [#allocation13], %s5723_s24, %s5723_s24, %s5724_s22  }
  0x3b   :  { %s5551_s27 = scalar_lea.hbm %s7277_s12, 48 }
  0x3c   :  { %p5552_p10 = scmp.ne.s32.totalorder %s7277_s12, %s5551_s27  ;;  %p5555_p11 = scmp.lt.u32.totalorder %s5551_s27, %s7277_s12 }
  0x3e   :  { %p5557_p12 = pnand %p5555_p11, %p5552_p10 }
  0x40   :  { %5560 = shalt.err (!%p5557_p12)
}
  0x41   :  { %s5561_s5 = scalar_lea.vmem %s5856_s25, 48  ;;  %s5565_s10 = scalar_lea.vmem %s5856_s25, 64 }
  0x42   :  { %p5562_p13 = scmp.ne.s32.totalorder %s5856_s25, %s5561_s5  ;;  %p5566_p0 = scmp.lt.s32.totalorder %s5856_s25, %s5856_s25 }
  0x43   :  { %p5567_p1 = scmp.lt.s32.totalorder %s5565_s10, %s5561_s5 }
  0x45   :  { %p5568_p2 = por %p5567_p1, %p5566_p0 }
  0x47   :  { %p5569_p3 = pnand %p5568_p2, %p5562_p13 }
  0x49   :  { %5572 = shalt.err (!%p5569_p3)
}
  0x4a   :  { %126 = dma.hbm_to_vmem [thread:$0]  %s7277_s12, 48, %s5856_s25, [#allocation16]  }
  0x4b   :  { %s5725_s17 = smov [#allocation4]   ;;  %s5726_s23 = smov [#allocation8]  }
  0x4c   :  { %s40_s20 = sshll.u32 %s5725_s17, 4  ;;  %s66_s26 = sshll.u32 %s5726_s23, 4  ;;  %s41_s20 = int_to_ptr.vmem [resolvable:$true] %s40_s20  ;;  %s5891_s26 = int_to_ptr.vmem [resolvable:$true] %s66_s26 }
  0x4d   :  { %s5573_s29 = scalar_lea.hbm %s7269_s4, 1024 }
  0x4e   :  { %p5574_p4 = scmp.ne.s32.totalorder %s7269_s4, %s5573_s29  ;;  %p5577_p5 = scmp.lt.u32.totalorder %s5573_s29, %s7269_s4 }
  0x50   :  { %p5579_p6 = pnand %p5577_p5, %p5574_p4 }
  0x52   :  { %5582 = shalt.err (!%p5579_p6)
}
  0x53   :  { %s5583_s12 = scalar_lea.vmem %s41_s20, 1024  ;;  %p5588_p8 = scmp.lt.s32.totalorder %s41_s20, %s41_s20 }
  0x54   :  { %p5584_p7 = scmp.ne.s32.totalorder %s41_s20, %s5583_s12  ;;  %p5589_p9 = scmp.lt.s32.totalorder %s5583_s12, %s5583_s12 }
  0x56   :  { %p5590_p10 = por %p5589_p9, %p5588_p8 }
  0x58   :  { %p5591_p11 = pnand %p5590_p10, %p5584_p7 }
  0x5a   :  { %5594 = shalt.err (!%p5591_p11)
}
  0x5b   :  { %46 = dma.hbm_to_vmem [thread:$0]  %s7269_s4, 1024, %s41_s20, [#allocation5], %s5719_s18, %s5719_s18, %s5720_s19  }
  0x5c   :  { %s5595_s23 = scalar_lea.hbm %s7272_s7, 3072 }
  0x5d   :  { %p5596_p12 = scmp.ne.s32.totalorder %s7272_s7, %s5595_s23  ;;  %p5599_p13 = scmp.lt.u32.totalorder %s5595_s23, %s7272_s7 }
  0x5f   :  { %p5601_p0 = pnand %p5599_p13, %p5596_p12 }
  0x61   :  { %5604 = shalt.err (!%p5601_p0)
}
  0x62   :  { %s5605_s0 = scalar_lea.vmem %s5891_s26, 3072  ;;  %p5610_p2 = scmp.lt.s32.totalorder %s5891_s26, %s5891_s26 }
  0x63   :  { %p5606_p1 = scmp.ne.s32.totalorder %s5891_s26, %s5605_s0  ;;  %p5611_p3 = scmp.lt.s32.totalorder %s5605_s0, %s5605_s0 }
  0x65   :  { %p5612_p4 = por %p5611_p3, %p5610_p2 }
  0x67   :  { %p5613_p5 = pnand %p5612_p4, %p5606_p1 }
  0x69   :  { %5616 = shalt.err (!%p5613_p5)
}
  0x6a   :  { %72 = dma.hbm_to_vmem [thread:$0]  %s7272_s7, 3072, %s5891_s26, [#allocation7], %s5723_s24, %s5723_s24, %s5724_s22  }
  0x6b   :  { %s5727_s5 = smov [#allocation11]   ;;  %s5728_s12 = smov [#allocation14]  }
  0x6c   :  { %s89_s10 = sshll.u32 %s5727_s5, 4  ;;  %s110_s25 = sshll.u32 %s5728_s12, 4  ;;  %s90_s10 = int_to_ptr.vmem [resolvable:$true] %s89_s10  ;;  %s5928_s25 = int_to_ptr.vmem [resolvable:$true] %s110_s25 }
  0x6d   :  { %s5617_s17 = scalar_lea.hbm %s7274_s9, 48 }
  0x6e   :  { %p5618_p6 = scmp.ne.s32.totalorder %s7274_s9, %s5617_s17  ;;  %p5621_p7 = scmp.lt.u32.totalorder %s5617_s17, %s7274_s9 }
  0x70   :  { %p5623_p8 = pnand %p5621_p7, %p5618_p6 }
  0x72   :  { %5626 = shalt.err (!%p5623_p8)
}
  0x73   :  { %s5627_s7 = scalar_lea.vmem %s90_s10, 48  ;;  %s5631_s26 = scalar_lea.vmem %s90_s10, 64 }
  0x74   :  { %p5628_p9 = scmp.ne.s32.totalorder %s90_s10, %s5627_s7  ;;  %p5632_p10 = scmp.lt.s32.totalorder %s90_s10, %s90_s10 }
  0x75   :  { %p5633_p11 = scmp.lt.s32.totalorder %s5631_s26, %s5627_s7 }
  0x77   :  { %p5634_p12 = por %p5633_p11, %p5632_p10 }
  0x79   :  { %p5635_p13 = pnand %p5634_p12, %p5628_p9 }
  0x7b   :  { %5638 = shalt.err (!%p5635_p13)
}
  0x7c   :  { %92 = dma.hbm_to_vmem [thread:$0]  %s7274_s9, 48, %s90_s10, [#allocation10]  }
  0x7d   :  { %s5639_s5 = scalar_lea.hbm %s7276_s11, 3072 }
  0x7e   :  { %p5640_p0 = scmp.ne.s32.totalorder %s7276_s11, %s5639_s5  ;;  %p5643_p1 = scmp.lt.u32.totalorder %s5639_s5, %s7276_s11 }
  0x80   :  { %p5645_p2 = pnand %p5643_p1, %p5640_p0 }
  0x82   :  { %5648 = shalt.err (!%p5645_p2)
}
  0x83   :  { %s5649_s23 = scalar_lea.vmem %s5928_s25, 3072  ;;  %p5654_p4 = scmp.lt.s32.totalorder %s5928_s25, %s5928_s25 }
  0x84   :  { %p5650_p3 = scmp.ne.s32.totalorder %s5928_s25, %s5649_s23  ;;  %p5655_p5 = scmp.lt.s32.totalorder %s5649_s23, %s5649_s23 }
  0x86   :  { %p5656_p6 = por %p5655_p5, %p5654_p4 }
  0x88   :  { %p5657_p7 = pnand %p5656_p6, %p5650_p3 }
  0x8a   :  { %5660 = shalt.err (!%p5657_p7)
}
  0x8b   :  { %116 = dma.hbm_to_vmem [thread:$0]  %s7276_s11, 3072, %s5928_s25, [#allocation13], %s5723_s24, %s5723_s24, %s5724_s22  }
  0x8c   :  { %s5729_s27 = smov [#allocation17]   ;;  %s5730_s29 = smov [#allocation18]  }
  0x8d   :  { %s133_s28 = sshll.u32 %s5729_s27, 4  ;;  %s142_s7 = sshll.u32 %s5730_s29, 4  ;;  %s134_s28 = int_to_ptr.vmem [resolvable:$true] %s133_s28  ;;  %s5962_s7 = int_to_ptr.vmem [resolvable:$true] %s142_s7 }
  0x8e   :  { %s5661_s0 = scalar_lea.hbm %s7278_s13, 48 }
  0x8f   :  { %p5662_p8 = scmp.ne.s32.totalorder %s7278_s13, %s5661_s0  ;;  %p5665_p9 = scmp.lt.u32.totalorder %s5661_s0, %s7278_s13 }
  0x91   :  { %p5667_p10 = pnand %p5665_p9, %p5662_p8 }
  0x93   :  { %5670 = shalt.err (!%p5667_p10)
}
  0x94   :  { %s5671_s11 = scalar_lea.vmem %s134_s28, 48  ;;  %s5675_s24 = scalar_lea.vmem %s134_s28, 64 }
  0x95   :  { %p5672_p11 = scmp.ne.s32.totalorder %s134_s28, %s5671_s11  ;;  %p5676_p12 = scmp.lt.s32.totalorder %s134_s28, %s134_s28 }
  0x96   :  { %p5677_p13 = scmp.lt.s32.totalorder %s5675_s24, %s5671_s11 }
  0x98   :  { %p5678_p0 = por %p5677_p13, %p5676_p12 }
  0x9a   :  { %p5679_p1 = pnand %p5678_p0, %p5672_p11 }
  0x9c   :  { %5682 = shalt.err (!%p5679_p1)
}
  0x9d   :  { %136 = dma.hbm_to_vmem [thread:$0]  %s7278_s13, 48, %s134_s28, [#allocation16]  }
  0x9e   :  { %s5683_s17 = scalar_lea.hbm %s7279_s14, 1024 }
  0x9f   :  { %p5684_p2 = scmp.ne.s32.totalorder %s7279_s14, %s5683_s17  ;;  %p5687_p3 = scmp.lt.u32.totalorder %s5683_s17, %s7279_s14 }
  0xa1   :  { %p5689_p4 = pnand %p5687_p3, %p5684_p2 }
  0xa3   :  { %5692 = shalt.err (!%p5689_p4)
}
  0xa4   :  { %s5693_s29 = scalar_lea.vmem %s5962_s7, 1024  ;;  %p5698_p6 = scmp.lt.s32.totalorder %s5962_s7, %s5962_s7 }
  0xa5   :  { %p5694_p5 = scmp.ne.s32.totalorder %s5962_s7, %s5693_s29  ;;  %p5699_p7 = scmp.lt.s32.totalorder %s5693_s29, %s5693_s29 }
  0xa7   :  { %p5700_p8 = por %p5699_p7, %p5698_p6 }
  0xa9   :  { %p5701_p9 = pnand %p5700_p8, %p5694_p5 }
  0xab   :  { %5704 = shalt.err (!%p5701_p9)
}
  0xac   :  { %148 = dma.hbm_to_vmem [thread:$0]  %s7279_s14, 1024, %s5962_s7, [#allocation19], %s5719_s18, %s5719_s18, %s5720_s19  }
  0xad   :  { %5705 = dma.done.wait [#allocation5], 1024  }
  0xae   :  { %5706 = vsyncadd [#allocation5], 4294966272 }
  0xaf   :  { %5707 = dma.done.wait [#allocation7], 4096  }
  0xb0   :  { %5708 = vsyncadd [#allocation7], 4294963200 }
  0xb1   :  { %5709 = dma.done.wait [#allocation10], 96  }
  0xb2   :  { %5710 = vsyncadd [#allocation10], 4294967200 }
  0xb3   :  { %5711 = dma.done.wait [#allocation13], 6144  }
  0xb4   :  { %5712 = vsyncadd [#allocation13], 4294961152 }
  0xb5   :  { %5713 = dma.done.wait [#allocation16], 96  }
  0xb6   :  { %5714 = vsyncadd [#allocation16], 4294967200 }
  0xb7   :  { %5715 = dma.done.wait [#allocation19], 1024  }
  0xb8   :  { %5716 = vsyncadd [#allocation19], 4294966272  ;;  %v5731_v0 = vmov 0.0   ;;  %vm5732_vm0 = vmmov 0   ;;  %v5017_v1 = vld [vmem:[%s7268_s3] sm:$0xff]   ;;  %v5018_v2 = vld [vmem:[%s7268_s3 + $0x8] sm:$0xff]   ;;  %v376_v22 = vlaneseq }
  0xb9   :  { %4529 = vmatprep.subr.bf16.mxu0 %v5731_v0  ;;  %4545 = vmatprep.mubr.msk.bf16.mxu0 %vm5732_vm0, %v5731_v0  ;;  %v5019_v3 = vld [vmem:[%s7268_s3 + $0x10] sm:$0xff]   ;;  %v5020_v4 = vld [vmem:[%s7268_s3 + $0x18] sm:$0xff]   ;;  %v5021_v5 = vld [vmem:[%s7268_s3 + $0x20] sm:$0xff]   ;;  %s7284_s10 = sld [smem:[#allocation26_spill]]  ;;  %v5733_v23 = vmov 0   ;;  %vm419_vm2 = vcmask 64512  }
  0xba   :  { %4549 = vmatprep.subr.bf16.mxu1 %v5731_v0  ;;  %4551 = vmatprep.mubr.msk.bf16.mxu1 %vm5732_vm0, %v5731_v0  ;;  %v184_v6 = vld [vmem:[%s7266_s1] sm:$0xff]  ;;  %v5022_v8 = vld [vmem:[%s7268_s3 + $0x28] sm:$0xff]   ;;  %v5023_v9 = vld [vmem:[%s7268_s3 + $0x30] sm:$0xff]   ;;  %v5734_v24 = vmov 1966171168   ;;  %v6058_v26 = vshrl.u32 %v376_v22, 7 }
  0xbb   :  { %4530 = vmatpush3.bf16.msra.mxu0 %v5017_v1  ;;  %v6024_v7 = vpack.c.bf16 %v184_v6, %v184_v6  ;;  %v5024_v10 = vld [vmem:[%s7268_s3 + $0x38] sm:$0xff]   ;;  %v5025_v13 = vld [vmem:[#allocation6] sm:$0xff]   ;;  %v5026_v15 = vld [vmem:[#allocation6 + $0x8] sm:$0xff]   ;;  %5016 = vset.pattern.permute.xlu0 %v5733_v23  ;;  %v388_v25 = vunpack.c.l.s4 %v5734_v24  ;;  %v377_v45 = vand.u32 127, %v376_v22  ;;  %vm447_vm4 = vcmask 1043456  }
  0xbc   :  { %4531 = vmatprep.subr.bf16.mxu0 %v5731_v0  ;;  %v5027_v16 = vld [vmem:[#allocation6 + $0x10] sm:$0xff]   ;;  %v5028_v17 = vld [vmem:[#allocation6 + $0x18] sm:$0xff]   ;;  %v5029_v18 = vld [vmem:[#allocation6 + $0x20] sm:$0xff]   ;;  %v6065_v31 = vsub.s32 0, %v6058_v26  ;;  %vm1328_vm5 = vcmask 1041409   ;;  %vm1483_vm6 = vcmask 1042434  }
  0xbd   :  { %4550 = vmatpush3.bf16.xpose.msra.mxu1 %v6024_v7  ;;  %v5030_v19 = vld [vmem:[#allocation6 + $0x28] sm:$0xff]   ;;  %v5031_v20 = vld [vmem:[#allocation6 + $0x30] sm:$0xff]   ;;  %v5032_v21 = vld [vmem:[#allocation6 + $0x38] sm:$0xff]   ;;  %v389_v28 = vunpack.c.0.s8 %v388_v25  ;;  %vm1642_vm7 = vcmask 1043459   ;;  %vm1802_vm8 = vcmask 1044484   ;;  %vm1962_vm9 = vcmask 1045509  }
  0xbe   :  { %4555 = vmatprep.subr.bf16.mxu1 %v5731_v0  ;;  %v4147_v27 = vld.sshfl [vmem:[%s7267_s2] sm:$0x11 pattern:$0x75316420]  ;;  %v185_v36 = vld [vmem:[%s7266_s1 + $0x8] sm:$0xff]  ;;  %v5039_v24 = vld [vmem:[#allocation4 + $0x30] sm:$0xff]  }
  0xbf   :  { %4532 = vmatpush3.bf16.msra.mxu0 %v5018_v2  ;;  %v182_v11 = vld [vmem:[%s7284_s10] sm:$0xff]  ;;  %v183_v12 = vld [vmem:[%s7284_s10 + $0x8] sm:$0xff]  ;;  %v386_v29 = vcombine.high %v4147_v27, %v4147_v27  ;;  %v392_v30 = vsub.s32 %v389_v28, %v6058_v26  ;;  %v6072_v38 = vpack.c.bf16 %v185_v36, %v185_v36  ;;  %v5040_v25 = vld [vmem:[#allocation4 + $0x38] sm:$0xff]   ;;  %vm2122_vm10 = vcmask 1046534  }
  0xc0   :  { %4533 = vmatprep.subr.bf16.mxu0 %v5731_v0  ;;  %v188_v14 = vpack.c.bf16 %v183_v12, %v182_v11  ;;  %v5035_v11 = vld [vmem:[#allocation4 + $0x10] sm:$0xff]   ;;  %v5036_v12 = vld [vmem:[#allocation4 + $0x18] sm:$0xff]   ;;  %v5038_v22 = vld [vmem:[#allocation4 + $0x28] sm:$0xff]   ;;  %vm2282_vm11 = vcmask 1047559  }
  0xc1   :  { %v393_v32 = vrot.slane %v4147_v27, %v392_v30  ;;  %v400_v33 = vrot.slane %v386_v29, %v392_v30  ;;  %v5041_v27 = vld [vmem:[%s7271_s6] ss:$12 sps:$4 sm:$0xff]   ;;  %v5043_v28 = vld [vmem:[%s7271_s6 + $0x4] ss:$12 sps:$4 sm:$0xff]   ;;  %v5049_v30 = vld [vmem:[%s7271_s6 + $0x1c] ss:$12 sps:$4 sm:$0xff]  }
  0xc2   :  { %v6109_v29 = vld [vmem:[#allocation8 + $0x4] ss:$12 sps:$4 sm:$0xff]   ;;  %v5059_v36 = vld [vmem:[%s7271_s6 + $0x48] ss:$12 sps:$4 sm:$0xff]  }
  0xc3   :  { %4534 = vmatpush3.bf16.msra.mxu0 %v5019_v3  ;;  %v404_v34 = vrot.slane %v393_v32, %v6065_v31  ;;  %v408_v35 = vrot.slane %v400_v33, %v6065_v31  ;;  %v5047_v32 = vld [vmem:[%s7271_s6 + $0x18] ss:$12 sps:$4 sm:$0xff]   ;;  %v5055_v33 = vld [vmem:[%s7271_s6 + $0x34] ss:$12 sps:$4 sm:$0xff]  }
  0xc4   :  { %4535 = vmatprep.subr.bf16.mxu0 %v5731_v0 }
  0xc5   :  { %410 = vperm.xlu0 %5016, %v404_v34   ;;  %v5053_v34 = vld [vmem:[%s7271_s6 + $0x30] ss:$12 sps:$4 sm:$0xff]  }
  0xc7   :  { %4536 = vmatpush3.bf16.msra.mxu0 %v5020_v4 }
  0xc8   :  { %4537 = vmatprep.subr.bf16.mxu0 %v5731_v0 }
  0xc9   :  { %413 = vperm.xlu0 %5016, %v408_v35   ;;  %v5061_v35 = vld [vmem:[%s7271_s6 + $0x4c] ss:$12 sps:$4 sm:$0xff]  }
  0xcb   :  { %4538 = vmatpush3.bf16.msra.mxu0 %v5021_v5 }
  0xcc   :  { %4539 = vmatprep.subr.bf16.mxu0 %v5731_v0 }
  0xcf   :  { %4540 = vmatpush3.bf16.msra.mxu0 %v5022_v8  ;;  %v449_v8 = vsel %vm447_vm4, %v6024_v7, 0 }
  0xd0   :  { %4541 = vmatprep.subr.bf16.mxu0 %v5731_v0 }
  0xd3   :  { %4542 = vmatpush3.bf16.msra.mxu0 %v5023_v9  ;;  %v5033_v9 = vld [vmem:[#allocation4] sm:$0xff]  }
  0xd4   :  { %4543 = vmatprep.subr.bf16.mxu0 %v5731_v0 }
  0xd7   :  { %4544 = vmatpush3.bf16.msra.mxu0 %v5024_v10  ;;  %v5034_v10 = vld [vmem:[#allocation4 + $0x8] sm:$0xff]  }
  0xd8   :  { %4573 = vmatprep.subr.bf16.mxu0 %v5731_v0 }
  0xda   :  { %4546 = vmatmul.mubr.bf16.vlgmr.msra.gmra.mrb[0].mxu0 %v188_v14 }
  0xdb   :  { %4574 = vmatpush3.bf16.msra.mxu0 %v5025_v13  ;;  %4589 = vmatprep.mubr.msk.bf16.mxu0 %vm5732_vm0, %v5731_v0  ;;  %v5037_v13 = vld [vmem:[#allocation4 + $0x20] sm:$0xff]  }
  0xdc   :  { %4575 = vmatprep.subr.bf16.mxu0 %v5731_v0 }
  0xdf   :  { %4576 = vmatpush3.bf16.msra.mxu0 %v5026_v15 }
  0xe0   :  { %4577 = vmatprep.subr.bf16.mxu0 %v5731_v0 }
  0xe3   :  { %4578 = vmatpush3.bf16.msra.mxu0 %v5027_v16 }
  0xe4   :  { %4579 = vmatprep.subr.bf16.mxu0 %v5731_v0 }
  0xe7   :  { %4580 = vmatpush3.bf16.msra.mxu0 %v5028_v17 }
  0xe8   :  { %4581 = vmatprep.subr.bf16.mxu0 %v5731_v0 }
  0xeb   :  { %4582 = vmatpush3.bf16.msra.mxu0 %v5029_v18  ;;  %v495_v18 = vsel %vm447_vm4, %v6072_v38, 0 }
  0xec   :  { %4583 = vmatprep.subr.bf16.mxu0 %v5731_v0 }
  0xef   :  { %4584 = vmatpush3.bf16.msra.mxu0 %v5030_v19 }
  0xf0   :  { %4585 = vmatprep.subr.bf16.mxu0 %v5731_v0 }
  0xf3   :  { %4586 = vmatpush3.bf16.msra.mxu0 %v5031_v20 }
  0xf4   :  { %4587 = vmatprep.subr.bf16.mxu0 %v5731_v0 }
  0xf7   :  { %4588 = vmatpush3.bf16.msra.mxu0 %v5032_v21 }
  0xf8   :  { %4593 = vmatprep.subr.bf16.mxu0 %v5731_v0 }
 0x144   :  { %v411_v46 = vpop.permute.xlu0 %410 }
 0x145   :  { %vm415_vm1 = vcmp.ge.s32.totalorder %v377_v45, %v411_v46 }
 0x148   :  { %v414_v53 = vpop.permute.xlu0 %413 }
 0x149   :  { %vm416_vm3 = vcmp.ge.s32.totalorder %v377_v45, %v414_v53  ;;  %v6151_v53 = vld [vmem:[#allocation8 + $0x4c] ss:$12 sps:$4 sm:$0xff]  }
 0x1ad   :  { %v287_v37 = vpop.f32.mrb[0].mxu0 }
 0x1ae   :  { %v294_v39 = vpack.c.bf16 %v287_v37, %v287_v37  ;;  %v4547_v40 = vpop.f32.mrb[1].mxu0 }
 0x1af   :  { %v290_v41 = vpop.f32.mrb[2].mxu0 }
 0x1b0   :  { %v554_v42 = vpack.c.bf16 %v290_v41, %v287_v37  ;;  %v4548_v43 = vpop.f32.mrb[3].mxu0  ;;  %4552 = vmatmul.mubr.bf16.vlgmr.msra.gmra.mrb[0].mxu1 %v294_v39  ;;  %v295_v44 = vpack.c.bf16 %v290_v41, %v290_v41  ;;  %v5067_v37 = vld [vmem:[%s7271_s6 + $0x64] ss:$12 sps:$4 sm:$0xff]  }
 0x1b1   :  { %4556 = vmatpush3.bf16.xpose.msra.mxu1 %v6072_v38  ;;  %4557 = vmatprep.mubr.msk.bf16.mxu1 %vm5732_vm0, %v5731_v0  ;;  %v5065_v38 = vld [vmem:[%s7271_s6 + $0x60] ss:$12 sps:$4 sm:$0xff]  }
 0x1b2   :  { %4590 = vmatmul.mubr.bf16.vlgmr.msra.gmra.mrb[4].mxu0 %v554_v42  ;;  %4561 = vmatprep.subr.bf16.mxu1 %v5731_v0 }
 0x1b3   :  { %4609 = vmatprep.mubr.msk.bf16.mxu0 %vm5732_vm0, %v5731_v0  ;;  %4594 = vmatpush3.bf16.msra.mxu0 %v5033_v9 }
 0x1b4   :  { %4595 = vmatprep.subr.bf16.mxu0 %v5731_v0 }
 0x1b7   :  { %4596 = vmatpush3.bf16.msra.mxu0 %v5034_v10 }
 0x1b8   :  { %4558 = vmatmul.mubr.bf16.vlgmr.msra.gmra.mrb[4].mxu1 %v295_v44  ;;  %4597 = vmatprep.subr.bf16.mxu0 %v5731_v0  ;;  %v6136_v44 = vld [vmem:[#allocation8] ss:$12 sps:$4 sm:$0xff]  }
 0x1b9   :  { %4563 = vmatprep.mubr.msk.bf16.mxu1 %vm5732_vm0, %v5731_v0  ;;  %4562 = vmatpush3.bf16.msra.mxu1 %v449_v8 }
 0x1ba   :  { %4567 = vmatprep.subr.bf16.mxu1 %v5731_v0 }
 0x1bb   :  { %4598 = vmatpush3.bf16.msra.mxu0 %v5035_v11 }
 0x1bc   :  { %4599 = vmatprep.subr.bf16.mxu0 %v5731_v0 }
 0x1bf   :  { %4600 = vmatpush3.bf16.msra.mxu0 %v5036_v12 }
 0x1c0   :  { %4601 = vmatprep.subr.bf16.mxu0 %v5731_v0 }
 0x1c3   :  { %4602 = vmatpush3.bf16.msra.mxu0 %v5037_v13  ;;  %v5089_v13 = vld [vmem:[%s7271_s6 + $0x8] ss:$12 sps:$4 sm:$0xff]  }
 0x1c4   :  { %4603 = vmatprep.subr.bf16.mxu0 %v5731_v0 }
 0x1c7   :  { %4604 = vmatpush3.bf16.msra.mxu0 %v5038_v22  ;;  %v6257_v22 = vld [vmem:[#allocation8 + $0x20] ss:$12 sps:$4 sm:$0xff]  }
 0x1c8   :  { %4605 = vmatprep.subr.bf16.mxu0 %v5731_v0 }
 0x1cb   :  { %4606 = vmatpush3.bf16.msra.mxu0 %v5039_v24  ;;  %v6263_v24 = vld [vmem:[#allocation8 + $0x38] ss:$12 sps:$4 sm:$0xff]  }
 0x1cc   :  { %4607 = vmatprep.subr.bf16.mxu0 %v5731_v0 }
 0x1cf   :  { %4608 = vmatpush3.bf16.msra.mxu0 %v5040_v25  ;;  %v6267_v25 = vld [vmem:[#allocation8 + $0x50] ss:$12 sps:$4 sm:$0xff]  }
 0x1d0   :  { %1190 = vmatprep.subr.bf16.mxu0 %v6109_v29 }
 0x283   :  { %v330_v47 = vpop.f32.mrb[0].mxu1 }
 0x284   :  { %v417_v48 = vsel %vm415_vm1, -1e+30, %v330_v47  ;;  %v4553_v49 = vpop.f32.mrb[1].mxu1  ;;  %v6138_v47 = vld [vmem:[#allocation8 + $0x1c] ss:$12 sps:$4 sm:$0xff]  }
 0x285   :  { %v333_v50 = vpop.f32.mrb[2].mxu1  ;;  %v420_v51 = vsel %vm419_vm2, %v417_v48, -inf }
 0x286   :  { %421 = vmax.xlane.f32.xlu1 %v420_v51  ;;  %v4554_v52 = vpop.f32.mrb[3].mxu1  ;;  %v6141_v50 = vld [vmem:[#allocation8 + $0x18] ss:$12 sps:$4 sm:$0xff]   ;;  %v6145_v51 = vld [vmem:[#allocation8 + $0x34] ss:$12 sps:$4 sm:$0xff]  }
 0x287   :  { %v6148_v52 = vld [vmem:[#allocation8 + $0x30] ss:$12 sps:$4 sm:$0xff]  }
 0x28b   :  { %v370_v54 = vpop.f32.mrb[4].mxu1 }
 0x28c   :  { %v418_v55 = vsel %vm416_vm3, -1e+30, %v370_v54  ;;  %v4559_v56 = vpop.f32.mrb[5].mxu1  ;;  %v6154_v54 = vld [vmem:[#allocation8 + $0x48] ss:$12 sps:$4 sm:$0xff]  }
 0x28d   :  { %v373_v57 = vpop.f32.mrb[6].mxu1  ;;  %v423_v58 = vsel %vm419_vm2, %v418_v55, -inf  ;;  %v6160_v56 = vld [vmem:[#allocation8 + $0x60] ss:$12 sps:$4 sm:$0xff]  }
 0x28e   :  { %424 = vmax.xlane.f32.xlu1 %v423_v58  ;;  %v4560_v59 = vpop.f32.mrb[7].mxu1  ;;  %v5073_v57 = vld [vmem:[%s7271_s6 + $0x7c] ss:$12 sps:$4 sm:$0xff]   ;;  %v5071_v58 = vld [vmem:[%s7271_s6 + $0x78] ss:$12 sps:$4 sm:$0xff]  }
 0x28f   :  { %v6170_v59 = vld [vmem:[#allocation8 + $0x7c] ss:$12 sps:$4 sm:$0xff]  }
 0x313   :  { %v422_v60 = vpop.xlane.xlu1 %421 }
 0x314   :  { %v426_v61 = vsub.f32 %v417_v48, %v422_v60  ;;  %v6172_v60 = vld [vmem:[#allocation8 + $0x78] ss:$12 sps:$4 sm:$0xff]  }
 0x316   :  { %v428_v62 = vmul.f32 1.442695, %v426_v61  ;;  %v5079_v61 = vld [vmem:[%s7271_s6 + $0x94] ss:$12 sps:$4 sm:$0xff]  }
 0x318   :  { %5177 = vpow2.f32 %v428_v62  ;;  %v5077_v62 = vld [vmem:[%s7271_s6 + $0x90] ss:$12 sps:$4 sm:$0xff]  }
 0x31b   :  { %v425_v63 = vpop.xlane.xlu1 %424 }
 0x31c   :  { %v427_v1 = vsub.f32 %v418_v55, %v425_v63  ;;  %v6158_v55 = vld [vmem:[#allocation8 + $0x64] ss:$12 sps:$4 sm:$0xff]   ;;  %v6181_v63 = vld [vmem:[#allocation8 + $0x94] ss:$12 sps:$4 sm:$0xff]  }
 0x31e   :  { %v430_v2 = vmul.f32 1.442695, %v427_v1  ;;  %v6184_v1 = vld [vmem:[#allocation8 + $0x90] ss:$12 sps:$4 sm:$0xff]  }
 0x320   :  { %5179 = vpow2.f32 %v430_v2  ;;  %v5085_v2 = vld [vmem:[%s7271_s6 + $0xac] ss:$12 sps:$4 sm:$0xff]  }
 0x322   :  { %v5178_v3 = vpop.eup %5177 }
 0x323   :  { %v432_v4 = vsel %vm419_vm2, %v5178_v3, 0.0 }
 0x324   :  { %433 = vadd.xlane.f32.xlu0 %v432_v4  ;;  %v5083_v4 = vld [vmem:[%s7271_s6 + $0xa8] ss:$12 sps:$4 sm:$0xff]  }
 0x32a   :  { %v5180_v5 = vpop.eup %5179 }
 0x32b   :  { %v435_v6 = vsel %vm419_vm2, %v5180_v5, 0.0 }
 0x32c   :  { %436 = vadd.xlane.f32.xlu1 %v435_v6 }
 0x3b1   :  { %v434_v7 = vpop.xlane.xlu0 %433 }
 0x3b2   :  { %5181 = vrcp.f32 %v434_v7 }
 0x3b9   :  { %v437_v14 = vpop.xlane.xlu1 %436 }
 0x3ba   :  { %5183 = vrcp.f32 %v437_v14  ;;  %v5090_v14 = vld [vmem:[%s7271_s6 + $0x20] ss:$12 sps:$4 sm:$0xff]  }
 0x3bc   :  { %v5182_v15 = vpop.eup %5181 }
 0x3bd   :  { %v440_v16 = vmul.f32 %v5182_v15, %v5178_v3  ;;  %v6190_v3 = vld [vmem:[#allocation8 + $0xac] ss:$12 sps:$4 sm:$0xff]  }
 0x3be   :  { %v5091_v15 = vld [vmem:[%s7271_s6 + $0x38] ss:$12 sps:$4 sm:$0xff]  }
 0x3bf   :  { %v442_v17 = vpack.c.bf16 %v440_v16, %v440_v16  ;;  %v5092_v16 = vld [vmem:[%s7271_s6 + $0x50] ss:$12 sps:$4 sm:$0xff]  }
 0x3c1   :  { %4564 = vmatmul.mubr.msk.bf16.vlgmr.msra.gmra.mrb[8].mxu1 %vm419_vm2, %v442_v17  ;;  %v5093_v17 = vld [vmem:[%s7271_s6 + $0x68] ss:$12 sps:$4 sm:$0xff]  }
 0x3c2   :  { %4568 = vmatpush3.bf16.msra.mxu1 %v495_v18  ;;  %4569 = vmatprep.mubr.msk.bf16.mxu1 %vm5732_vm0, %v5731_v0  ;;  %v5094_v18 = vld [vmem:[%s7271_s6 + $0x80] ss:$12 sps:$4 sm:$0xff]  }
 0x3c3   :  { %929 = vmatprep.subr.bf16.mxu1 %v5043_v28  ;;  %v6275_v28 = vld [vmem:[#allocation8 + $0x80] ss:$12 sps:$4 sm:$0xff]  }
 0x3c4   :  { %v5184_v19 = vpop.eup %5183 }
 0x3c5   :  { %v441_v20 = vmul.f32 %v5184_v19, %v5180_v5  ;;  %v6196_v5 = vld [vmem:[#allocation8 + $0xa8] ss:$12 sps:$4 sm:$0xff]   ;;  %v5095_v19 = vld [vmem:[%s7271_s6 + $0x98] ss:$12 sps:$4 sm:$0xff]  }
 0x3c7   :  { %v443_v21 = vpack.c.bf16 %v441_v20, %v441_v20  ;;  %v5096_v20 = vld [vmem:[%s7271_s6 + $0xb0] ss:$12 sps:$4 sm:$0xff]  }
 0x3c9   :  { %4570 = vmatmul.mubr.msk.bf16.vlgmr.msra.gmra.mrb[12].mxu1 %vm419_vm2, %v443_v21  ;;  %v6253_v21 = vld [vmem:[#allocation8 + $0x8] ss:$12 sps:$4 sm:$0xff]  }
 0x3ca   :  { %961 = vmatprep.mubr.bf16.mxu1 %v5733_v23  ;;  %930 = vmatpush1.bf16.msra.mxu1 %v5041_v27  ;;  %v6271_v27 = vld [vmem:[#allocation8 + $0x68] ss:$12 sps:$4 sm:$0xff]  }
 0x3cb   :  { %931 = vmatprep.subr.bf16.mxu1 %v5049_v30  ;;  %v6279_v30 = vld [vmem:[#allocation8 + $0x98] ss:$12 sps:$4 sm:$0xff]  }
 0x3ce   :  { %932 = vmatpush1.bf16.msra.mxu1 %v5047_v32  ;;  %v6283_v32 = vld [vmem:[#allocation8 + $0xb0] ss:$12 sps:$4 sm:$0xff]  }
 0x3cf   :  { %933 = vmatprep.subr.bf16.mxu1 %v5055_v33 }
 0x3d2   :  { %934 = vmatpush1.bf16.msra.mxu1 %v5053_v34 }
 0x3d3   :  { %935 = vmatprep.subr.bf16.mxu1 %v5061_v35 }
 0x3d6   :  { %936 = vmatpush1.bf16.msra.mxu1 %v5059_v36 }
 0x3d7   :  { %937 = vmatprep.subr.bf16.mxu1 %v5067_v37 }
 0x3da   :  { %938 = vmatpush1.bf16.msra.mxu1 %v5065_v38 }
 0x3db   :  { %939 = vmatprep.subr.bf16.mxu1 %v5073_v57 }
 0x3de   :  { %940 = vmatpush1.bf16.msra.mxu1 %v5071_v58 }
 0x3df   :  { %941 = vmatprep.subr.bf16.mxu1 %v5079_v61 }
 0x3e2   :  { %942 = vmatpush1.bf16.msra.mxu1 %v5077_v62 }
 0x3e3   :  { %943 = vmatprep.subr.bf16.mxu1 %v5085_v2 }
 0x3e6   :  { %944 = vmatpush1.bf16.msra.mxu1 %v5083_v4 }
 0x3e7   :  { %4613 = vmatprep.subr.bf16.mxu1 %v5731_v0 }
 0x494   :  { %v485_v39 = vpop.f32.mrb[8].mxu1 }
 0x495   :  { %v4565_v40 = vpop.f32.mrb[9].mxu1 }
 0x496   :  { %v488_v41 = vpop.f32.mrb[10].mxu1 }
 0x497   :  { %v4566_v42 = vpop.f32.mrb[11].mxu1  ;;  %v1045_v41 = vld [vmem:[#allocation11] sm:$0x7] }
 0x498   :  { %v784_v42 = vld [vmem:[#allocation9] sm:$0x7] }
 0x49c   :  { %v531_v43 = vpop.f32.mrb[12].mxu1 }
 0x49d   :  { %v537_v45 = vpack.c.bf16 %v531_v43, %v485_v39  ;;  %v4571_v46 = vpop.f32.mrb[13].mxu1  ;;  %v6308_v43 = vrot.slane %v1045_v41, %v6065_v31 }
 0x49e   :  { %v534_v48 = vpop.f32.mrb[14].mxu1 }
 0x49f   :  { %v4572_v49 = vpop.f32.mrb[15].mxu1  ;;  %4610 = vmatmul.mubr.bf16.vlgmr.msra.gmra.mrb[4].mxu0 %v537_v45  ;;  %v789_v45 = vrot.slane %v784_v42, %v6065_v31 }
 0x4a0   :  { %1191 = vmatpush1.bf16.msra.mxu0 %v6136_v44  ;;  %1222 = vmatprep.mubr.bf16.mxu0 %v5733_v23  ;;  %v6315_v49 = vsub.s32 1, %v6058_v26 }
 0x4a1   :  { %1192 = vmatprep.subr.bf16.mxu0 %v6138_v47 }
 0x4a2   :  { %v6321_v62 = vrot.slane %v1045_v41, %v6315_v49 }
 0x4a4   :  { %1193 = vmatpush1.bf16.msra.mxu0 %v6141_v50 }
 0x4a5   :  { %1194 = vmatprep.subr.bf16.mxu0 %v6145_v51 }
 0x4a8   :  { %1195 = vmatpush1.bf16.msra.mxu0 %v6148_v52 }
 0x4a9   :  { %1196 = vmatprep.subr.bf16.mxu0 %v6151_v53 }
 0x4ac   :  { %1197 = vmatpush1.bf16.msra.mxu0 %v6154_v54 }
 0x4ad   :  { %1198 = vmatprep.subr.bf16.mxu0 %v6158_v55 }
 0x4b0   :  { %1199 = vmatpush1.bf16.msra.mxu0 %v6160_v56 }
 0x4b1   :  { %1200 = vmatprep.subr.bf16.mxu0 %v6170_v59 }
 0x4b4   :  { %1201 = vmatpush1.bf16.msra.mxu0 %v6172_v60 }
 0x4b5   :  { %1202 = vmatprep.subr.bf16.mxu0 %v6181_v63 }
 0x4b8   :  { %1203 = vmatpush1.bf16.msra.mxu0 %v6184_v1 }
 0x4b9   :  { %1204 = vmatprep.subr.bf16.mxu0 %v6190_v3 }
 0x4bc   :  { %1205 = vmatpush1.bf16.msra.mxu0 %v6196_v5 }
 0x4bd   :  { %1342 = vmatprep.subr.bf16.mxu0 %v6109_v29 }
 0x4bf   :  { %1223 = vmatmul.mubr.bf16.vlgmr.msra.gmra.mrb[8].mxu0 %v5733_v23 }
 0x4c0   :  { %1343 = vmatpush1.bf16.msra.mxu0 %v6136_v44  ;;  %1374 = vmatprep.mubr.bf16.mxu0 %v5733_v23 }
 0x4c1   :  { %1344 = vmatprep.subr.bf16.mxu0 %v6138_v47 }
 0x4c4   :  { %1345 = vmatpush1.bf16.msra.mxu0 %v6141_v50 }
 0x4c5   :  { %1346 = vmatprep.subr.bf16.mxu0 %v6145_v51 }
 0x4c8   :  { %1347 = vmatpush1.bf16.msra.mxu0 %v6148_v52 }
 0x4c9   :  { %1348 = vmatprep.subr.bf16.mxu0 %v6151_v53 }
 0x4cc   :  { %1349 = vmatpush1.bf16.msra.mxu0 %v6154_v54 }
 0x4cd   :  { %1350 = vmatprep.subr.bf16.mxu0 %v6158_v55 }
 0x4d0   :  { %1351 = vmatpush1.bf16.msra.mxu0 %v6160_v56 }
 0x4d1   :  { %1352 = vmatprep.subr.bf16.mxu0 %v6170_v59 }
 0x4d4   :  { %1353 = vmatpush1.bf16.msra.mxu0 %v6172_v60 }
 0x4d5   :  { %1354 = vmatprep.subr.bf16.mxu0 %v6181_v63 }
 0x4d8   :  { %1355 = vmatpush1.bf16.msra.mxu0 %v6184_v1 }
 0x4d9   :  { %1356 = vmatprep.subr.bf16.mxu0 %v6190_v3 }
 0x4dc   :  { %1357 = vmatpush1.bf16.msra.mxu0 %v6196_v5 }
 0x4dd   :  { %1498 = vmatprep.subr.bf16.mxu0 %v6109_v29 }
 0x572   :  { %v742_v6 = vpop.f32.mrb[4].mxu0 }
 0x573   :  { %v4611_v8 = vpop.f32.mrb[5].mxu0  ;;  %5185 = vtanh.f32 %v742_v6 }
 0x574   :  { %v745_v9 = vpop.f32.mrb[6].mxu0  ;;  %v793_v8 = vrot.slane %v784_v42, %v6315_v49 }
 0x575   :  { %5187 = vtanh.f32 %v745_v9  ;;  %v4612_v10 = vpop.f32.mrb[7].mxu0 }
 0x57d   :  { %v5186_v11 = vpop.eup %5185 }
 0x57f   :  { %v5188_v12 = vpop.eup %5187 }
 0x580   :  { %v751_v7 = vpack.c.bf16 %v5188_v12, %v5186_v11 }
 0x582   :  { %962 = vmatmul.mubr.bf16.vlgmr.msra.gmra.mrb[16].mxu1 %v751_v7 }
 0x583   :  { %4614 = vmatpush3.bf16.msra.mxu1 %v5089_v13  ;;  %4629 = vmatprep.mubr.msk.bf16.mxu1 %vm5732_vm0, %v5731_v0 }
 0x584   :  { %4615 = vmatprep.subr.bf16.mxu1 %v5731_v0 }
 0x587   :  { %4616 = vmatpush3.bf16.msra.mxu1 %v5090_v14 }
 0x588   :  { %4617 = vmatprep.subr.bf16.mxu1 %v5731_v0 }
 0x58b   :  { %4618 = vmatpush3.bf16.msra.mxu1 %v5091_v15 }
 0x58c   :  { %4619 = vmatprep.subr.bf16.mxu1 %v5731_v0 }
 0x58f   :  { %4620 = vmatpush3.bf16.msra.mxu1 %v5092_v16 }
 0x590   :  { %4621 = vmatprep.subr.bf16.mxu1 %v5731_v0 }
 0x592   :  { %v1224_v33 = vpop.f32.mrb[8].mxu0 }
 0x593   :  { %4622 = vmatpush3.bf16.msra.mxu1 %v5093_v17  ;;  %v1226_v34 = vpop.f32.mrb[9].mxu0  ;;  %v1225_v46 = vadd.f32 %v1224_v33, %v6308_v43 }
 0x594   :  { %4623 = vmatprep.subr.bf16.mxu1 %v5731_v0  ;;  %v1228_v35 = vpop.f32.mrb[10].mxu0  ;;  %v1227_v12 = vadd.f32 %v1226_v34, %v6321_v62 }
 0x595   :  { %v1229_v36 = vpop.f32.mrb[11].mxu0  ;;  %v1272_v57 = vrot.slane %v1225_v46, 1 }
 0x596   :  { %v1290_v14 = vrot.slane %v1227_v12, 1  ;;  %v6333_v36 = vsub.s32 2, %v6058_v26 }
 0x597   :  { %4624 = vmatpush3.bf16.msra.mxu1 %v5094_v18 }
 0x598   :  { %4625 = vmatprep.subr.bf16.mxu1 %v5731_v0 }
 0x59b   :  { %4626 = vmatpush3.bf16.msra.mxu1 %v5095_v19 }
 0x59c   :  { %4627 = vmatprep.subr.bf16.mxu1 %v5731_v0 }
 0x59f   :  { %4628 = vmatpush3.bf16.msra.mxu1 %v5096_v20 }
 0x5a0   :  { %4633 = vmatprep.subr.bf16.mxu1 %v5731_v0 }
 0x5a2   :  { %4630 = vmatmul.mubr.bf16.vlgmr.msra.gmra.mrb[20].mxu1 %v751_v7 }
 0x5a3   :  { %4634 = vmatpush3.bf16.msra.mxu1 %v6253_v21  ;;  %4649 = vmatprep.mubr.msk.bf16.mxu1 %vm5732_vm0, %v5731_v0 }
 0x5a4   :  { %4635 = vmatprep.subr.bf16.mxu1 %v5731_v0 }
 0x5a7   :  { %4636 = vmatpush3.bf16.msra.mxu1 %v6257_v22 }
 0x5a8   :  { %4637 = vmatprep.subr.bf16.mxu1 %v5731_v0 }
 0x5ab   :  { %4638 = vmatpush3.bf16.msra.mxu1 %v6263_v24 }
 0x5ac   :  { %4639 = vmatprep.subr.bf16.mxu1 %v5731_v0 }
 0x5af   :  { %4640 = vmatpush3.bf16.msra.mxu1 %v6267_v25 }
 0x5b0   :  { %4641 = vmatprep.subr.bf16.mxu1 %v5731_v0 }
 0x5b3   :  { %4642 = vmatpush3.bf16.msra.mxu1 %v6271_v27 }
 0x5b4   :  { %4643 = vmatprep.subr.bf16.mxu1 %v5731_v0 }
 0x5b7   :  { %4644 = vmatpush3.bf16.msra.mxu1 %v6275_v28 }
 0x5b8   :  { %4645 = vmatprep.subr.bf16.mxu1 %v5731_v0 }
 0x5bb   :  { %4646 = vmatpush3.bf16.msra.mxu1 %v6279_v30 }
 0x5bc   :  { %4647 = vmatprep.subr.bf16.mxu1 %v5731_v0 }
 0x5bf   :  { %4648 = vmatpush3.bf16.msra.mxu1 %v6283_v32 }
 0x5c0   :  { %4653 = vmatprep.subr.bf16.mxu1 %v5731_v0 }
 0x5c2   :  { %4650 = vmatmul.mubr.bf16.vlgmr.msra.gmra.mrb[24].mxu1 %v5733_v23 }
 0x5c3   :  { %4654 = vmatpush3.bf16.msra.mxu1 %v6253_v21  ;;  %4669 = vmatprep.mubr.msk.bf16.mxu1 %vm5732_vm0, %v5731_v0 }
 0x5c4   :  { %4655 = vmatprep.subr.bf16.mxu1 %v5731_v0 }
 0x5c7   :  { %4656 = vmatpush3.bf16.msra.mxu1 %v6257_v22 }
 0x5c8   :  { %4657 = vmatprep.subr.bf16.mxu1 %v5731_v0 }
 0x5cb   :  { %4658 = vmatpush3.bf16.msra.mxu1 %v6263_v24 }
 0x5cc   :  { %4659 = vmatprep.subr.bf16.mxu1 %v5731_v0 }
 0x5cf   :  { %4660 = vmatpush3.bf16.msra.mxu1 %v6267_v25 }
 0x5d0   :  { %4661 = vmatprep.subr.bf16.mxu1 %v5731_v0 }
 0x5d3   :  { %4662 = vmatpush3.bf16.msra.mxu1 %v6271_v27 }
 0x5d4   :  { %4663 = vmatprep.subr.bf16.mxu1 %v5731_v0 }
 0x5d7   :  { %4664 = vmatpush3.bf16.msra.mxu1 %v6275_v28 }
 0x5d8   :  { %4665 = vmatprep.subr.bf16.mxu1 %v5731_v0 }
 0x5db   :  { %4666 = vmatpush3.bf16.msra.mxu1 %v6279_v30 }
 0x5dc   :  { %4667 = vmatprep.subr.bf16.mxu1 %v5731_v0 }
 0x5df   :  { %4668 = vmatpush3.bf16.msra.mxu1 %v6283_v32 }
 0x5e0   :  { %4673 = vmatprep.subr.bf16.mxu1 %v5731_v0 }
 0x655   :  { %v963_v37 = vpop.f32.mrb[16].mxu1 }
 0x656   :  { %v965_v38 = vpop.f32.mrb[17].mxu1  ;;  %v6312_v48 = vadd.f32 %v963_v37, %v789_v45 }
 0x657   :  { %v967_v39 = vpop.f32.mrb[18].mxu1  ;;  %v6326_v7 = vadd.f32 %v965_v38, %v793_v8  ;;  %v6336_v38 = vrot.slane %v1045_v41, %v6333_v36 }
 0x658   :  { %v969_v40 = vpop.f32.mrb[19].mxu1  ;;  %v6317_v58 = vadd.f32 %v967_v39, %v789_v45  ;;  %v1275_v61 = vadd.f32 %v1225_v46, %v6312_v48  ;;  %v797_v45 = vrot.slane %v784_v42, %v6333_v36 }
 0x659   :  { %v6328_v15 = vadd.f32 %v969_v40, %v793_v8  ;;  %v1293_v16 = vadd.f32 %v1227_v12, %v6326_v7 }
 0x65a   :  { %v1276_v6 = vadd.f32 %v1272_v57, %v6317_v58  ;;  %v4214_v10 = vmul.f32 -1.442695, %v1275_v61 }
 0x65b   :  { %v1294_v17 = vadd.f32 %v1290_v14, %v6328_v15  ;;  %v4216_v18 = vmul.f32 -1.442695, %v1293_v16 }
 0x65c   :  { %v4215_v13 = vmul.f32 -1.442695, %v1276_v6  ;;  %5189 = vpow2.f32 %v4214_v10 }
 0x65d   :  { %v4217_v19 = vmul.f32 -1.442695, %v1294_v17 }
 0x65e   :  { %5191 = vpow2.f32 %v4215_v13 }
 0x65f   :  { %5193 = vpow2.f32 %v4216_v18 }
 0x660   :  { %5195 = vpow2.f32 %v4217_v19 }
 0x666   :  { %v5190_v20 = vpop.eup %5189 }
 0x667   :  { %v1283_v35 = vadd.f32 1.0, %v5190_v20 }
 0x668   :  { %v5192_v33 = vpop.eup %5191 }
 0x669   :  { %v1284_v34 = vadd.f32 1.0, %v5192_v33  ;;  %5197 = vrcp.f32 %v1283_v35  ;;  %v5194_v37 = vpop.eup %5193 }
 0x66a   :  { %v5196_v39 = vpop.eup %5195  ;;  %v1301_v40 = vadd.f32 1.0, %v5194_v37 }
 0x66b   :  { %5199 = vrcp.f32 %v1284_v34 }
 0x66c   :  { %5201 = vrcp.f32 %v1301_v40 }
 0x673   :  { %v5198_v6 = vpop.eup %5197 }
 0x675   :  { %v1006_v2 = vpop.f32.mrb[20].mxu1  ;;  %v5200_v14 = vpop.eup %5199 }
 0x676   :  { %v4631_v4 = vpop.f32.mrb[21].mxu1  ;;  %v6340_v10 = vadd.f32 %v1006_v2, %v797_v45  ;;  %v5202_v18 = vpop.eup %5201 }
 0x677   :  { %v1009_v9 = vpop.f32.mrb[22].mxu1  ;;  %v1302_v4 = vadd.f32 1.0, %v5196_v39  ;;  %v1317_v20 = vsub.f32 1.0, %v5202_v18  ;;  %v1321_v2 = vmul.f32 0.0, %v5202_v18 }
 0x678   :  { %v4632_v11 = vpop.f32.mrb[23].mxu1  ;;  %v6342_v41 = vadd.f32 %v1009_v9, %v797_v45 }
 0x679   :  { %5203 = vrcp.f32 %v1302_v4 }
 0x683   :  { %v5204_v19 = vpop.eup %5203 }
 0x684   :  { %v1318_v34 = vsub.f32 1.0, %v5204_v19  ;;  %v1322_v40 = vmul.f32 0.0, %v5204_v19 }
 0x695   :  { %v1265_v46 = vpop.f32.mrb[24].mxu1 }
 0x696   :  { %v1266_v57 = vadd.f32 %v1265_v46, %v6336_v38  ;;  %v4651_v61 = vpop.f32.mrb[25].mxu1 }
 0x697   :  { %v1268_v8 = vpop.f32.mrb[26].mxu1 }
 0x698   :  { %v1308_v11 = vrot.slane %v1266_v57, 1  ;;  %v1311_v12 = vmul.f32 %v5198_v6, %v1266_v57  ;;  %v4652_v13 = vpop.f32.mrb[27].mxu1 }
 0x69a   :  { %v1312_v16 = vmul.f32 %v5200_v14, %v1308_v11  ;;  %v1313_v17 = vadd.f32 %v1311_v12, %v6340_v10 }
 0x69c   :  { %v1314_v42 = vadd.f32 %v1312_v16, %v6342_v41  ;;  %5205 = vtanh.f32 %v1313_v17 }
 0x69e   :  { %5207 = vtanh.f32 %v1314_v42 }
 0x6a6   :  { %v5206_v33 = vpop.eup %5205 }
 0x6a7   :  { %v1319_v35 = vmul.f32 %v5206_v33, %v1317_v20 }
 0x6a8   :  { %v5208_v37 = vpop.eup %5207 }
 0x6a9   :  { %v1320_v39 = vmul.f32 %v5208_v37, %v1318_v34  ;;  %v6346_v9 = vadd.f32 %v1321_v2, %v1319_v35 }
 0x6ab   :  { %v6348_v45 = vadd.f32 %v1322_v40, %v1320_v39  ;;  %v1332_v57 = vpack.c.bf16 %v6346_v9, %v6346_v9 }
 0x6ad   :  { %v1327_v46 = vrot.slane %v6348_v45, 7  ;;  %v1333_v61 = vpack.c.bf16 %v6348_v45, %v6348_v45  ;;  %v1336_v8 = vunpack.c.l.b16 %v1332_v57 }
 0x6af   :  { %v1329_v4 = vsel %vm1328_vm5, %v1327_v46, %v6346_v9  ;;  %v1337_v6 = vunpack.c.l.b16 %v1333_v61 }
 0x6b0   :  { %1331 = vst [vmem:[#allocation2] sm:$0x3] %v1329_v4 }
 0x6b1   :  { %v1338_v11 = vrot.slane %v1337_v6, 7 }
 0x6b3   :  { %v1339_v12 = vsel %vm1328_vm5, %v1338_v11, %v1336_v8 }
 0x6b4   :  { %v1340_v13 = vpack.c.b16 %v1339_v12, %v1339_v12 }
 0x6b6   :  { %1375 = vmatmul.mubr.bf16.vlgmr.msra.gmra.mrb[12].mxu0 %v1340_v13  ;;  %4670 = vmatmul.mubr.bf16.vlgmr.msra.gmra.mrb[28].mxu1 %v1340_v13 }
 0x6b7   :  { %1499 = vmatpush1.bf16.msra.mxu0 %v6136_v44  ;;  %4674 = vmatpush3.bf16.msra.mxu1 %v6253_v21 }
 0x6b8   :  { %1500 = vmatprep.subr.bf16.mxu0 %v6138_v47  ;;  %4675 = vmatprep.subr.bf16.mxu1 %v5731_v0 }
 0x6b9   :  { %1530 = vmatprep.mubr.bf16.mxu0 %v5733_v23  ;;  %4689 = vmatprep.mubr.msk.bf16.mxu1 %vm5732_vm0, %v5731_v0 }
 0x6bb   :  { %1501 = vmatpush1.bf16.msra.mxu0 %v6141_v50  ;;  %4676 = vmatpush3.bf16.msra.mxu1 %v6257_v22 }
 0x6bc   :  { %1502 = vmatprep.subr.bf16.mxu0 %v6145_v51  ;;  %4677 = vmatprep.subr.bf16.mxu1 %v5731_v0 }
 0x6bf   :  { %1503 = vmatpush1.bf16.msra.mxu0 %v6148_v52  ;;  %4678 = vmatpush3.bf16.msra.mxu1 %v6263_v24 }
 0x6c0   :  { %1504 = vmatprep.subr.bf16.mxu0 %v6151_v53  ;;  %4679 = vmatprep.subr.bf16.mxu1 %v5731_v0 }
 0x6c3   :  { %1505 = vmatpush1.bf16.msra.mxu0 %v6154_v54  ;;  %4680 = vmatpush3.bf16.msra.mxu1 %v6267_v25 }
 0x6c4   :  { %1506 = vmatprep.subr.bf16.mxu0 %v6158_v55  ;;  %4681 = vmatprep.subr.bf16.mxu1 %v5731_v0 }
 0x6c7   :  { %1507 = vmatpush1.bf16.msra.mxu0 %v6160_v56  ;;  %4682 = vmatpush3.bf16.msra.mxu1 %v6271_v27 }
 0x6c8   :  { %1508 = vmatprep.subr.bf16.mxu0 %v6170_v59  ;;  %4683 = vmatprep.subr.bf16.mxu1 %v5731_v0 }
 0x6cb   :  { %1509 = vmatpush1.bf16.msra.mxu0 %v6172_v60  ;;  %4684 = vmatpush3.bf16.msra.mxu1 %v6275_v28 }
 0x6cc   :  { %1510 = vmatprep.subr.bf16.mxu0 %v6181_v63  ;;  %4685 = vmatprep.subr.bf16.mxu1 %v5731_v0 }
 0x6cf   :  { %1511 = vmatpush1.bf16.msra.mxu0 %v6184_v1  ;;  %4686 = vmatpush3.bf16.msra.mxu1 %v6279_v30 }
 0x6d0   :  { %1512 = vmatprep.subr.bf16.mxu0 %v6190_v3  ;;  %4687 = vmatprep.subr.bf16.mxu1 %v5731_v0 }
 0x6d3   :  { %1513 = vmatpush1.bf16.msra.mxu0 %v6196_v5  ;;  %4688 = vmatpush3.bf16.msra.mxu1 %v6283_v32 }
 0x6d4   :  { %1658 = vmatprep.subr.bf16.mxu0 %v6109_v29  ;;  %4693 = vmatprep.subr.bf16.mxu1 %v5731_v0 }
 0x789   :  { %v1376_v14 = vpop.f32.mrb[12].mxu0  ;;  %v1417_v16 = vpop.f32.mrb[28].mxu1 }
 0x78a   :  { %v1377_v17 = vadd.f32 %v1376_v14, %v6308_v43  ;;  %v1378_v42 = vpop.f32.mrb[13].mxu0  ;;  %v4671_v18 = vpop.f32.mrb[29].mxu1 }
 0x78b   :  { %v1379_v19 = vadd.f32 %v1378_v42, %v6321_v62  ;;  %v1380_v20 = vpop.f32.mrb[14].mxu0  ;;  %v1420_v33 = vpop.f32.mrb[30].mxu1 }
 0x78c   :  { %v1424_v2 = vrot.slane %v1377_v17, 7  ;;  %v1428_v35 = vadd.f32 %v1377_v17, %v6317_v58  ;;  %v1381_v34 = vpop.f32.mrb[15].mxu0  ;;  %v4672_v37 = vpop.f32.mrb[31].mxu1  ;;  %v1418_v33 = vadd.f32 %v1417_v16, %v6336_v38 }
 0x78d   :  { %v1442_v39 = vrot.slane %v1379_v19, 7  ;;  %v1446_v4 = vadd.f32 %v1379_v19, %v6328_v15 }
 0x78e   :  { %v1427_v40 = vadd.f32 %v1424_v2, %v6312_v48  ;;  %v4219_v57 = vmul.f32 -1.442695, %v1428_v35  ;;  %v1460_v35 = vrot.slane %v1418_v33, 7 }
 0x78f   :  { %v1445_v61 = vadd.f32 %v1442_v39, %v6326_v7  ;;  %v4221_v11 = vmul.f32 -1.442695, %v1446_v4  ;;  %v1473_v39 = vrot.slane %v6346_v9, 7 }
 0x790   :  { %v4218_v6 = vmul.f32 -1.442695, %v1427_v40  ;;  %5209 = vpow2.f32 %v4219_v57 }
 0x791   :  { %v4220_v8 = vmul.f32 -1.442695, %v1445_v61 }
 0x792   :  { %5211 = vpow2.f32 %v4218_v6 }
 0x793   :  { %5213 = vpow2.f32 %v4220_v8 }
 0x794   :  { %5215 = vpow2.f32 %v4221_v11 }
 0x79a   :  { %v5210_v12 = vpop.eup %5209 }
 0x79b   :  { %v1436_v13 = vadd.f32 1.0, %v5210_v12 }
 0x79c   :  { %v5212_v14 = vpop.eup %5211 }
 0x79d   :  { %v5214_v17 = vpop.eup %5213  ;;  %v1435_v42 = vadd.f32 1.0, %v5212_v14  ;;  %5217 = vrcp.f32 %v1436_v13 }
 0x79e   :  { %v1453_v18 = vadd.f32 1.0, %v5214_v17  ;;  %v5216_v20 = vpop.eup %5215 }
 0x79f   :  { %5219 = vrcp.f32 %v1435_v42  ;;  %v1454_v19 = vadd.f32 1.0, %v5216_v20 }
 0x7a0   :  { %5221 = vrcp.f32 %v1453_v18 }
 0x7a1   :  { %5223 = vrcp.f32 %v1454_v19 }
 0x7a7   :  { %v5218_v2 = vpop.eup %5217 }
 0x7a8   :  { %v1464_v34 = vmul.f32 %v5218_v2, %v1418_v33 }
 0x7a9   :  { %v5220_v37 = vpop.eup %5219 }
 0x7aa   :  { %v5222_v40 = vpop.eup %5221  ;;  %v1463_v57 = vmul.f32 %v5220_v37, %v1460_v35  ;;  %v1466_v61 = vadd.f32 %v1464_v34, %v6342_v41 }
 0x7ab   :  { %v1476_v4 = vmul.f32 %v5222_v40, %v1473_v39  ;;  %v5224_v8 = vpop.eup %5223  ;;  %v1469_v12 = vsub.f32 1.0, %v5222_v40 }
 0x7ac   :  { %v1465_v6 = vadd.f32 %v1463_v57, %v6340_v10  ;;  %5225 = vtanh.f32 %v1466_v61  ;;  %v1470_v11 = vsub.f32 1.0, %v5224_v8  ;;  %v1477_v14 = vmul.f32 %v5224_v8, %v1327_v46 }
 0x7ae   :  { %5227 = vtanh.f32 %v1465_v6 }
 0x7b6   :  { %v5226_v16 = vpop.eup %5225 }
 0x7b7   :  { %v1472_v13 = vmul.f32 %v5226_v16, %v1470_v11 }
 0x7b8   :  { %v5228_v17 = vpop.eup %5227 }
 0x7b9   :  { %v1471_v42 = vmul.f32 %v5228_v17, %v1469_v12  ;;  %v6407_v9 = vadd.f32 %v1477_v14, %v1472_v13 }
 0x7bb   :  { %v6409_v18 = vadd.f32 %v1476_v4, %v1471_v42  ;;  %v1482_v20 = vrot.slane %v6407_v9, 7  ;;  %v1489_v45 = vpack.c.bf16 %v6407_v9, %v6407_v9 }
 0x7bd   :  { %v1484_v33 = vsel %vm1483_vm6, %v1482_v20, %v6409_v18  ;;  %v1488_v19 = vpack.c.bf16 %v6409_v18, %v6409_v18  ;;  %v1493_v2 = vunpack.c.l.b16 %v1489_v45 }
 0x7be   :  { %1487 = vst [vmem:[#allocation2 + $0x1] sm:$0x6] %v1484_v33 }
 0x7bf   :  { %v1492_v46 = vunpack.c.l.b16 %v1488_v19 }
 0x7c1   :  { %v1494_v35 = vrot.slane %v1492_v46, 1 }
 0x7c3   :  { %v1495_v34 = vsel %vm1328_vm5, %v1493_v2, %v1494_v35 }
 0x7c4   :  { %v1496_v37 = vpack.c.b16 %v1495_v34, %v1495_v34 }
 0x7c6   :  { %1531 = vmatmul.mubr.bf16.vlgmr.msra.gmra.mrb[16].mxu0 %v1496_v37  ;;  %4690 = vmatmul.mubr.bf16.vlgmr.msra.gmra.mrb[32].mxu1 %v1496_v37 }
 0x7c7   :  { %1659 = vmatpush1.bf16.msra.mxu0 %v6136_v44  ;;  %4694 = vmatpush3.bf16.msra.mxu1 %v6253_v21 }
 0x7c8   :  { %1660 = vmatprep.subr.bf16.mxu0 %v6138_v47  ;;  %4695 = vmatprep.subr.bf16.mxu1 %v5731_v0 }
 0x7c9   :  { %1690 = vmatprep.mubr.bf16.mxu0 %v5733_v23  ;;  %4709 = vmatprep.mubr.msk.bf16.mxu1 %vm5732_vm0, %v5731_v0 }
 0x7cb   :  { %1661 = vmatpush1.bf16.msra.mxu0 %v6141_v50  ;;  %4696 = vmatpush3.bf16.msra.mxu1 %v6257_v22 }
 0x7cc   :  { %1662 = vmatprep.subr.bf16.mxu0 %v6145_v51  ;;  %4697 = vmatprep.subr.bf16.mxu1 %v5731_v0 }
 0x7cf   :  { %1663 = vmatpush1.bf16.msra.mxu0 %v6148_v52  ;;  %4698 = vmatpush3.bf16.msra.mxu1 %v6263_v24 }
 0x7d0   :  { %1664 = vmatprep.subr.bf16.mxu0 %v6151_v53  ;;  %4699 = vmatprep.subr.bf16.mxu1 %v5731_v0 }
 0x7d3   :  { %1665 = vmatpush1.bf16.msra.mxu0 %v6154_v54  ;;  %4700 = vmatpush3.bf16.msra.mxu1 %v6267_v25 }
 0x7d4   :  { %1666 = vmatprep.subr.bf16.mxu0 %v6158_v55  ;;  %4701 = vmatprep.subr.bf16.mxu1 %v5731_v0 }
 0x7d7   :  { %1667 = vmatpush1.bf16.msra.mxu0 %v6160_v56  ;;  %4702 = vmatpush3.bf16.msra.mxu1 %v6271_v27 }
 0x7d8   :  { %1668 = vmatprep.subr.bf16.mxu0 %v6170_v59  ;;  %4703 = vmatprep.subr.bf16.mxu1 %v5731_v0 }
 0x7db   :  { %1669 = vmatpush1.bf16.msra.mxu0 %v6172_v60  ;;  %4704 = vmatpush3.bf16.msra.mxu1 %v6275_v28 }
 0x7dc   :  { %1670 = vmatprep.subr.bf16.mxu0 %v6181_v63  ;;  %4705 = vmatprep.subr.bf16.mxu1 %v5731_v0 }
 0x7df   :  { %1671 = vmatpush1.bf16.msra.mxu0 %v6184_v1  ;;  %4706 = vmatpush3.bf16.msra.mxu1 %v6279_v30 }
 0x7e0   :  { %1672 = vmatprep.subr.bf16.mxu0 %v6190_v3  ;;  %4707 = vmatprep.subr.bf16.mxu1 %v5731_v0 }
 0x7e3   :  { %1673 = vmatpush1.bf16.msra.mxu0 %v6196_v5  ;;  %4708 = vmatpush3.bf16.msra.mxu1 %v6283_v32 }
 0x7e4   :  { %1818 = vmatprep.subr.bf16.mxu0 %v6109_v29  ;;  %4713 = vmatprep.subr.bf16.mxu1 %v5731_v0 }
 0x899   :  { %v1532_v39 = vpop.f32.mrb[16].mxu0  ;;  %v1573_v40 = vpop.f32.mrb[32].mxu1 }
 0x89a   :  { %v1533_v57 = vadd.f32 %v1532_v39, %v6308_v43  ;;  %v1534_v61 = vpop.f32.mrb[17].mxu0  ;;  %v4691_v4 = vpop.f32.mrb[33].mxu1 }
 0x89b   :  { %v1535_v6 = vadd.f32 %v1534_v61, %v6321_v62  ;;  %v1536_v8 = vpop.f32.mrb[18].mxu0  ;;  %v1576_v11 = vpop.f32.mrb[34].mxu1 }
 0x89c   :  { %v1580_v16 = vrot.slane %v1533_v57, 6  ;;  %v1581_v12 = vrot.slane %v1533_v57, 7  ;;  %v1537_v13 = vpop.f32.mrb[19].mxu0  ;;  %v4692_v14 = vpop.f32.mrb[35].mxu1  ;;  %v1574_v11 = vadd.f32 %v1573_v40, %v6336_v38 }
 0x89d   :  { %v1599_v17 = vrot.slane %v1535_v6, 6  ;;  %v1600_v33 = vrot.slane %v1535_v6, 7 }
 0x89e   :  { %v1584_v42 = vadd.f32 %v1580_v16, %v6312_v48  ;;  %v1585_v29 = vadd.f32 %v1581_v12, %v6317_v58  ;;  %v1618_v12 = vrot.slane %v1574_v11, 6  ;;  %v1619_v14 = vrot.slane %v1574_v11, 7 }
 0x89f   :  { %v1603_v19 = vadd.f32 %v1599_v17, %v6326_v7  ;;  %v1604_v35 = vadd.f32 %v1600_v33, %v6328_v15 }
 0x8a0   :  { %v4222_v45 = vmul.f32 -1.442695, %v1584_v42  ;;  %v4223_v46 = vmul.f32 -1.442695, %v1585_v29  ;;  %v1632_v29 = vrot.slane %v6409_v18, 7 }
 0x8a1   :  { %v4224_v2 = vmul.f32 -1.442695, %v1603_v19  ;;  %v4225_v34 = vmul.f32 -1.442695, %v1604_v35 }
 0x8a2   :  { %5229 = vpow2.f32 %v4222_v45 }
 0x8a3   :  { %5231 = vpow2.f32 %v4223_v46 }
 0x8a4   :  { %5233 = vpow2.f32 %v4224_v2 }
 0x8a5   :  { %5235 = vpow2.f32 %v4225_v34 }
 0x8ac   :  { %v5230_v37 = vpop.eup %5229 }
 0x8ad   :  { %v5232_v39 = vpop.eup %5231  ;;  %v1592_v57 = vadd.f32 1.0, %v5230_v37 }
 0x8ae   :  { %v5234_v61 = vpop.eup %5233  ;;  %v1593_v4 = vadd.f32 1.0, %v5232_v39 }
 0x8af   :  { %5237 = vrcp.f32 %v1592_v57  ;;  %v1611_v8 = vadd.f32 1.0, %v5234_v61  ;;  %v5236_v6 = vpop.eup %5235 }
 0x8b0   :  { %5239 = vrcp.f32 %v1593_v4  ;;  %v1612_v16 = vadd.f32 1.0, %v5236_v6 }
 0x8b1   :  { %5241 = vrcp.f32 %v1611_v8 }
 0x8b2   :  { %5243 = vrcp.f32 %v1612_v16 }
 0x8b9   :  { %v5238_v13 = vpop.eup %5237 }
 0x8ba   :  { %v5240_v17 = vpop.eup %5239  ;;  %v1622_v42 = vmul.f32 %v5238_v13, %v1618_v12 }
 0x8bb   :  { %v5242_v33 = vpop.eup %5241  ;;  %v1623_v19 = vmul.f32 %v5240_v17, %v1619_v14 }
 0x8bc   :  { %v1624_v45 = vadd.f32 %v1622_v42, %v6340_v10  ;;  %v1635_v46 = vmul.f32 %v5242_v33, %v1632_v29  ;;  %v5244_v35 = vpop.eup %5243  ;;  %v1628_v40 = vsub.f32 1.0, %v5242_v33 }
 0x8bd   :  { %v1625_v2 = vadd.f32 %v1623_v19, %v6342_v41  ;;  %v1629_v37 = vsub.f32 1.0, %v5244_v35  ;;  %v1636_v18 = vmul.f32 %v5244_v35, %v1482_v20 }
 0x8be   :  { %5245 = vtanh.f32 %v1624_v45 }
 0x8bf   :  { %5247 = vtanh.f32 %v1625_v2 }
 0x8c8   :  { %v5246_v34 = vpop.eup %5245 }
 0x8c9   :  { %v5248_v39 = vpop.eup %5247  ;;  %v1630_v57 = vmul.f32 %v5246_v34, %v1628_v40 }
 0x8ca   :  { %v1631_v61 = vmul.f32 %v5248_v39, %v1629_v37 }
 0x8cb   :  { %v6467_v4 = vadd.f32 %v1635_v46, %v1630_v57 }
 0x8cc   :  { %v6469_v8 = vadd.f32 %v1636_v18, %v1631_v61 }
 0x8cd   :  { %v1647_v6 = vpack.c.bf16 %v6467_v4, %v6467_v4 }
 0x8ce   :  { %v1641_v11 = vrot.slane %v6469_v8, 7  ;;  %v1648_v16 = vpack.c.bf16 %v6469_v8, %v6469_v8 }
 0x8cf   :  { %v1651_v12 = vunpack.c.l.b16 %v1647_v6 }
 0x8d0   :  { %v1643_v13 = vsel %vm1642_vm7, %v1641_v11, %v6467_v4  ;;  %v1652_v9 = vunpack.c.l.b16 %v1648_v16 }
 0x8d1   :  { %1646 = vst [vmem:[#allocation2 + $0x2] sm:$0xc] %v1643_v13  ;;  %v1653_v20 = vrot.slane %v1651_v12, 2 }
 0x8d2   :  { %v1654_v14 = vrot.slane %v1652_v9, 1 }
 0x8d4   :  { %v1655_v17 = vsel %vm1328_vm5, %v1654_v14, %v1653_v20 }
 0x8d5   :  { %v1656_v42 = vpack.c.b16 %v1655_v17, %v1655_v17 }
 0x8d7   :  { %1691 = vmatmul.mubr.bf16.vlgmr.msra.gmra.mrb[20].mxu0 %v1656_v42  ;;  %4710 = vmatmul.mubr.bf16.vlgmr.msra.gmra.mrb[36].mxu1 %v1656_v42  ;;  %v1792_v42 = vrot.slane %v6467_v4, 7 }
 0x8d8   :  { %1819 = vmatpush1.bf16.msra.mxu0 %v6136_v44  ;;  %4714 = vmatpush3.bf16.msra.mxu1 %v6253_v21  ;;  %v6513_v44 = vld [vmem:[#allocation8 + $0x4] ss:$12 sps:$4 sm:$0xff]  }
 0x8d9   :  { %1820 = vmatprep.subr.bf16.mxu0 %v6138_v47  ;;  %4715 = vmatprep.subr.bf16.mxu1 %v5731_v0 }
 0x8da   :  { %1850 = vmatprep.mubr.bf16.mxu0 %v5733_v23  ;;  %4729 = vmatprep.mubr.msk.bf16.mxu1 %vm5732_vm0, %v5731_v0 }
 0x8dc   :  { %1821 = vmatpush1.bf16.msra.mxu0 %v6141_v50  ;;  %4716 = vmatpush3.bf16.msra.mxu1 %v6257_v22 }
 0x8dd   :  { %1822 = vmatprep.subr.bf16.mxu0 %v6145_v51  ;;  %4717 = vmatprep.subr.bf16.mxu1 %v5731_v0 }
 0x8e0   :  { %1823 = vmatpush1.bf16.msra.mxu0 %v6148_v52  ;;  %4718 = vmatpush3.bf16.msra.mxu1 %v6263_v24 }
 0x8e1   :  { %1824 = vmatprep.subr.bf16.mxu0 %v6151_v53  ;;  %4719 = vmatprep.subr.bf16.mxu1 %v5731_v0 }
 0x8e4   :  { %1825 = vmatpush1.bf16.msra.mxu0 %v6154_v54  ;;  %4720 = vmatpush3.bf16.msra.mxu1 %v6267_v25 }
 0x8e5   :  { %1826 = vmatprep.subr.bf16.mxu0 %v6158_v55  ;;  %4721 = vmatprep.subr.bf16.mxu1 %v5731_v0 }
 0x8e8   :  { %1827 = vmatpush1.bf16.msra.mxu0 %v6160_v56  ;;  %4722 = vmatpush3.bf16.msra.mxu1 %v6271_v27 }
 0x8e9   :  { %1828 = vmatprep.subr.bf16.mxu0 %v6170_v59  ;;  %4723 = vmatprep.subr.bf16.mxu1 %v5731_v0 }
 0x8ec   :  { %1829 = vmatpush1.bf16.msra.mxu0 %v6172_v60  ;;  %4724 = vmatpush3.bf16.msra.mxu1 %v6275_v28 }
 0x8ed   :  { %1830 = vmatprep.subr.bf16.mxu0 %v6181_v63  ;;  %4725 = vmatprep.subr.bf16.mxu1 %v5731_v0 }
 0x8f0   :  { %1831 = vmatpush1.bf16.msra.mxu0 %v6184_v1  ;;  %4726 = vmatpush3.bf16.msra.mxu1 %v6279_v30 }
 0x8f1   :  { %1832 = vmatprep.subr.bf16.mxu0 %v6190_v3  ;;  %4727 = vmatprep.subr.bf16.mxu1 %v5731_v0 }
 0x8f4   :  { %1833 = vmatpush1.bf16.msra.mxu0 %v6196_v5  ;;  %4728 = vmatpush3.bf16.msra.mxu1 %v6283_v32 }
 0x8f5   :  { %1978 = vmatprep.subr.bf16.mxu0 %v6513_v44  ;;  %4733 = vmatprep.subr.bf16.mxu1 %v5731_v0 }
 0x9aa   :  { %v1692_v47 = vpop.f32.mrb[20].mxu0  ;;  %v1733_v50 = vpop.f32.mrb[36].mxu1 }
 0x9ab   :  { %v1693_v51 = vadd.f32 %v1692_v47, %v6308_v43  ;;  %v1694_v52 = vpop.f32.mrb[21].mxu0  ;;  %v4711_v53 = vpop.f32.mrb[37].mxu1  ;;  %v1734_v16 = vadd.f32 %v1733_v50, %v6336_v38 }
 0x9ac   :  { %v1695_v54 = vadd.f32 %v1694_v52, %v6321_v62  ;;  %v1696_v55 = vpop.f32.mrb[22].mxu0  ;;  %v1736_v56 = vpop.f32.mrb[38].mxu1 }
 0x9ad   :  { %v1740_v59 = vrot.slane %v1693_v51, 5  ;;  %v1741_v60 = vrot.slane %v1693_v51, 6  ;;  %v1697_v63 = vpop.f32.mrb[23].mxu0  ;;  %v4712_v1 = vpop.f32.mrb[39].mxu1  ;;  %v1778_v13 = vrot.slane %v1734_v16, 5  ;;  %v1779_v20 = vrot.slane %v1734_v16, 6 }
 0x9ae   :  { %v1759_v3 = vrot.slane %v1695_v54, 5  ;;  %v1760_v33 = vrot.slane %v1695_v54, 6  ;;  %v6585_v16 = vld [vmem:[#allocation8 + $0x78] ss:$12 sps:$4 sm:$0xff]  }
 0x9af   :  { %v1744_v5 = vadd.f32 %v1740_v59, %v6312_v48  ;;  %v1745_v29 = vadd.f32 %v1741_v60, %v6317_v58 }
 0x9b0   :  { %v1763_v19 = vadd.f32 %v1759_v3, %v6326_v7  ;;  %v1764_v35 = vadd.f32 %v1760_v33, %v6328_v15 }
 0x9b1   :  { %v4226_v45 = vmul.f32 -1.442695, %v1744_v5  ;;  %v4227_v46 = vmul.f32 -1.442695, %v1745_v29 }
 0x9b2   :  { %v4228_v2 = vmul.f32 -1.442695, %v1763_v19  ;;  %v4229_v40 = vmul.f32 -1.442695, %v1764_v35 }
 0x9b3   :  { %5249 = vpow2.f32 %v4226_v45 }
 0x9b4   :  { %5251 = vpow2.f32 %v4227_v46 }
 0x9b5   :  { %5253 = vpow2.f32 %v4228_v2 }
 0x9b6   :  { %5255 = vpow2.f32 %v4229_v40 }
 0x9bd   :  { %v5250_v34 = vpop.eup %5249 }
 0x9be   :  { %v5252_v37 = vpop.eup %5251  ;;  %v1752_v39 = vadd.f32 1.0, %v5250_v34  ;;  %v6542_v34 = vld [vmem:[#allocation8] ss:$12 sps:$4 sm:$0xff]  }
 0x9bf   :  { %v5254_v57 = vpop.eup %5253  ;;  %v1753_v61 = vadd.f32 1.0, %v5252_v37  ;;  %v6546_v37 = vld [vmem:[#allocation8 + $0x1c] ss:$12 sps:$4 sm:$0xff]  }
 0x9c0   :  { %5257 = vrcp.f32 %v1752_v39  ;;  %v1771_v18 = vadd.f32 1.0, %v5254_v57  ;;  %v5256_v6 = vpop.eup %5255  ;;  %v6553_v39 = vld [vmem:[#allocation8 + $0x18] ss:$12 sps:$4 sm:$0xff]   ;;  %v6557_v57 = vld [vmem:[#allocation8 + $0x34] ss:$12 sps:$4 sm:$0xff]  }
 0x9c1   :  { %5259 = vrcp.f32 %v1753_v61  ;;  %v1772_v12 = vadd.f32 1.0, %v5256_v6  ;;  %v6565_v61 = vld [vmem:[#allocation8 + $0x4c] ss:$12 sps:$4 sm:$0xff]  }
 0x9c2   :  { %5261 = vrcp.f32 %v1771_v18  ;;  %v6569_v18 = vld [vmem:[#allocation8 + $0x48] ss:$12 sps:$4 sm:$0xff]   ;;  %v6577_v6 = vld [vmem:[#allocation8 + $0x60] ss:$12 sps:$4 sm:$0xff]  }
 0x9c3   :  { %5263 = vrcp.f32 %v1772_v12  ;;  %v6593_v12 = vld [vmem:[#allocation8 + $0x90] ss:$12 sps:$4 sm:$0xff]  }
 0x9ca   :  { %v5258_v9 = vpop.eup %5257 }
 0x9cb   :  { %v5260_v14 = vpop.eup %5259  ;;  %v1782_v17 = vmul.f32 %v5258_v9, %v1778_v13  ;;  %v6601_v13 = vld [vmem:[#allocation8 + $0xa8] ss:$12 sps:$4 sm:$0xff]  }
 0x9cc   :  { %v5262_v47 = vpop.eup %5261  ;;  %v1783_v51 = vmul.f32 %v5260_v14, %v1779_v20 }
 0x9cd   :  { %v1784_v52 = vadd.f32 %v1782_v17, %v6340_v10  ;;  %v1795_v53 = vmul.f32 %v5262_v47, %v1792_v42  ;;  %v5264_v55 = vpop.eup %5263  ;;  %v1788_v50 = vsub.f32 1.0, %v5262_v47 }
 0x9ce   :  { %v1785_v54 = vadd.f32 %v1783_v51, %v6342_v41  ;;  %v1789_v59 = vsub.f32 1.0, %v5264_v55  ;;  %v1796_v4 = vmul.f32 %v5264_v55, %v1641_v11 }
 0x9cf   :  { %5265 = vtanh.f32 %v1784_v52 }
 0x9d0   :  { %5267 = vtanh.f32 %v1785_v54 }
 0x9d9   :  { %v5266_v56 = vpop.eup %5265 }
 0x9da   :  { %v5268_v60 = vpop.eup %5267  ;;  %v1790_v63 = vmul.f32 %v5266_v56, %v1788_v50 }
 0x9db   :  { %v1791_v1 = vmul.f32 %v5268_v60, %v1789_v59 }
 0x9dc   :  { %v6529_v3 = vadd.f32 %v1795_v53, %v1790_v63 }
 0x9dd   :  { %v6531_v5 = vadd.f32 %v1796_v4, %v1791_v1 }
 0x9de   :  { %v1807_v29 = vpack.c.bf16 %v6529_v3, %v6529_v3 }
 0x9df   :  { %v1801_v33 = vrot.slane %v6531_v5, 7  ;;  %v1808_v19 = vpack.c.bf16 %v6531_v5, %v6531_v5 }
 0x9e0   :  { %v1811_v45 = vunpack.c.l.b16 %v1807_v29 }
 0x9e1   :  { %v1803_v46 = vsel %vm1802_vm8, %v1801_v33, %v6529_v3  ;;  %v1812_v8 = vunpack.c.l.b16 %v1808_v19 }
 0x9e2   :  { %1806 = vst [vmem:[#allocation2 + $0x3] sm:$0x18] %v1803_v46  ;;  %v1813_v11 = vrot.slane %v1811_v45, 3 }
 0x9e3   :  { %v1814_v2 = vrot.slane %v1812_v8, 2 }
 0x9e5   :  { %v1815_v35 = vsel %vm1328_vm5, %v1814_v2, %v1813_v11 }
 0x9e6   :  { %v1816_v40 = vpack.c.b16 %v1815_v35, %v1815_v35 }
 0x9e8   :  { %1851 = vmatmul.mubr.bf16.vlgmr.msra.gmra.mrb[24].mxu0 %v1816_v40  ;;  %4730 = vmatmul.mubr.bf16.vlgmr.msra.gmra.mrb[40].mxu1 %v1816_v40 }
 0x9e9   :  { %1979 = vmatpush1.bf16.msra.mxu0 %v6542_v34  ;;  %4734 = vmatpush3.bf16.msra.mxu1 %v6253_v21  ;;  %v6561_v21 = vld [vmem:[#allocation8 + $0x30] ss:$12 sps:$4 sm:$0xff]  }
 0x9ea   :  { %1980 = vmatprep.subr.bf16.mxu0 %v6546_v37  ;;  %4735 = vmatprep.subr.bf16.mxu1 %v5731_v0 }
 0x9eb   :  { %2010 = vmatprep.mubr.bf16.mxu0 %v5733_v23  ;;  %4749 = vmatprep.mubr.msk.bf16.mxu1 %vm5732_vm0, %v5731_v0 }
 0x9ed   :  { %1981 = vmatpush1.bf16.msra.mxu0 %v6553_v39  ;;  %4736 = vmatpush3.bf16.msra.mxu1 %v6257_v22  ;;  %v6573_v22 = vld [vmem:[#allocation8 + $0x64] ss:$12 sps:$4 sm:$0xff]  }
 0x9ee   :  { %1982 = vmatprep.subr.bf16.mxu0 %v6557_v57  ;;  %4737 = vmatprep.subr.bf16.mxu1 %v5731_v0 }
 0x9f1   :  { %1983 = vmatpush1.bf16.msra.mxu0 %v6561_v21  ;;  %4738 = vmatpush3.bf16.msra.mxu1 %v6263_v24  ;;  %v6581_v24 = vld [vmem:[#allocation8 + $0x7c] ss:$12 sps:$4 sm:$0xff]  }
 0x9f2   :  { %1984 = vmatprep.subr.bf16.mxu0 %v6565_v61  ;;  %4739 = vmatprep.subr.bf16.mxu1 %v5731_v0 }
 0x9f5   :  { %1985 = vmatpush1.bf16.msra.mxu0 %v6569_v18  ;;  %4740 = vmatpush3.bf16.msra.mxu1 %v6267_v25  ;;  %v6589_v25 = vld [vmem:[#allocation8 + $0x94] ss:$12 sps:$4 sm:$0xff]  }
 0x9f6   :  { %1986 = vmatprep.subr.bf16.mxu0 %v6573_v22  ;;  %4741 = vmatprep.subr.bf16.mxu1 %v5731_v0 }
 0x9f9   :  { %1987 = vmatpush1.bf16.msra.mxu0 %v6577_v6  ;;  %4742 = vmatpush3.bf16.msra.mxu1 %v6271_v27  ;;  %v6597_v27 = vld [vmem:[#allocation8 + $0xac] ss:$12 sps:$4 sm:$0xff]  }
 0x9fa   :  { %1988 = vmatprep.subr.bf16.mxu0 %v6581_v24  ;;  %4743 = vmatprep.subr.bf16.mxu1 %v5731_v0 }
 0x9fd   :  { %1989 = vmatpush1.bf16.msra.mxu0 %v6585_v16  ;;  %4744 = vmatpush3.bf16.msra.mxu1 %v6275_v28 }
 0x9fe   :  { %1990 = vmatprep.subr.bf16.mxu0 %v6589_v25  ;;  %4745 = vmatprep.subr.bf16.mxu1 %v5731_v0 }
 0xa01   :  { %1991 = vmatpush1.bf16.msra.mxu0 %v6593_v12  ;;  %4746 = vmatpush3.bf16.msra.mxu1 %v6279_v30 }
 0xa02   :  { %1992 = vmatprep.subr.bf16.mxu0 %v6597_v27  ;;  %4747 = vmatprep.subr.bf16.mxu1 %v5731_v0 }
 0xa05   :  { %1993 = vmatpush1.bf16.msra.mxu0 %v6601_v13  ;;  %4748 = vmatpush3.bf16.msra.mxu1 %v6283_v32 }
 0xa06   :  { %2138 = vmatprep.subr.bf16.mxu0 %v6513_v44  ;;  %4753 = vmatprep.subr.bf16.mxu1 %v5731_v0 }
 0xabb   :  { %v1852_v28 = vpop.f32.mrb[24].mxu0  ;;  %v1893_v9 = vpop.f32.mrb[40].mxu1 }
 0xabc   :  { %v1853_v30 = vadd.f32 %v1852_v28, %v6308_v43  ;;  %v1854_v20 = vpop.f32.mrb[25].mxu0  ;;  %v4731_v14 = vpop.f32.mrb[41].mxu1  ;;  %v1894_v40 = vadd.f32 %v1893_v9, %v6336_v38 }
 0xabd   :  { %v1855_v17 = vadd.f32 %v1854_v20, %v6321_v62  ;;  %v1856_v42 = vpop.f32.mrb[26].mxu0  ;;  %v1896_v47 = vpop.f32.mrb[42].mxu1 }
 0xabe   :  { %v1900_v51 = vrot.slane %v1853_v30, 4  ;;  %v1901_v52 = vrot.slane %v1853_v30, 5  ;;  %v1857_v53 = vpop.f32.mrb[27].mxu0  ;;  %v4732_v54 = vpop.f32.mrb[43].mxu1  ;;  %v1938_v30 = vrot.slane %v1894_v40, 4  ;;  %v1939_v14 = vrot.slane %v1894_v40, 5 }
 0xabf   :  { %v1919_v55 = vrot.slane %v1855_v17, 4  ;;  %v1920_v56 = vrot.slane %v1855_v17, 5  ;;  %v1952_v47 = vrot.slane %v6529_v3, 7  ;;  %v6633_v40 = vld [vmem:[#allocation8 + $0x8] ss:$12 sps:$4 sm:$0xff]  }
 0xac0   :  { %v1904_v32 = vadd.f32 %v1900_v51, %v6312_v48  ;;  %v1905_v50 = vadd.f32 %v1901_v52, %v6317_v58 }
 0xac1   :  { %v1923_v59 = vadd.f32 %v1919_v55, %v6326_v7  ;;  %v1924_v4 = vadd.f32 %v1920_v56, %v6328_v15 }
 0xac2   :  { %v4230_v60 = vmul.f32 -1.442695, %v1904_v32  ;;  %v4231_v63 = vmul.f32 -1.442695, %v1905_v50 }
 0xac3   :  { %v4232_v1 = vmul.f32 -1.442695, %v1923_v59  ;;  %v4233_v29 = vmul.f32 -1.442695, %v1924_v4 }
 0xac4   :  { %5269 = vpow2.f32 %v4230_v60 }
 0xac5   :  { %5271 = vpow2.f32 %v4231_v63 }
 0xac6   :  { %5273 = vpow2.f32 %v4232_v1 }
 0xac7   :  { %5275 = vpow2.f32 %v4233_v29 }
 0xace   :  { %v5270_v19 = vpop.eup %5269 }
 0xacf   :  { %v5272_v45 = vpop.eup %5271  ;;  %v1912_v46 = vadd.f32 1.0, %v5270_v19 }
 0xad0   :  { %v5274_v8 = vpop.eup %5273  ;;  %v1913_v11 = vadd.f32 1.0, %v5272_v45 }
 0xad1   :  { %5277 = vrcp.f32 %v1912_v46  ;;  %v1931_v2 = vadd.f32 1.0, %v5274_v8  ;;  %v5276_v35 = vpop.eup %5275 }
 0xad2   :  { %5279 = vrcp.f32 %v1913_v11  ;;  %v1932_v28 = vadd.f32 1.0, %v5276_v35 }
 0xad3   :  { %5281 = vrcp.f32 %v1931_v2 }
 0xad4   :  { %5283 = vrcp.f32 %v1932_v28  ;;  %v6642_v28 = vld [vmem:[#allocation8 + $0x20] ss:$12 sps:$4 sm:$0xff]  }
 0xadb   :  { %v5278_v20 = vpop.eup %5277 }
 0xadc   :  { %v5280_v17 = vpop.eup %5279  ;;  %v1942_v42 = vmul.f32 %v5278_v20, %v1938_v30  ;;  %v6648_v30 = vld [vmem:[#allocation8 + $0x38] ss:$12 sps:$4 sm:$0xff]   ;;  %v6654_v20 = vld [vmem:[#allocation8 + $0x50] ss:$12 sps:$4 sm:$0xff]  }
 0xadd   :  { %v5282_v51 = vpop.eup %5281  ;;  %v1943_v52 = vmul.f32 %v5280_v17, %v1939_v14  ;;  %v6660_v14 = vld [vmem:[#allocation8 + $0x68] ss:$12 sps:$4 sm:$0xff]   ;;  %v6666_v17 = vld [vmem:[#allocation8 + $0x80] ss:$12 sps:$4 sm:$0xff]  }
 0xade   :  { %v1944_v53 = vadd.f32 %v1942_v42, %v6340_v10  ;;  %v1955_v54 = vmul.f32 %v5282_v51, %v1952_v47  ;;  %v5284_v32 = vpop.eup %5283  ;;  %v1948_v9 = vsub.f32 1.0, %v5282_v51  ;;  %v6672_v42 = vld [vmem:[#allocation8 + $0x98] ss:$12 sps:$4 sm:$0xff]   ;;  %v6678_v47 = vld [vmem:[#allocation8 + $0xb0] ss:$12 sps:$4 sm:$0xff]  }
 0xadf   :  { %v1945_v55 = vadd.f32 %v1943_v52, %v6342_v41  ;;  %v1949_v56 = vsub.f32 1.0, %v5284_v32  ;;  %v1956_v3 = vmul.f32 %v5284_v32, %v1801_v33 }
 0xae0   :  { %5285 = vtanh.f32 %v1944_v53 }
 0xae1   :  { %5287 = vtanh.f32 %v1945_v55 }
 0xaea   :  { %v5286_v50 = vpop.eup %5285 }
 0xaeb   :  { %v5288_v59 = vpop.eup %5287  ;;  %v1950_v60 = vmul.f32 %v5286_v50, %v1948_v9 }
 0xaec   :  { %v1951_v63 = vmul.f32 %v5288_v59, %v1949_v56 }
 0xaed   :  { %v6619_v1 = vadd.f32 %v1955_v54, %v1950_v60 }
 0xaee   :  { %v6621_v4 = vadd.f32 %v1956_v3, %v1951_v63 }
 0xaef   :  { %v1967_v29 = vpack.c.bf16 %v6619_v1, %v6619_v1 }
 0xaf0   :  { %v1961_v19 = vrot.slane %v6621_v4, 7  ;;  %v1968_v45 = vpack.c.bf16 %v6621_v4, %v6621_v4 }
 0xaf1   :  { %v1971_v46 = vunpack.c.l.b16 %v1967_v29 }
 0xaf2   :  { %v1963_v8 = vsel %vm1962_vm9, %v1961_v19, %v6619_v1  ;;  %v1972_v5 = vunpack.c.l.b16 %v1968_v45 }
 0xaf3   :  { %1966 = vst [vmem:[#allocation2 + $0x4] sm:$0x30] %v1963_v8  ;;  %v1973_v33 = vrot.slane %v1971_v46, 4 }
 0xaf4   :  { %v1974_v11 = vrot.slane %v1972_v5, 3 }
 0xaf6   :  { %v1975_v2 = vsel %vm1328_vm5, %v1974_v11, %v1973_v33 }
 0xaf7   :  { %v1976_v35 = vpack.c.b16 %v1975_v2, %v1975_v2 }
 0xaf9   :  { %2011 = vmatmul.mubr.bf16.vlgmr.msra.gmra.mrb[28].mxu0 %v1976_v35  ;;  %4750 = vmatmul.mubr.bf16.vlgmr.msra.gmra.mrb[44].mxu1 %v1976_v35 }
 0xafa   :  { %2139 = vmatpush1.bf16.msra.mxu0 %v6542_v34  ;;  %4754 = vmatpush3.bf16.msra.mxu1 %v6633_v40 }
 0xafb   :  { %2140 = vmatprep.subr.bf16.mxu0 %v6546_v37  ;;  %4755 = vmatprep.subr.bf16.mxu1 %v5731_v0 }
 0xafc   :  { %2170 = vmatprep.mubr.bf16.mxu0 %v5733_v23  ;;  %4769 = vmatprep.mubr.msk.bf16.mxu1 %vm5732_vm0, %v5731_v0 }
 0xafe   :  { %2141 = vmatpush1.bf16.msra.mxu0 %v6553_v39  ;;  %4756 = vmatpush3.bf16.msra.mxu1 %v6642_v28 }
 0xaff   :  { %2142 = vmatprep.subr.bf16.mxu0 %v6557_v57  ;;  %4757 = vmatprep.subr.bf16.mxu1 %v5731_v0 }
 0xb02   :  { %2143 = vmatpush1.bf16.msra.mxu0 %v6561_v21  ;;  %4758 = vmatpush3.bf16.msra.mxu1 %v6648_v30 }
 0xb03   :  { %2144 = vmatprep.subr.bf16.mxu0 %v6565_v61  ;;  %4759 = vmatprep.subr.bf16.mxu1 %v5731_v0 }
 0xb06   :  { %2145 = vmatpush1.bf16.msra.mxu0 %v6569_v18  ;;  %4760 = vmatpush3.bf16.msra.mxu1 %v6654_v20 }
 0xb07   :  { %2146 = vmatprep.subr.bf16.mxu0 %v6573_v22  ;;  %4761 = vmatprep.subr.bf16.mxu1 %v5731_v0 }
 0xb0a   :  { %2147 = vmatpush1.bf16.msra.mxu0 %v6577_v6  ;;  %4762 = vmatpush3.bf16.msra.mxu1 %v6660_v14 }
 0xb0b   :  { %2148 = vmatprep.subr.bf16.mxu0 %v6581_v24  ;;  %4763 = vmatprep.subr.bf16.mxu1 %v5731_v0 }
 0xb0e   :  { %2149 = vmatpush1.bf16.msra.mxu0 %v6585_v16  ;;  %4764 = vmatpush3.bf16.msra.mxu1 %v6666_v17 }
 0xb0f   :  { %2150 = vmatprep.subr.bf16.mxu0 %v6589_v25  ;;  %4765 = vmatprep.subr.bf16.mxu1 %v5731_v0 }
 0xb12   :  { %2151 = vmatpush1.bf16.msra.mxu0 %v6593_v12  ;;  %4766 = vmatpush3.bf16.msra.mxu1 %v6672_v42 }
 0xb13   :  { %2152 = vmatprep.subr.bf16.mxu0 %v6597_v27  ;;  %4767 = vmatprep.subr.bf16.mxu1 %v5731_v0 }
 0xb16   :  { %2153 = vmatpush1.bf16.msra.mxu0 %v6601_v13  ;;  %4768 = vmatpush3.bf16.msra.mxu1 %v6678_v47 }
 0xb17   :  { %2298 = vmatprep.subr.bf16.mxu0 %v6513_v44  ;;  %4773 = vmatprep.subr.bf16.mxu1 %v5731_v0 }
 0xbcc   :  { %v2012_v51 = vpop.f32.mrb[28].mxu0  ;;  %v2053_v52 = vpop.f32.mrb[44].mxu1 }
 0xbcd   :  { %v2013_v53 = vadd.f32 %v2012_v51, %v6308_v43  ;;  %v2014_v54 = vpop.f32.mrb[29].mxu0  ;;  %v4751_v55 = vpop.f32.mrb[45].mxu1 }
 0xbce   :  { %v2015_v32 = vadd.f32 %v2014_v54, %v6321_v62  ;;  %v2016_v9 = vpop.f32.mrb[30].mxu0  ;;  %v2056_v50 = vpop.f32.mrb[46].mxu1 }
 0xbcf   :  { %v2060_v56 = vrot.slane %v2013_v53, 3  ;;  %v2061_v59 = vrot.slane %v2013_v53, 4  ;;  %v2017_v60 = vpop.f32.mrb[31].mxu0  ;;  %v4752_v63 = vpop.f32.mrb[47].mxu1  ;;  %v2054_v50 = vadd.f32 %v2053_v52, %v6336_v38 }
 0xbd0   :  { %v2079_v3 = vrot.slane %v2015_v32, 3  ;;  %v2080_v45 = vrot.slane %v2015_v32, 4 }
 0xbd1   :  { %v2064_v29 = vadd.f32 %v2060_v56, %v6312_v48  ;;  %v2065_v44 = vadd.f32 %v2061_v59, %v6317_v58  ;;  %v2098_v59 = vrot.slane %v2054_v50, 3  ;;  %v2099_v63 = vrot.slane %v2054_v50, 4 }
 0xbd2   :  { %v2083_v46 = vadd.f32 %v2079_v3, %v6326_v7  ;;  %v2084_v11 = vadd.f32 %v2080_v45, %v6328_v15 }
 0xbd3   :  { %v4234_v8 = vmul.f32 -1.442695, %v2064_v29  ;;  %v4235_v5 = vmul.f32 -1.442695, %v2065_v44  ;;  %v2112_v44 = vrot.slane %v6619_v1, 7 }
 0xbd4   :  { %v4236_v33 = vmul.f32 -1.442695, %v2083_v46  ;;  %v4237_v2 = vmul.f32 -1.442695, %v2084_v11 }
 0xbd5   :  { %5289 = vpow2.f32 %v4234_v8 }
 0xbd6   :  { %5291 = vpow2.f32 %v4235_v5 }
 0xbd7   :  { %5293 = vpow2.f32 %v4236_v33 }
 0xbd8   :  { %5295 = vpow2.f32 %v4237_v2 }
 0xbdf   :  { %v5290_v35 = vpop.eup %5289 }
 0xbe0   :  { %v5292_v51 = vpop.eup %5291  ;;  %v2072_v53 = vadd.f32 1.0, %v5290_v35 }
 0xbe1   :  { %v5294_v54 = vpop.eup %5293  ;;  %v2073_v55 = vadd.f32 1.0, %v5292_v51 }
 0xbe2   :  { %5297 = vrcp.f32 %v2072_v53  ;;  %v2091_v9 = vadd.f32 1.0, %v5294_v54  ;;  %v5296_v32 = vpop.eup %5295 }
 0xbe3   :  { %5299 = vrcp.f32 %v2073_v55  ;;  %v2092_v56 = vadd.f32 1.0, %v5296_v32 }
 0xbe4   :  { %5301 = vrcp.f32 %v2091_v9 }
 0xbe5   :  { %5303 = vrcp.f32 %v2092_v56 }
 0xbec   :  { %v5298_v60 = vpop.eup %5297 }
 0xbed   :  { %v5300_v3 = vpop.eup %5299  ;;  %v2102_v29 = vmul.f32 %v5298_v60, %v2098_v59 }
 0xbee   :  { %v5302_v45 = vpop.eup %5301  ;;  %v2103_v46 = vmul.f32 %v5300_v3, %v2099_v63 }
 0xbef   :  { %v2104_v8 = vadd.f32 %v2102_v29, %v6340_v10  ;;  %v2115_v5 = vmul.f32 %v5302_v45, %v2112_v44  ;;  %v5304_v11 = vpop.eup %5303  ;;  %v2108_v52 = vsub.f32 1.0, %v5302_v45 }
 0xbf0   :  { %v2105_v33 = vadd.f32 %v2103_v46, %v6342_v41  ;;  %v2109_v35 = vsub.f32 1.0, %v5304_v11  ;;  %v2116_v1 = vmul.f32 %v5304_v11, %v1961_v19 }
 0xbf1   :  { %5305 = vtanh.f32 %v2104_v8 }
 0xbf2   :  { %5307 = vtanh.f32 %v2105_v33 }
 0xbfb   :  { %v5306_v2 = vpop.eup %5305 }
 0xbfc   :  { %v5308_v51 = vpop.eup %5307  ;;  %v2110_v53 = vmul.f32 %v5306_v2, %v2108_v52 }
 0xbfd   :  { %v2111_v54 = vmul.f32 %v5308_v51, %v2109_v35 }
 0xbfe   :  { %v6695_v55 = vadd.f32 %v2115_v5, %v2110_v53 }
 0xbff   :  { %v6697_v9 = vadd.f32 %v2116_v1, %v2111_v54 }
 0xc00   :  { %v2127_v32 = vpack.c.bf16 %v6695_v55, %v6695_v55  ;;  %v2272_v1 = vrot.slane %v6695_v55, 7 }
 0xc01   :  { %v2121_v50 = vrot.slane %v6697_v9, 7  ;;  %v2128_v56 = vpack.c.bf16 %v6697_v9, %v6697_v9 }
 0xc02   :  { %v2131_v59 = vunpack.c.l.b16 %v2127_v32 }
 0xc03   :  { %v2123_v60 = vsel %vm2122_vm10, %v2121_v50, %v6695_v55  ;;  %v2132_v4 = vunpack.c.l.b16 %v2128_v56 }
 0xc04   :  { %2126 = vst [vmem:[#allocation2 + $0x5] sm:$0x60] %v2123_v60  ;;  %v2133_v19 = vrot.slane %v2131_v59, 5 }
 0xc05   :  { %v2134_v63 = vrot.slane %v2132_v4, 4 }
 0xc07   :  { %v2135_v3 = vsel %vm1328_vm5, %v2134_v63, %v2133_v19 }
 0xc08   :  { %v2136_v29 = vpack.c.b16 %v2135_v3, %v2135_v3 }
 0xc0a   :  { %2171 = vmatmul.mubr.bf16.vlgmr.msra.gmra.mrb[32].mxu0 %v2136_v29  ;;  %4770 = vmatmul.mubr.bf16.vlgmr.msra.gmra.mrb[48].mxu1 %v2136_v29 }
 0xc0b   :  { %2299 = vmatpush1.bf16.msra.mxu0 %v6542_v34  ;;  %4774 = vmatpush3.bf16.msra.mxu1 %v6633_v40 }
 0xc0c   :  { %2300 = vmatprep.subr.bf16.mxu0 %v6546_v37  ;;  %4775 = vmatprep.subr.bf16.mxu1 %v5731_v0 }
 0xc0d   :  { %2330 = vmatprep.mubr.bf16.mxu0 %v5733_v23  ;;  %4789 = vmatprep.mubr.msk.bf16.mxu1 %vm5732_vm0, %v5731_v0 }
 0xc0f   :  { %2301 = vmatpush1.bf16.msra.mxu0 %v6553_v39  ;;  %4776 = vmatpush3.bf16.msra.mxu1 %v6642_v28 }
 0xc10   :  { %2302 = vmatprep.subr.bf16.mxu0 %v6557_v57  ;;  %4777 = vmatprep.subr.bf16.mxu1 %v5731_v0 }
 0xc13   :  { %2303 = vmatpush1.bf16.msra.mxu0 %v6561_v21  ;;  %4778 = vmatpush3.bf16.msra.mxu1 %v6648_v30 }
 0xc14   :  { %2304 = vmatprep.subr.bf16.mxu0 %v6565_v61  ;;  %4779 = vmatprep.subr.bf16.mxu1 %v5731_v0 }
 0xc17   :  { %2305 = vmatpush1.bf16.msra.mxu0 %v6569_v18  ;;  %4780 = vmatpush3.bf16.msra.mxu1 %v6654_v20 }
 0xc18   :  { %2306 = vmatprep.subr.bf16.mxu0 %v6573_v22  ;;  %4781 = vmatprep.subr.bf16.mxu1 %v5731_v0 }
 0xc1b   :  { %2307 = vmatpush1.bf16.msra.mxu0 %v6577_v6  ;;  %4782 = vmatpush3.bf16.msra.mxu1 %v6660_v14 }
 0xc1c   :  { %2308 = vmatprep.subr.bf16.mxu0 %v6581_v24  ;;  %4783 = vmatprep.subr.bf16.mxu1 %v5731_v0 }
 0xc1f   :  { %2309 = vmatpush1.bf16.msra.mxu0 %v6585_v16  ;;  %4784 = vmatpush3.bf16.msra.mxu1 %v6666_v17 }
 0xc20   :  { %2310 = vmatprep.subr.bf16.mxu0 %v6589_v25  ;;  %4785 = vmatprep.subr.bf16.mxu1 %v5731_v0 }
 0xc23   :  { %2311 = vmatpush1.bf16.msra.mxu0 %v6593_v12  ;;  %4786 = vmatpush3.bf16.msra.mxu1 %v6672_v42 }
 0xc24   :  { %2312 = vmatprep.subr.bf16.mxu0 %v6597_v27  ;;  %4787 = vmatprep.subr.bf16.mxu1 %v5731_v0 }
 0xc27   :  { %2313 = vmatpush1.bf16.msra.mxu0 %v6601_v13  ;;  %4788 = vmatpush3.bf16.msra.mxu1 %v6678_v47 }
 0xc28   :  { %4793 = vmatprep.subr.bf16.mxu1 %v5731_v0 }
 0xcdd   :  { %v2172_v34 = vpop.f32.mrb[32].mxu0  ;;  %v2213_v37 = vpop.f32.mrb[48].mxu1 }
 0xcde   :  { %v2173_v39 = vadd.f32 %v2172_v34, %v6308_v43  ;;  %v2174_v57 = vpop.f32.mrb[33].mxu0  ;;  %v4771_v21 = vpop.f32.mrb[49].mxu1  ;;  %v2214_v11 = vadd.f32 %v2213_v37, %v6336_v38 }
 0xcdf   :  { %v2175_v61 = vadd.f32 %v2174_v57, %v6321_v62  ;;  %v2176_v18 = vpop.f32.mrb[34].mxu0  ;;  %v2216_v22 = vpop.f32.mrb[50].mxu1 }
 0xce0   :  { %v2220_v6 = vrot.slane %v2173_v39, 2  ;;  %v2221_v24 = vrot.slane %v2173_v39, 3  ;;  %v2177_v16 = vpop.f32.mrb[35].mxu0  ;;  %v4772_v25 = vpop.f32.mrb[51].mxu1  ;;  %v2258_v2 = vrot.slane %v2214_v11, 2  ;;  %v2259_v51 = vrot.slane %v2214_v11, 3 }
 0xce1   :  { %v2239_v12 = vrot.slane %v2175_v61, 2  ;;  %v2240_v40 = vrot.slane %v2175_v61, 3  ;;  %v5125_v11 = vld [vmem:[#allocation12 + $0x78] ss:$12 sps:$4 sm:$0xff]  }
 0xce2   :  { %v2224_v27 = vadd.f32 %v2220_v6, %v6312_v48  ;;  %v2225_v13 = vadd.f32 %v2221_v24, %v6317_v58 }
 0xce3   :  { %v2243_v28 = vadd.f32 %v2239_v12, %v6326_v7  ;;  %v2244_v17 = vadd.f32 %v2240_v40, %v6328_v15  ;;  %v5108_v40 = vld [vmem:[#allocation12 + $0x8] ss:$12 sps:$4 sm:$0xff]  }
 0xce4   :  { %v4238_v30 = vmul.f32 -1.442695, %v2224_v27  ;;  %v4239_v20 = vmul.f32 -1.442695, %v2225_v13  ;;  %v5107_v27 = vld [vmem:[#allocation12 + $0x4] ss:$12 sps:$4 sm:$0xff]  }
 0xce5   :  { %v4240_v14 = vmul.f32 -1.442695, %v2243_v28  ;;  %v4241_v42 = vmul.f32 -1.442695, %v2244_v17  ;;  %v5105_v13 = vld [vmem:[#allocation12] ss:$12 sps:$4 sm:$0xff]   ;;  %2677 = vmatprep.subr.bf16.mxu0 %v5107_v27 }
 0xce6   :  { %5309 = vpow2.f32 %v4238_v30  ;;  %v5111_v28 = vld [vmem:[#allocation12 + $0x1c] ss:$12 sps:$4 sm:$0xff]   ;;  %v5109_v30 = vld [vmem:[#allocation12 + $0x18] ss:$12 sps:$4 sm:$0xff]  }
 0xce7   :  { %5311 = vpow2.f32 %v4239_v20  ;;  %v5112_v20 = vld [vmem:[#allocation12 + $0x20] ss:$12 sps:$4 sm:$0xff]   ;;  %v5113_v17 = vld [vmem:[#allocation12 + $0x30] ss:$12 sps:$4 sm:$0xff]  }
 0xce8   :  { %5313 = vpow2.f32 %v4240_v14  ;;  %v5115_v14 = vld [vmem:[#allocation12 + $0x34] ss:$12 sps:$4 sm:$0xff]  }
 0xce9   :  { %5315 = vpow2.f32 %v4241_v42  ;;  %v5116_v42 = vld [vmem:[#allocation12 + $0x38] ss:$12 sps:$4 sm:$0xff]  }
 0xcf0   :  { %v5310_v47 = vpop.eup %5309 }
 0xcf1   :  { %v5312_v44 = vpop.eup %5311  ;;  %v2232_v45 = vadd.f32 1.0, %v5310_v47  ;;  %v5119_v47 = vld [vmem:[#allocation12 + $0x4c] ss:$12 sps:$4 sm:$0xff]  }
 0xcf2   :  { %v5314_v46 = vpop.eup %5313  ;;  %v2233_v8 = vadd.f32 1.0, %v5312_v44  ;;  %v5117_v44 = vld [vmem:[#allocation12 + $0x48] ss:$12 sps:$4 sm:$0xff]  }
 0xcf3   :  { %5317 = vrcp.f32 %v2232_v45  ;;  %v2251_v5 = vadd.f32 1.0, %v5314_v46  ;;  %v5316_v33 = vpop.eup %5315  ;;  %v5120_v45 = vld [vmem:[#allocation12 + $0x50] ss:$12 sps:$4 sm:$0xff]  }
 0xcf4   :  { %5319 = vrcp.f32 %v2233_v8  ;;  %v2252_v52 = vadd.f32 1.0, %v5316_v33  ;;  %v5123_v46 = vld [vmem:[#allocation12 + $0x64] ss:$12 sps:$4 sm:$0xff]   ;;  %v5121_v8 = vld [vmem:[#allocation12 + $0x60] ss:$12 sps:$4 sm:$0xff]  }
 0xcf5   :  { %5321 = vrcp.f32 %v2251_v5  ;;  %v5124_v5 = vld [vmem:[#allocation12 + $0x68] ss:$12 sps:$4 sm:$0xff]  }
 0xcf6   :  { %5323 = vrcp.f32 %v2252_v52  ;;  %v5127_v33 = vld [vmem:[#allocation12 + $0x7c] ss:$12 sps:$4 sm:$0xff]   ;;  %v5128_v52 = vld [vmem:[#allocation12 + $0x80] ss:$12 sps:$4 sm:$0xff]  }
 0xcfd   :  { %v5318_v35 = vpop.eup %5317 }
 0xcfe   :  { %v5320_v53 = vpop.eup %5319  ;;  %v2262_v54 = vmul.f32 %v5318_v35, %v2258_v2  ;;  %v5131_v2 = vld [vmem:[#allocation12 + $0x94] ss:$12 sps:$4 sm:$0xff]   ;;  %v5129_v35 = vld [vmem:[#allocation12 + $0x90] ss:$12 sps:$4 sm:$0xff]  }
 0xcff   :  { %v5322_v32 = vpop.eup %5321  ;;  %v2263_v56 = vmul.f32 %v5320_v53, %v2259_v51  ;;  %v5132_v51 = vld [vmem:[#allocation12 + $0x98] ss:$12 sps:$4 sm:$0xff]  }
 0xd00   :  { %v2264_v59 = vadd.f32 %v2262_v54, %v6340_v10  ;;  %v2275_v60 = vmul.f32 %v5322_v32, %v2272_v1  ;;  %v5324_v19 = vpop.eup %5323  ;;  %v2268_v63 = vsub.f32 1.0, %v5322_v32  ;;  %v5135_v53 = vld [vmem:[#allocation12 + $0xac] ss:$12 sps:$4 sm:$0xff]   ;;  %v5133_v54 = vld [vmem:[#allocation12 + $0xa8] ss:$12 sps:$4 sm:$0xff]  }
 0xd01   :  { %v2265_v4 = vadd.f32 %v2263_v56, %v6342_v41  ;;  %v2269_v29 = vsub.f32 1.0, %v5324_v19  ;;  %v2276_v55 = vmul.f32 %v5324_v19, %v2121_v50  ;;  %v5136_v1 = vld [vmem:[#allocation12 + $0xb0] ss:$12 sps:$4 sm:$0xff]  }
 0xd02   :  { %5325 = vtanh.f32 %v2264_v59  ;;  %v6776_v32 = vld [vmem:[#allocation14 + $0x4] ss:$12 sps:$4 sm:$0xff]  }
 0xd03   :  { %5327 = vtanh.f32 %v2265_v4 }
 0xd0c   :  { %v5326_v3 = vpop.eup %5325 }
 0xd0d   :  { %v5328_v34 = vpop.eup %5327  ;;  %v2270_v37 = vmul.f32 %v5326_v3, %v2268_v63 }
 0xd0e   :  { %v2271_v39 = vmul.f32 %v5328_v34, %v2269_v29 }
 0xd0f   :  { %v6754_v57 = vadd.f32 %v2275_v60, %v2270_v37 }
 0xd10   :  { %v6756_v21 = vadd.f32 %v2276_v55, %v2271_v39 }
 0xd11   :  { %v2287_v61 = vpack.c.bf16 %v6754_v57, %v6754_v57 }
 0xd12   :  { %v2281_v18 = vrot.slane %v6756_v21, 7  ;;  %v2288_v22 = vpack.c.bf16 %v6756_v21, %v6756_v21 }
 0xd13   :  { %v2291_v6 = vunpack.c.l.b16 %v2287_v61 }
 0xd14   :  { %v2283_v24 = vsel %vm2282_vm11, %v2281_v18, %v6754_v57  ;;  %v2292_v9 = vunpack.c.l.b16 %v2288_v22 }
 0xd15   :  { %2286 = vst [vmem:[#allocation2 + $0x6] sm:$0xc0] %v2283_v24  ;;  %v2293_v50 = vrot.slane %v2291_v6, 6 }
 0xd16   :  { %v2294_v16 = vrot.slane %v2292_v9, 5 }
 0xd18   :  { %v2295_v25 = vsel %vm1328_vm5, %v2294_v16, %v2293_v50 }
 0xd19   :  { %v2296_v12 = vpack.c.b16 %v2295_v25, %v2295_v25 }
 0xd1b   :  { %2331 = vmatmul.mubr.bf16.vlgmr.msra.gmra.mrb[36].mxu0 %v2296_v12  ;;  %4790 = vmatmul.mubr.bf16.vlgmr.msra.gmra.mrb[52].mxu1 %v2296_v12 }
 0xd1c   :  { %2709 = vmatprep.mubr.bf16.mxu0 %v5733_v23  ;;  %4809 = vmatprep.mubr.msk.bf16.mxu1 %vm5732_vm0, %v5731_v0 }
 0xd1d   :  { %2678 = vmatpush1.bf16.msra.mxu0 %v5105_v13  ;;  %4794 = vmatpush3.bf16.msra.mxu1 %v5108_v40 }
 0xd1e   :  { %4795 = vmatprep.subr.bf16.mxu1 %v5731_v0  ;;  %2679 = vmatprep.subr.bf16.mxu0 %v5111_v28 }
 0xd21   :  { %2680 = vmatpush1.bf16.msra.mxu0 %v5109_v30  ;;  %4796 = vmatpush3.bf16.msra.mxu1 %v5112_v20 }
 0xd22   :  { %4797 = vmatprep.subr.bf16.mxu1 %v5731_v0  ;;  %2681 = vmatprep.subr.bf16.mxu0 %v5115_v14 }
 0xd25   :  { %2682 = vmatpush1.bf16.msra.mxu0 %v5113_v17  ;;  %4798 = vmatpush3.bf16.msra.mxu1 %v5116_v42 }
 0xd26   :  { %4799 = vmatprep.subr.bf16.mxu1 %v5731_v0  ;;  %2683 = vmatprep.subr.bf16.mxu0 %v5119_v47  ;;  %v2432_v47 = vrot.slane %v6754_v57, 7 }
 0xd29   :  { %2684 = vmatpush1.bf16.msra.mxu0 %v5117_v44  ;;  %4800 = vmatpush3.bf16.msra.mxu1 %v5120_v45 }
 0xd2a   :  { %4801 = vmatprep.subr.bf16.mxu1 %v5731_v0  ;;  %2685 = vmatprep.subr.bf16.mxu0 %v5123_v46 }
 0xd2d   :  { %2686 = vmatpush1.bf16.msra.mxu0 %v5121_v8  ;;  %4802 = vmatpush3.bf16.msra.mxu1 %v5124_v5 }
 0xd2e   :  { %2687 = vmatprep.subr.bf16.mxu0 %v5127_v33  ;;  %4803 = vmatprep.subr.bf16.mxu1 %v5731_v0 }
 0xd31   :  { %2688 = vmatpush1.bf16.msra.mxu0 %v5125_v11  ;;  %4804 = vmatpush3.bf16.msra.mxu1 %v5128_v52 }
 0xd32   :  { %2689 = vmatprep.subr.bf16.mxu0 %v5131_v2  ;;  %4805 = vmatprep.subr.bf16.mxu1 %v5731_v0 }
 0xd35   :  { %2690 = vmatpush1.bf16.msra.mxu0 %v5129_v35  ;;  %4806 = vmatpush3.bf16.msra.mxu1 %v5132_v51 }
 0xd36   :  { %2691 = vmatprep.subr.bf16.mxu0 %v5135_v53  ;;  %4807 = vmatprep.subr.bf16.mxu1 %v5731_v0 }
 0xd39   :  { %2692 = vmatpush1.bf16.msra.mxu0 %v5133_v54  ;;  %4808 = vmatpush3.bf16.msra.mxu1 %v5136_v1  ;;  %v5735_v1 = vmov 1983009808  }
 0xd3a   :  { %3022 = vmatprep.subr.bf16.mxu0 %v6776_v32  ;;  %4813 = vmatprep.subr.bf16.mxu1 %v5731_v0 }
 0xdee   :  { %v2332_v56 = vpop.f32.mrb[36].mxu0  ;;  %v2373_v59 = vpop.f32.mrb[52].mxu1 }
 0xdef   :  { %v2333_v60 = vadd.f32 %v2332_v56, %v6308_v43  ;;  %v2334_v4 = vpop.f32.mrb[37].mxu0  ;;  %v4791_v19 = vpop.f32.mrb[53].mxu1  ;;  %v2374_v28 = vadd.f32 %v2373_v59, %v6336_v38 }
 0xdf0   :  { %v2335_v63 = vadd.f32 %v2334_v4, %v6321_v62  ;;  %v2336_v3 = vpop.f32.mrb[38].mxu0  ;;  %v2376_v29 = vpop.f32.mrb[54].mxu1  ;;  %v2449_v4 = vld [vmem:[#allocation2 + $0x4] sm:$0x3]  ;;  %v2452_v19 = vld [vmem:[#allocation2 + $0xa] sm:$0x3] }
 0xdf1   :  { %v2380_v34 = vrot.slane %v2333_v60, 1  ;;  %v2381_v37 = vrot.slane %v2333_v60, 2  ;;  %v2337_v39 = vpop.f32.mrb[39].mxu0  ;;  %v4792_v55 = vpop.f32.mrb[55].mxu1  ;;  %v2418_v20 = vrot.slane %v2374_v28, 1 }
 0xdf2   :  { %v2399_v61 = vrot.slane %v2335_v63, 1  ;;  %v2400_v24 = vrot.slane %v2335_v63, 2  ;;  %v2448_v60 = vld [vmem:[#allocation2 + $0x2] sm:$0x3]  ;;  %v2447_v3 = vld [vmem:[#allocation2] sm:$0x3] }
 0xdf3   :  { %v2384_v22 = vadd.f32 %v2380_v34, %v6312_v48  ;;  %v2385_v6 = vadd.f32 %v2381_v37, %v6317_v58  ;;  %v2451_v29 = vld [vmem:[#allocation2 + $0x8] sm:$0x3]  ;;  %v2463_v21 = vcombine.low %v2447_v3, %v2448_v60  ;;  %v2453_v37 = vld [vmem:[#allocation2 + $0xc] sm:$0x3] }
 0xdf4   :  { %v2403_v9 = vadd.f32 %v2399_v61, %v6326_v7  ;;  %v2404_v62 = vadd.f32 %v2400_v24, %v6328_v15  ;;  %v2419_v15 = vrot.slane %v2374_v28, 2  ;;  %v6836_v28 = vld [vmem:[#allocation14 + $0x64] ss:$12 sps:$4 sm:$0xff]  }
 0xdf5   :  { %v4242_v50 = vmul.f32 -1.442695, %v2384_v22  ;;  %v4243_v43 = vmul.f32 -1.442695, %v2385_v6 }
 0xdf6   :  { %v4244_v16 = vmul.f32 -1.442695, %v2403_v9  ;;  %v4245_v25 = vmul.f32 -1.442695, %v2404_v62  ;;  %v6804_v62 = vld [vmem:[#allocation14 + $0x1c] ss:$12 sps:$4 sm:$0xff]  }
 0xdf7   :  { %5329 = vpow2.f32 %v4242_v50 }
 0xdf8   :  { %5331 = vpow2.f32 %v4243_v43  ;;  %v6800_v43 = vld [vmem:[#allocation14] ss:$12 sps:$4 sm:$0xff]  }
 0xdf9   :  { %5333 = vpow2.f32 %v4244_v16  ;;  %v6802_v16 = vld [vmem:[#allocation14 + $0x8] ss:$12 sps:$4 sm:$0xff]  }
 0xdfa   :  { %5335 = vpow2.f32 %v4245_v25  ;;  %v6807_v25 = vld [vmem:[#allocation14 + $0x18] ss:$12 sps:$4 sm:$0xff]  }
 0xe01   :  { %v5330_v12 = vpop.eup %5329 }
 0xe02   :  { %v5332_v27 = vpop.eup %5331  ;;  %v2392_v13 = vadd.f32 1.0, %v5330_v12  ;;  %v6810_v12 = vld [vmem:[#allocation14 + $0x20] ss:$12 sps:$4 sm:$0xff]  }
 0xe03   :  { %v5334_v40 = vpop.eup %5333  ;;  %v2393_v48 = vadd.f32 1.0, %v5332_v27  ;;  %v6813_v27 = vld [vmem:[#allocation14 + $0x34] ss:$12 sps:$4 sm:$0xff]  }
 0xe04   :  { %5337 = vrcp.f32 %v2392_v13  ;;  %v2411_v58 = vadd.f32 1.0, %v5334_v40  ;;  %v5336_v7 = vpop.eup %5335  ;;  %v6820_v13 = vld [vmem:[#allocation14 + $0x30] ss:$12 sps:$4 sm:$0xff]   ;;  %v6823_v40 = vld [vmem:[#allocation14 + $0x38] ss:$12 sps:$4 sm:$0xff]  }
 0xe05   :  { %5339 = vrcp.f32 %v2393_v48  ;;  %v2412_v30 = vadd.f32 1.0, %v5336_v7  ;;  %v6826_v48 = vld [vmem:[#allocation14 + $0x4c] ss:$12 sps:$4 sm:$0xff]   ;;  %v6833_v7 = vld [vmem:[#allocation14 + $0x50] ss:$12 sps:$4 sm:$0xff]  }
 0xe06   :  { %5341 = vrcp.f32 %v2411_v58  ;;  %v6830_v58 = vld [vmem:[#allocation14 + $0x48] ss:$12 sps:$4 sm:$0xff]  }
 0xe07   :  { %5343 = vrcp.f32 %v2412_v30  ;;  %v6840_v30 = vld [vmem:[#allocation14 + $0x60] ss:$12 sps:$4 sm:$0xff]  }
 0xe0e   :  { %v5338_v14 = vpop.eup %5337 }
 0xe0f   :  { %v5340_v17 = vpop.eup %5339  ;;  %v2422_v42 = vmul.f32 %v5338_v14, %v2418_v20  ;;  %v6843_v20 = vld [vmem:[#allocation14 + $0x68] ss:$12 sps:$4 sm:$0xff]  }
 0xe10   :  { %v5342_v44 = vpop.eup %5341  ;;  %v2423_v45 = vmul.f32 %v5340_v17, %v2419_v15  ;;  %v6846_v14 = vld [vmem:[#allocation14 + $0x7c] ss:$12 sps:$4 sm:$0xff]   ;;  %v6850_v15 = vld [vmem:[#allocation14 + $0x78] ss:$12 sps:$4 sm:$0xff]   ;;  %v6853_v17 = vld [vmem:[#allocation14 + $0x80] ss:$12 sps:$4 sm:$0xff]  }
 0xe11   :  { %v2424_v46 = vadd.f32 %v2422_v42, %v6340_v10  ;;  %v2435_v8 = vmul.f32 %v5342_v44, %v2432_v47  ;;  %v5344_v33 = vpop.eup %5343  ;;  %v2428_v38 = vsub.f32 1.0, %v5342_v44  ;;  %v2466_v10 = vunpack.c.l.s4 %v5735_v1  ;;  %v6856_v42 = vld [vmem:[#allocation14 + $0x94] ss:$12 sps:$4 sm:$0xff]   ;;  %v6860_v47 = vld [vmem:[#allocation14 + $0x90] ss:$12 sps:$4 sm:$0xff]  }
 0xe12   :  { %v2425_v5 = vadd.f32 %v2423_v45, %v6342_v41  ;;  %v2429_v52 = vsub.f32 1.0, %v5344_v33  ;;  %v2436_v57 = vmul.f32 %v5344_v33, %v2281_v18  ;;  %v2450_v41 = vld [vmem:[#allocation2 + $0x6] sm:$0x3]  ;;  %v2480_v18 = vcombine.low %v2451_v29, %v2452_v19  ;;  %v6863_v44 = vld [vmem:[#allocation14 + $0x98] ss:$12 sps:$4 sm:$0xff]  }
 0xe13   :  { %5345 = vtanh.f32 %v2424_v46  ;;  %v2467_v59 = vunpack.c.0.s8 %v2466_v10  ;;  %v2464_v63 = vcombine.low %v2449_v4, %v2450_v41  ;;  %v6866_v45 = vld [vmem:[#allocation14 + $0xac] ss:$12 sps:$4 sm:$0xff]   ;;  %v6870_v46 = vld [vmem:[#allocation14 + $0xa8] ss:$12 sps:$4 sm:$0xff]  }
 0xe14   :  { %5347 = vtanh.f32 %v2425_v5  ;;  %v2532_v5 = vld [vmem:[#allocation15] sm:$0x7] }
 0xe15   :  { %v6794_v34 = vsub.s32 %v2467_v59, %v6058_v26  ;;  %v2537_v33 = vrot.slane %v2532_v5, %v6065_v31 }
 0xe17   :  { %v2478_v55 = vrot.slane %v2464_v63, %v6794_v34  ;;  %v2471_v22 = vrot.slane %v2463_v21, %v6794_v34  ;;  %v2488_v6 = vrot.slane %v2480_v18, %v6794_v34 }
 0xe19   :  { %v2479_v9 = vcombine.low %v2471_v22, %v2478_v55 }
 0xe1d   :  { %v5346_v11 = vpop.eup %5345 }
 0xe1e   :  { %v5348_v2 = vpop.eup %5347  ;;  %v2430_v35 = vmul.f32 %v5346_v11, %v2428_v38  ;;  %v2545_v38 = vrot.slane %v2532_v5, %v6333_v36  ;;  %v2541_v11 = vrot.slane %v2532_v5, %v6315_v49 }
 0xe1f   :  { %v2431_v51 = vmul.f32 %v5348_v2, %v2429_v52 }
 0xe20   :  { %v2437_v53 = vadd.f32 %v2435_v8, %v2430_v35  ;;  %v6873_v8 = vld [vmem:[#allocation14 + $0xb0] ss:$12 sps:$4 sm:$0xff]  }
 0xe21   :  { %v2438_v54 = vadd.f32 %v2436_v57, %v2431_v51 }
 0xe22   :  { %2445 = vst [vmem:[#allocation2 + $0x7] sm:$0x80] %v2437_v53 }
 0xe23   :  { %v2441_v56 = vrot.slane %v2438_v54, 7 }
 0xe25   :  { %2446 = vst [vmem:[#allocation2 + $0xf] sm:$0x1] %v2441_v56 }
 0xe2c   :  { %v2454_v39 = vld [vmem:[#allocation2 + $0xe] sm:$0x3] }
 0xe2d   :  { %v2481_v61 = vcombine.low %v2453_v37, %v2454_v39 }
 0xe2f   :  { %v2495_v24 = vrot.slane %v2481_v61, %v6794_v34 }
 0xe31   :  { %v2496_v50 = vcombine.low %v2488_v6, %v2495_v24 }
 0xe33   :  { %v2499_v26 = vpack.c.bf16 %v2496_v50, %v2479_v9 }
 0xe35   :  { %2710 = vmatmul.mubr.bf16.vlgmr.msra.gmra.mrb[40].mxu0 %v2499_v26  ;;  %4810 = vmatmul.mubr.bf16.vlgmr.msra.gmra.mrb[56].mxu1 %v2499_v26 }
 0xe36   :  { %3023 = vmatpush1.bf16.msra.mxu0 %v6800_v43  ;;  %4814 = vmatpush3.bf16.msra.mxu1 %v6802_v16 }
 0xe37   :  { %3024 = vmatprep.subr.bf16.mxu0 %v6804_v62  ;;  %4815 = vmatprep.subr.bf16.mxu1 %v5731_v0 }
 0xe38   :  { %3054 = vmatprep.mubr.bf16.mxu0 %v5733_v23  ;;  %4829 = vmatprep.mubr.msk.bf16.mxu1 %vm5732_vm0, %v5731_v0 }
 0xe3a   :  { %3025 = vmatpush1.bf16.msra.mxu0 %v6807_v25  ;;  %4816 = vmatpush3.bf16.msra.mxu1 %v6810_v12 }
 0xe3b   :  { %3026 = vmatprep.subr.bf16.mxu0 %v6813_v27  ;;  %4817 = vmatprep.subr.bf16.mxu1 %v5731_v0 }
 0xe3e   :  { %3027 = vmatpush1.bf16.msra.mxu0 %v6820_v13  ;;  %4818 = vmatpush3.bf16.msra.mxu1 %v6823_v40 }
 0xe3f   :  { %3028 = vmatprep.subr.bf16.mxu0 %v6826_v48  ;;  %4819 = vmatprep.subr.bf16.mxu1 %v5731_v0 }
 0xe42   :  { %3029 = vmatpush1.bf16.msra.mxu0 %v6830_v58  ;;  %4820 = vmatpush3.bf16.msra.mxu1 %v6833_v7 }
 0xe43   :  { %3030 = vmatprep.subr.bf16.mxu0 %v6836_v28  ;;  %4821 = vmatprep.subr.bf16.mxu1 %v5731_v0 }
 0xe46   :  { %3031 = vmatpush1.bf16.msra.mxu0 %v6840_v30  ;;  %4822 = vmatpush3.bf16.msra.mxu1 %v6843_v20 }
 0xe47   :  { %3032 = vmatprep.subr.bf16.mxu0 %v6846_v14  ;;  %4823 = vmatprep.subr.bf16.mxu1 %v5731_v0 }
 0xe4a   :  { %3033 = vmatpush1.bf16.msra.mxu0 %v6850_v15  ;;  %4824 = vmatpush3.bf16.msra.mxu1 %v6853_v17 }
 0xe4b   :  { %3034 = vmatprep.subr.bf16.mxu0 %v6856_v42  ;;  %4825 = vmatprep.subr.bf16.mxu1 %v5731_v0 }
 0xe4e   :  { %3035 = vmatpush1.bf16.msra.mxu0 %v6860_v47  ;;  %4826 = vmatpush3.bf16.msra.mxu1 %v6863_v44 }
 0xe4f   :  { %3036 = vmatprep.subr.bf16.mxu0 %v6866_v45  ;;  %4827 = vmatprep.subr.bf16.mxu1 %v5731_v0 }
 0xe52   :  { %3037 = vmatpush1.bf16.msra.mxu0 %v6870_v46  ;;  %4828 = vmatpush3.bf16.msra.mxu1 %v6873_v8 }
 0xe53   :  { %3130 = vmatprep.subr.bf16.mxu0 %v6776_v32  ;;  %4833 = vmatprep.subr.bf16.mxu1 %v5731_v0 }
 0xe55   :  { %3055 = vmatmul.mubr.bf16.vlgmr.msra.gmra.mrb[44].mxu0 %v5733_v23  ;;  %4830 = vmatmul.mubr.bf16.vlgmr.msra.gmra.mrb[60].mxu1 %v5733_v23 }
 0xe56   :  { %3131 = vmatpush1.bf16.msra.mxu0 %v6800_v43  ;;  %4834 = vmatpush3.bf16.msra.mxu1 %v6802_v16 }
 0xe57   :  { %3132 = vmatprep.subr.bf16.mxu0 %v6804_v62  ;;  %4835 = vmatprep.subr.bf16.mxu1 %v5731_v0 }
 0xe58   :  { %3162 = vmatprep.mubr.bf16.mxu0 %v5733_v23  ;;  %4849 = vmatprep.mubr.msk.bf16.mxu1 %vm5732_vm0, %v5731_v0 }
 0xe5a   :  { %3133 = vmatpush1.bf16.msra.mxu0 %v6807_v25  ;;  %4836 = vmatpush3.bf16.msra.mxu1 %v6810_v12 }
 0xe5b   :  { %3134 = vmatprep.subr.bf16.mxu0 %v6813_v27  ;;  %4837 = vmatprep.subr.bf16.mxu1 %v5731_v0 }
 0xe5e   :  { %3135 = vmatpush1.bf16.msra.mxu0 %v6820_v13  ;;  %4838 = vmatpush3.bf16.msra.mxu1 %v6823_v40 }
 0xe5f   :  { %3136 = vmatprep.subr.bf16.mxu0 %v6826_v48  ;;  %4839 = vmatprep.subr.bf16.mxu1 %v5731_v0 }
 0xe62   :  { %3137 = vmatpush1.bf16.msra.mxu0 %v6830_v58  ;;  %4840 = vmatpush3.bf16.msra.mxu1 %v6833_v7 }
 0xe63   :  { %3138 = vmatprep.subr.bf16.mxu0 %v6836_v28  ;;  %4841 = vmatprep.subr.bf16.mxu1 %v5731_v0 }
 0xe66   :  { %3139 = vmatpush1.bf16.msra.mxu0 %v6840_v30  ;;  %4842 = vmatpush3.bf16.msra.mxu1 %v6843_v20 }
 0xe67   :  { %3140 = vmatprep.subr.bf16.mxu0 %v6846_v14  ;;  %4843 = vmatprep.subr.bf16.mxu1 %v5731_v0 }
 0xe6a   :  { %3141 = vmatpush1.bf16.msra.mxu0 %v6850_v15  ;;  %4844 = vmatpush3.bf16.msra.mxu1 %v6853_v17 }
 0xe6b   :  { %3142 = vmatprep.subr.bf16.mxu0 %v6856_v42  ;;  %4845 = vmatprep.subr.bf16.mxu1 %v5731_v0 }
 0xe6e   :  { %3143 = vmatpush1.bf16.msra.mxu0 %v6860_v47  ;;  %4846 = vmatpush3.bf16.msra.mxu1 %v6863_v44 }
 0xe6f   :  { %3144 = vmatprep.subr.bf16.mxu0 %v6866_v45  ;;  %4847 = vmatprep.subr.bf16.mxu1 %v5731_v0 }
 0xe72   :  { %3145 = vmatpush1.bf16.msra.mxu0 %v6870_v46  ;;  %4848 = vmatpush3.bf16.msra.mxu1 %v6873_v8 }
 0xe73   :  { %3239 = vmatprep.subr.bf16.mxu0 %v6776_v32  ;;  %4853 = vmatprep.subr.bf16.mxu1 %v5731_v0 }
 0xf08   :  { %v2711_v52 = vpop.f32.mrb[40].mxu0  ;;  %v2754_v2 = vpop.f32.mrb[56].mxu1 }
 0xf09   :  { %v2712_v35 = vadd.f32 %v2711_v52, %v2537_v33  ;;  %v2755_v51 = vadd.f32 %v2754_v2, %v2545_v38  ;;  %v2713_v57 = vpop.f32.mrb[41].mxu0  ;;  %v4811_v53 = vpop.f32.mrb[57].mxu1 }
 0xf0a   :  { %v2714_v54 = vadd.f32 %v2713_v57, %v2541_v11  ;;  %v2715_v1 = vpop.f32.mrb[42].mxu0  ;;  %v2757_v10 = vpop.f32.mrb[58].mxu1 }
 0xf0b   :  { %v2769_v56 = vcombine.high %v2755_v51, %v2755_v51  ;;  %v2716_v41 = vadd.f32 %v2715_v1, %v2537_v33  ;;  %v2758_v59 = vadd.f32 %v2757_v10, %v2545_v38  ;;  %v2717_v60 = vpop.f32.mrb[43].mxu0  ;;  %v4812_v4 = vpop.f32.mrb[59].mxu1  ;;  %v2790_v29 = vrot.slane %v2755_v51, %v6794_v34 }
 0xf0c   :  { %v2767_v19 = vcombine.low %v2712_v35, %v2714_v54  ;;  %v2768_v63 = vcombine.high %v2712_v35, %v2714_v54  ;;  %v2718_v3 = vadd.f32 %v2717_v60, %v2541_v11  ;;  %v2877_v35 = vld [vmem:[#allocation17] sm:$0x7] }
 0xf0d   :  { %v2797_v21 = vrot.slane %v2769_v56, %v6794_v34  ;;  %v2804_v18 = vcombine.high %v2758_v59, %v2758_v59  ;;  %v2825_v26 = vrot.slane %v2758_v59, %v6794_v34  ;;  %v6944_v51 = vrot.slane %v2877_v35, %v6065_v31 }
 0xf0e   :  { %v2776_v37 = vrot.slane %v2767_v19, %v6794_v34  ;;  %v2783_v39 = vrot.slane %v2768_v63, %v6794_v34  ;;  %v2802_v55 = vcombine.low %v2716_v41, %v2718_v3  ;;  %v2803_v61 = vcombine.high %v2716_v41, %v2718_v3 }
 0xf0f   :  { %v2832_v22 = vrot.slane %v2804_v18, %v6794_v34  ;;  %v6947_v57 = vrot.slane %v2877_v35, %v6315_v49 }
 0xf10   :  { %v2798_v6 = vcombine.low %v2776_v37, %v2790_v29  ;;  %v6926_v24 = vcombine.high %v2776_v37, %v2790_v29  ;;  %v6928_v9 = vcombine.low %v2783_v39, %v2797_v21  ;;  %v6930_v50 = vcombine.high %v2783_v39, %v2797_v21 }
 0xf11   :  { %v2811_v5 = vrot.slane %v2802_v55, %v6794_v34  ;;  %v2818_v33 = vrot.slane %v2803_v61, %v6794_v34  ;;  %v6952_v37 = vrot.slane %v2877_v35, %v6333_v36 }
 0xf12   :  { %v3110_v59 = vrot.slane %v2798_v6, 2 }
 0xf13   :  { %v6935_v38 = vcombine.low %v2811_v5, %v2825_v26  ;;  %v6937_v11 = vcombine.high %v2811_v5, %v2825_v26  ;;  %v6939_v52 = vcombine.low %v2818_v33, %v2832_v22  ;;  %v6941_v2 = vcombine.high %v2818_v33, %v2832_v22 }
 0xf14   :  { %v3120_v5 = vrot.slane %v2798_v6, 4 }
 0xf28   :  { %v3056_v53 = vpop.f32.mrb[44].mxu0  ;;  %v3097_v54 = vpop.f32.mrb[60].mxu1 }
 0xf29   :  { %v3057_v1 = vadd.f32 %v3056_v53, %v6944_v51  ;;  %v3058_v10 = vpop.f32.mrb[45].mxu0  ;;  %v4831_v56 = vpop.f32.mrb[61].mxu1  ;;  %v3098_v61 = vadd.f32 %v3097_v54, %v6952_v37 }
 0xf2a   :  { %v3059_v41 = vadd.f32 %v3058_v10, %v6947_v57  ;;  %v3060_v60 = vpop.f32.mrb[46].mxu0  ;;  %v3100_v4 = vpop.f32.mrb[62].mxu1 }
 0xf2b   :  { %v3103_v19 = vadd.f32 %v3057_v1, %v2798_v6  ;;  %v3061_v63 = vpop.f32.mrb[47].mxu0  ;;  %v4832_v3 = vpop.f32.mrb[63].mxu1 }
 0xf2c   :  { %v3112_v29 = vadd.f32 %v3110_v59, %v3059_v41  ;;  %v3218_v63 = vrot.slane %v6926_v24, 2 }
 0xf2d   :  { %v4294_v31 = vmul.f32 -1.442695, %v3103_v19 }
 0xf2e   :  { %v4295_v21 = vmul.f32 -1.442695, %v3112_v29 }
 0xf2f   :  { %5349 = vpow2.f32 %v4294_v31 }
 0xf30   :  { %5351 = vpow2.f32 %v4295_v21 }
 0xf39   :  { %v5350_v49 = vpop.eup %5349 }
 0xf3a   :  { %v3107_v18 = vadd.f32 1.0, %v5350_v49  ;;  %v5352_v39 = vpop.eup %5351 }
 0xf3b   :  { %v3116_v55 = vadd.f32 1.0, %v5352_v39 }
 0xf3c   :  { %5353 = vrcp.f32 %v3107_v18 }
 0xf3d   :  { %5355 = vrcp.f32 %v3116_v55 }
 0xf46   :  { %v5354_v22 = vpop.eup %5353 }
 0xf47   :  { %v3119_v26 = vmul.f32 %v5354_v22, %v3098_v61  ;;  %v5356_v53 = vpop.eup %5355 }
 0xf48   :  { %v3124_v1 = vsub.f32 1.0, %v5356_v53  ;;  %v3126_v41 = vmul.f32 0.0, %v5356_v53 }
 0xf49   :  { %v3122_v33 = vadd.f32 %v3120_v5, %v3119_v26 }
 0xf4b   :  { %5357 = vtanh.f32 %v3122_v33 }
 0xf55   :  { %v5358_v10 = vpop.eup %5357 }
 0xf56   :  { %v3125_v56 = vmul.f32 %v5358_v10, %v3124_v1  ;;  %v3228_v10 = vrot.slane %v6926_v24, 4 }
 0xf58   :  { %v6955_v59 = vadd.f32 %v3126_v41, %v3125_v56 }
 0xf5a   :  { %3128 = vst [vmem:[#allocation3] sm:$0x3] %v6955_v59  ;;  %v3129_v36 = vpack.c.bf16 %v6955_v59, %v6955_v59 }
 0xf5c   :  { %3163 = vmatmul.mubr.bf16.vlgmr.msra.gmra.mrb[48].mxu0 %v3129_v36  ;;  %4850 = vmatmul.mubr.bf16.vlgmr.msra.gmra.mrb[64].mxu1 %v3129_v36 }
 0xf5d   :  { %3240 = vmatpush1.bf16.msra.mxu0 %v6800_v43  ;;  %4854 = vmatpush3.bf16.msra.mxu1 %v6802_v16 }
 0xf5e   :  { %3241 = vmatprep.subr.bf16.mxu0 %v6804_v62  ;;  %4855 = vmatprep.subr.bf16.mxu1 %v5731_v0 }
 0xf5f   :  { %3271 = vmatprep.mubr.bf16.mxu0 %v5733_v23  ;;  %4869 = vmatprep.mubr.msk.bf16.mxu1 %vm5732_vm0, %v5731_v0 }
 0xf61   :  { %3242 = vmatpush1.bf16.msra.mxu0 %v6807_v25  ;;  %4856 = vmatpush3.bf16.msra.mxu1 %v6810_v12 }
 0xf62   :  { %3243 = vmatprep.subr.bf16.mxu0 %v6813_v27  ;;  %4857 = vmatprep.subr.bf16.mxu1 %v5731_v0 }
 0xf65   :  { %3244 = vmatpush1.bf16.msra.mxu0 %v6820_v13  ;;  %4858 = vmatpush3.bf16.msra.mxu1 %v6823_v40 }
 0xf66   :  { %3245 = vmatprep.subr.bf16.mxu0 %v6826_v48  ;;  %4859 = vmatprep.subr.bf16.mxu1 %v5731_v0 }
 0xf69   :  { %3246 = vmatpush1.bf16.msra.mxu0 %v6830_v58  ;;  %4860 = vmatpush3.bf16.msra.mxu1 %v6833_v7 }
 0xf6a   :  { %3247 = vmatprep.subr.bf16.mxu0 %v6836_v28  ;;  %4861 = vmatprep.subr.bf16.mxu1 %v5731_v0 }
 0xf6d   :  { %3248 = vmatpush1.bf16.msra.mxu0 %v6840_v30  ;;  %4862 = vmatpush3.bf16.msra.mxu1 %v6843_v20 }
 0xf6e   :  { %3249 = vmatprep.subr.bf16.mxu0 %v6846_v14  ;;  %4863 = vmatprep.subr.bf16.mxu1 %v5731_v0 }
 0xf71   :  { %3250 = vmatpush1.bf16.msra.mxu0 %v6850_v15  ;;  %4864 = vmatpush3.bf16.msra.mxu1 %v6853_v17 }
 0xf72   :  { %3251 = vmatprep.subr.bf16.mxu0 %v6856_v42  ;;  %4865 = vmatprep.subr.bf16.mxu1 %v5731_v0 }
 0xf75   :  { %3252 = vmatpush1.bf16.msra.mxu0 %v6860_v47  ;;  %4866 = vmatpush3.bf16.msra.mxu1 %v6863_v44 }
 0xf76   :  { %3253 = vmatprep.subr.bf16.mxu0 %v6866_v45  ;;  %4867 = vmatprep.subr.bf16.mxu1 %v5731_v0 }
 0xf79   :  { %3254 = vmatpush1.bf16.msra.mxu0 %v6870_v46  ;;  %4868 = vmatpush3.bf16.msra.mxu1 %v6873_v8 }
 0xf7a   :  { %3348 = vmatprep.subr.bf16.mxu0 %v6776_v32  ;;  %4873 = vmatprep.subr.bf16.mxu1 %v5731_v0 }
0x102f   :  { %v3164_v6 = vpop.f32.mrb[48].mxu0  ;;  %v3205_v35 = vpop.f32.mrb[64].mxu1 }
0x1030   :  { %v3165_v54 = vadd.f32 %v3164_v6, %v6944_v51  ;;  %v3166_v60 = vpop.f32.mrb[49].mxu0  ;;  %v4851_v4 = vpop.f32.mrb[65].mxu1  ;;  %v3206_v33 = vadd.f32 %v3205_v35, %v6952_v37 }
0x1031   :  { %v3167_v19 = vadd.f32 %v3166_v60, %v6947_v57  ;;  %v3168_v3 = vpop.f32.mrb[50].mxu0  ;;  %v3208_v29 = vpop.f32.mrb[66].mxu1 }
0x1032   :  { %v3211_v31 = vadd.f32 %v3165_v54, %v6926_v24  ;;  %v3169_v21 = vpop.f32.mrb[51].mxu0  ;;  %v4852_v49 = vpop.f32.mrb[67].mxu1 }
0x1033   :  { %v3220_v18 = vadd.f32 %v3218_v63, %v3167_v19 }
0x1034   :  { %v4296_v39 = vmul.f32 -1.442695, %v3211_v31  ;;  %v3327_v31 = vrot.slane %v6928_v9, 2 }
0x1035   :  { %v4297_v55 = vmul.f32 -1.442695, %v3220_v18 }
0x1036   :  { %5359 = vpow2.f32 %v4296_v39 }
0x1037   :  { %5361 = vpow2.f32 %v4297_v55 }
0x1040   :  { %v5360_v61 = vpop.eup %5359 }
0x1041   :  { %v3215_v22 = vadd.f32 1.0, %v5360_v61  ;;  %v5362_v26 = vpop.eup %5361 }
0x1042   :  { %v3224_v5 = vadd.f32 1.0, %v5362_v26 }
0x1043   :  { %5363 = vrcp.f32 %v3215_v22 }
0x1044   :  { %5365 = vrcp.f32 %v3224_v5 }
0x104d   :  { %v5364_v53 = vpop.eup %5363 }
0x104e   :  { %v3227_v1 = vmul.f32 %v5364_v53, %v3206_v33  ;;  %v5366_v41 = vpop.eup %5365 }
0x104f   :  { %v3232_v36 = vsub.f32 1.0, %v5366_v41  ;;  %v3234_v60 = vmul.f32 %v5366_v41, %v6955_v59 }
0x1050   :  { %v3230_v56 = vadd.f32 %v3228_v10, %v3227_v1 }
0x1052   :  { %5367 = vtanh.f32 %v3230_v56 }
0x105c   :  { %v5368_v6 = vpop.eup %5367 }
0x105d   :  { %v3233_v54 = vmul.f32 %v5368_v6, %v3232_v36  ;;  %v3337_v36 = vrot.slane %v6928_v9, 4 }
0x105f   :  { %v7002_v4 = vadd.f32 %v3234_v60, %v3233_v54 }
0x1061   :  { %3237 = vst [vmem:[#allocation3 + $0x2] sm:$0x3] %v7002_v4  ;;  %v3238_v35 = vpack.c.bf16 %v7002_v4, %v7002_v4 }
0x1063   :  { %3272 = vmatmul.mubr.bf16.vlgmr.msra.gmra.mrb[52].mxu0 %v3238_v35  ;;  %4870 = vmatmul.mubr.bf16.vlgmr.msra.gmra.mrb[68].mxu1 %v3238_v35 }
0x1064   :  { %3349 = vmatpush1.bf16.msra.mxu0 %v6800_v43  ;;  %4874 = vmatpush3.bf16.msra.mxu1 %v6802_v16 }
0x1065   :  { %3350 = vmatprep.subr.bf16.mxu0 %v6804_v62  ;;  %4875 = vmatprep.subr.bf16.mxu1 %v5731_v0 }
0x1066   :  { %3380 = vmatprep.mubr.bf16.mxu0 %v5733_v23  ;;  %4889 = vmatprep.mubr.msk.bf16.mxu1 %vm5732_vm0, %v5731_v0 }
0x1068   :  { %3351 = vmatpush1.bf16.msra.mxu0 %v6807_v25  ;;  %4876 = vmatpush3.bf16.msra.mxu1 %v6810_v12 }
0x1069   :  { %3352 = vmatprep.subr.bf16.mxu0 %v6813_v27  ;;  %4877 = vmatprep.subr.bf16.mxu1 %v5731_v0 }
0x106c   :  { %3353 = vmatpush1.bf16.msra.mxu0 %v6820_v13  ;;  %4878 = vmatpush3.bf16.msra.mxu1 %v6823_v40 }
0x106d   :  { %3354 = vmatprep.subr.bf16.mxu0 %v6826_v48  ;;  %4879 = vmatprep.subr.bf16.mxu1 %v5731_v0 }
0x1070   :  { %3355 = vmatpush1.bf16.msra.mxu0 %v6830_v58  ;;  %4880 = vmatpush3.bf16.msra.mxu1 %v6833_v7 }
0x1071   :  { %3356 = vmatprep.subr.bf16.mxu0 %v6836_v28  ;;  %4881 = vmatprep.subr.bf16.mxu1 %v5731_v0 }
0x1074   :  { %3357 = vmatpush1.bf16.msra.mxu0 %v6840_v30  ;;  %4882 = vmatpush3.bf16.msra.mxu1 %v6843_v20 }
0x1075   :  { %3358 = vmatprep.subr.bf16.mxu0 %v6846_v14  ;;  %4883 = vmatprep.subr.bf16.mxu1 %v5731_v0 }
0x1078   :  { %3359 = vmatpush1.bf16.msra.mxu0 %v6850_v15  ;;  %4884 = vmatpush3.bf16.msra.mxu1 %v6853_v17 }
0x1079   :  { %3360 = vmatprep.subr.bf16.mxu0 %v6856_v42  ;;  %4885 = vmatprep.subr.bf16.mxu1 %v5731_v0 }
0x107c   :  { %3361 = vmatpush1.bf16.msra.mxu0 %v6860_v47  ;;  %4886 = vmatpush3.bf16.msra.mxu1 %v6863_v44 }
0x107d   :  { %3362 = vmatprep.subr.bf16.mxu0 %v6866_v45  ;;  %4887 = vmatprep.subr.bf16.mxu1 %v5731_v0 }
0x1080   :  { %3363 = vmatpush1.bf16.msra.mxu0 %v6870_v46  ;;  %4888 = vmatpush3.bf16.msra.mxu1 %v6873_v8 }
0x1081   :  { %3457 = vmatprep.subr.bf16.mxu0 %v6776_v32  ;;  %4893 = vmatprep.subr.bf16.mxu1 %v5731_v0 }
0x1136   :  { %v3273_v24 = vpop.f32.mrb[52].mxu0  ;;  %v3314_v59 = vpop.f32.mrb[68].mxu1 }
0x1137   :  { %v3274_v19 = vadd.f32 %v3273_v24, %v6944_v51  ;;  %v3275_v63 = vpop.f32.mrb[53].mxu0  ;;  %v4871_v3 = vpop.f32.mrb[69].mxu1  ;;  %v3315_v10 = vadd.f32 %v3314_v59, %v6952_v37 }
0x1138   :  { %v3276_v29 = vadd.f32 %v3275_v63, %v6947_v57  ;;  %v3277_v21 = vpop.f32.mrb[54].mxu0  ;;  %v3317_v49 = vpop.f32.mrb[70].mxu1 }
0x1139   :  { %v3320_v18 = vadd.f32 %v3274_v19, %v6928_v9  ;;  %v3278_v39 = vpop.f32.mrb[55].mxu0  ;;  %v4872_v55 = vpop.f32.mrb[71].mxu1  ;;  %v3436_v49 = vrot.slane %v6930_v50, 2 }
0x113a   :  { %v3329_v61 = vadd.f32 %v3327_v31, %v3276_v29 }
0x113b   :  { %v4298_v22 = vmul.f32 -1.442695, %v3320_v18 }
0x113c   :  { %v4299_v26 = vmul.f32 -1.442695, %v3329_v61 }
0x113d   :  { %5369 = vpow2.f32 %v4298_v22 }
0x113e   :  { %5371 = vpow2.f32 %v4299_v26 }
0x1147   :  { %v5370_v5 = vpop.eup %5369 }
0x1148   :  { %v3324_v33 = vadd.f32 1.0, %v5370_v5  ;;  %v5372_v53 = vpop.eup %5371 }
0x1149   :  { %v3333_v1 = vadd.f32 1.0, %v5372_v53 }
0x114a   :  { %5373 = vrcp.f32 %v3324_v33 }
0x114b   :  { %5375 = vrcp.f32 %v3333_v1 }
0x1154   :  { %v5374_v56 = vpop.eup %5373 }
0x1155   :  { %v3336_v41 = vmul.f32 %v5374_v56, %v3315_v10  ;;  %v5376_v54 = vpop.eup %5375 }
0x1156   :  { %v3341_v60 = vsub.f32 1.0, %v5376_v54  ;;  %v3343_v19 = vmul.f32 %v5376_v54, %v7002_v4 }
0x1157   :  { %v3339_v6 = vadd.f32 %v3337_v36, %v3336_v41 }
0x1159   :  { %5377 = vtanh.f32 %v3339_v6  ;;  %v3446_v6 = vrot.slane %v6930_v50, 4 }
0x1163   :  { %v5378_v35 = vpop.eup %5377 }
0x1164   :  { %v3342_v24 = vmul.f32 %v5378_v35, %v3341_v60 }
0x1166   :  { %v7049_v63 = vadd.f32 %v3343_v19, %v3342_v24 }
0x1168   :  { %3346 = vst [vmem:[#allocation3 + $0x4] sm:$0x3] %v7049_v63  ;;  %v3347_v59 = vpack.c.bf16 %v7049_v63, %v7049_v63 }
0x116a   :  { %3381 = vmatmul.mubr.bf16.vlgmr.msra.gmra.mrb[56].mxu0 %v3347_v59  ;;  %4890 = vmatmul.mubr.bf16.vlgmr.msra.gmra.mrb[72].mxu1 %v3347_v59 }
0x116b   :  { %3458 = vmatpush1.bf16.msra.mxu0 %v6800_v43  ;;  %4894 = vmatpush3.bf16.msra.mxu1 %v6802_v16 }
0x116c   :  { %3459 = vmatprep.subr.bf16.mxu0 %v6804_v62  ;;  %4895 = vmatprep.subr.bf16.mxu1 %v5731_v0 }
0x116d   :  { %3489 = vmatprep.mubr.bf16.mxu0 %v5733_v23  ;;  %4909 = vmatprep.mubr.msk.bf16.mxu1 %vm5732_vm0, %v5731_v0 }
0x116f   :  { %3460 = vmatpush1.bf16.msra.mxu0 %v6807_v25  ;;  %4896 = vmatpush3.bf16.msra.mxu1 %v6810_v12 }
0x1170   :  { %3461 = vmatprep.subr.bf16.mxu0 %v6813_v27  ;;  %4897 = vmatprep.subr.bf16.mxu1 %v5731_v0 }
0x1173   :  { %3462 = vmatpush1.bf16.msra.mxu0 %v6820_v13  ;;  %4898 = vmatpush3.bf16.msra.mxu1 %v6823_v40 }
0x1174   :  { %3463 = vmatprep.subr.bf16.mxu0 %v6826_v48  ;;  %4899 = vmatprep.subr.bf16.mxu1 %v5731_v0 }
0x1177   :  { %3464 = vmatpush1.bf16.msra.mxu0 %v6830_v58  ;;  %4900 = vmatpush3.bf16.msra.mxu1 %v6833_v7 }
0x1178   :  { %3465 = vmatprep.subr.bf16.mxu0 %v6836_v28  ;;  %4901 = vmatprep.subr.bf16.mxu1 %v5731_v0 }
0x117b   :  { %3466 = vmatpush1.bf16.msra.mxu0 %v6840_v30  ;;  %4902 = vmatpush3.bf16.msra.mxu1 %v6843_v20 }
0x117c   :  { %3467 = vmatprep.subr.bf16.mxu0 %v6846_v14  ;;  %4903 = vmatprep.subr.bf16.mxu1 %v5731_v0 }
0x117f   :  { %3468 = vmatpush1.bf16.msra.mxu0 %v6850_v15  ;;  %4904 = vmatpush3.bf16.msra.mxu1 %v6853_v17 }
0x1180   :  { %3469 = vmatprep.subr.bf16.mxu0 %v6856_v42  ;;  %4905 = vmatprep.subr.bf16.mxu1 %v5731_v0 }
0x1183   :  { %3470 = vmatpush1.bf16.msra.mxu0 %v6860_v47  ;;  %4906 = vmatpush3.bf16.msra.mxu1 %v6863_v44 }
0x1184   :  { %3471 = vmatprep.subr.bf16.mxu0 %v6866_v45  ;;  %4907 = vmatprep.subr.bf16.mxu1 %v5731_v0 }
0x1187   :  { %3472 = vmatpush1.bf16.msra.mxu0 %v6870_v46  ;;  %4908 = vmatpush3.bf16.msra.mxu1 %v6873_v8 }
0x1188   :  { %3566 = vmatprep.subr.bf16.mxu0 %v6776_v32  ;;  %4913 = vmatprep.subr.bf16.mxu1 %v5731_v0 }
0x123d   :  { %v3382_v9 = vpop.f32.mrb[56].mxu0  ;;  %v3423_v4 = vpop.f32.mrb[72].mxu1 }
0x123e   :  { %v3383_v3 = vadd.f32 %v3382_v9, %v6944_v51  ;;  %v3384_v29 = vpop.f32.mrb[57].mxu0  ;;  %v4891_v31 = vpop.f32.mrb[73].mxu1  ;;  %v3424_v56 = vadd.f32 %v3423_v4, %v6952_v37 }
0x123f   :  { %v3385_v21 = vadd.f32 %v3384_v29, %v6947_v57  ;;  %v3386_v18 = vpop.f32.mrb[58].mxu0  ;;  %v3426_v39 = vpop.f32.mrb[74].mxu1 }
0x1240   :  { %v3429_v55 = vadd.f32 %v3383_v3, %v6930_v50  ;;  %v3387_v61 = vpop.f32.mrb[59].mxu0  ;;  %v4892_v22 = vpop.f32.mrb[75].mxu1  ;;  %v7134_v50 = vld [vmem:[#allocation14 + $0x4] ss:$12 sps:$4 sm:$0xff]   ;;  %v3545_v18 = vrot.slane %v6935_v38, 2 }
0x1241   :  { %v3438_v26 = vadd.f32 %v3436_v49, %v3385_v21 }
0x1242   :  { %v4300_v32 = vmul.f32 -1.442695, %v3429_v55 }
0x1243   :  { %v4301_v5 = vmul.f32 -1.442695, %v3438_v26 }
0x1244   :  { %5379 = vpow2.f32 %v4300_v32 }
0x1245   :  { %5381 = vpow2.f32 %v4301_v5 }
0x124e   :  { %v5380_v33 = vpop.eup %5379 }
0x124f   :  { %v3433_v53 = vadd.f32 1.0, %v5380_v33  ;;  %v5382_v1 = vpop.eup %5381 }
0x1250   :  { %v3442_v10 = vadd.f32 1.0, %v5382_v1 }
0x1251   :  { %5383 = vrcp.f32 %v3433_v53 }
0x1252   :  { %5385 = vrcp.f32 %v3442_v10 }
0x125b   :  { %v5384_v41 = vpop.eup %5383 }
0x125c   :  { %v3445_v36 = vmul.f32 %v5384_v41, %v3424_v56  ;;  %v5386_v60 = vpop.eup %5385 }
0x125d   :  { %v3450_v35 = vsub.f32 1.0, %v5386_v60  ;;  %v3452_v59 = vmul.f32 %v5386_v60, %v7049_v63 }
0x125e   :  { %v3448_v54 = vadd.f32 %v3446_v6, %v3445_v36 }
0x1260   :  { %5387 = vtanh.f32 %v3448_v54  ;;  %v3555_v54 = vrot.slane %v6935_v38, 4 }
0x126a   :  { %v5388_v24 = vpop.eup %5387 }
0x126b   :  { %v3451_v19 = vmul.f32 %v5388_v24, %v3450_v35 }
0x126d   :  { %v7096_v9 = vadd.f32 %v3452_v59, %v3451_v19 }
0x126f   :  { %3455 = vst [vmem:[#allocation3 + $0x6] sm:$0x3] %v7096_v9  ;;  %v3456_v4 = vpack.c.bf16 %v7096_v9, %v7096_v9 }
0x1271   :  { %3490 = vmatmul.mubr.bf16.vlgmr.msra.gmra.mrb[60].mxu0 %v3456_v4  ;;  %4910 = vmatmul.mubr.bf16.vlgmr.msra.gmra.mrb[76].mxu1 %v3456_v4 }
0x1272   :  { %3567 = vmatpush1.bf16.msra.mxu0 %v6800_v43  ;;  %4914 = vmatpush3.bf16.msra.mxu1 %v6802_v16 }
0x1273   :  { %3568 = vmatprep.subr.bf16.mxu0 %v6804_v62  ;;  %4915 = vmatprep.subr.bf16.mxu1 %v5731_v0 }
0x1274   :  { %3598 = vmatprep.mubr.bf16.mxu0 %v5733_v23  ;;  %4929 = vmatprep.mubr.msk.bf16.mxu1 %vm5732_vm0, %v5731_v0 }
0x1276   :  { %3569 = vmatpush1.bf16.msra.mxu0 %v6807_v25  ;;  %4916 = vmatpush3.bf16.msra.mxu1 %v6810_v12 }
0x1277   :  { %3570 = vmatprep.subr.bf16.mxu0 %v6813_v27  ;;  %4917 = vmatprep.subr.bf16.mxu1 %v5731_v0 }
0x127a   :  { %3571 = vmatpush1.bf16.msra.mxu0 %v6820_v13  ;;  %4918 = vmatpush3.bf16.msra.mxu1 %v6823_v40 }
0x127b   :  { %3572 = vmatprep.subr.bf16.mxu0 %v6826_v48  ;;  %4919 = vmatprep.subr.bf16.mxu1 %v5731_v0 }
0x127e   :  { %3573 = vmatpush1.bf16.msra.mxu0 %v6830_v58  ;;  %4920 = vmatpush3.bf16.msra.mxu1 %v6833_v7 }
0x127f   :  { %3574 = vmatprep.subr.bf16.mxu0 %v6836_v28  ;;  %4921 = vmatprep.subr.bf16.mxu1 %v5731_v0 }
0x1282   :  { %3575 = vmatpush1.bf16.msra.mxu0 %v6840_v30  ;;  %4922 = vmatpush3.bf16.msra.mxu1 %v6843_v20 }
0x1283   :  { %3576 = vmatprep.subr.bf16.mxu0 %v6846_v14  ;;  %4923 = vmatprep.subr.bf16.mxu1 %v5731_v0 }
0x1286   :  { %3577 = vmatpush1.bf16.msra.mxu0 %v6850_v15  ;;  %4924 = vmatpush3.bf16.msra.mxu1 %v6853_v17 }
0x1287   :  { %3578 = vmatprep.subr.bf16.mxu0 %v6856_v42  ;;  %4925 = vmatprep.subr.bf16.mxu1 %v5731_v0 }
0x128a   :  { %3579 = vmatpush1.bf16.msra.mxu0 %v6860_v47  ;;  %4926 = vmatpush3.bf16.msra.mxu1 %v6863_v44 }
0x128b   :  { %3580 = vmatprep.subr.bf16.mxu0 %v6866_v45  ;;  %4927 = vmatprep.subr.bf16.mxu1 %v5731_v0 }
0x128e   :  { %3581 = vmatpush1.bf16.msra.mxu0 %v6870_v46  ;;  %4928 = vmatpush3.bf16.msra.mxu1 %v6873_v8 }
0x128f   :  { %3675 = vmatprep.subr.bf16.mxu0 %v7134_v50  ;;  %4933 = vmatprep.subr.bf16.mxu1 %v5731_v0 }
0x1344   :  { %v3491_v63 = vpop.f32.mrb[60].mxu0  ;;  %v3532_v3 = vpop.f32.mrb[76].mxu1 }
0x1345   :  { %v3492_v29 = vadd.f32 %v3491_v63, %v6944_v51  ;;  %v3493_v31 = vpop.f32.mrb[61].mxu0  ;;  %v4911_v21 = vpop.f32.mrb[77].mxu1  ;;  %v3533_v41 = vadd.f32 %v3532_v3, %v6952_v37 }
0x1346   :  { %v3494_v49 = vadd.f32 %v3493_v31, %v6947_v57  ;;  %v3495_v39 = vpop.f32.mrb[62].mxu0  ;;  %v3535_v55 = vpop.f32.mrb[78].mxu1 }
0x1347   :  { %v3538_v61 = vadd.f32 %v3492_v29, %v6935_v38  ;;  %v3496_v22 = vpop.f32.mrb[63].mxu0  ;;  %v4912_v26 = vpop.f32.mrb[79].mxu1  ;;  %v5462_v39 = vld [vmem:[#allocation14] ss:$12 sps:$4 sm:$0xff]   ;;  %v5464_v55 = vld [vmem:[#allocation14 + $0x1c] ss:$12 sps:$4 sm:$0xff]  }
0x1348   :  { %v3547_v32 = vadd.f32 %v3545_v18, %v3494_v49  ;;  %v5466_v22 = vld [vmem:[#allocation14 + $0x20] ss:$12 sps:$4 sm:$0xff]  }
0x1349   :  { %v4302_v5 = vmul.f32 -1.442695, %v3538_v61  ;;  %v5465_v61 = vld [vmem:[#allocation14 + $0x18] ss:$12 sps:$4 sm:$0xff]   ;;  %v5467_v26 = vld [vmem:[#allocation14 + $0x34] ss:$12 sps:$4 sm:$0xff]  }
0x134a   :  { %v4303_v33 = vmul.f32 -1.442695, %v3547_v32  ;;  %v5468_v32 = vld [vmem:[#allocation14 + $0x30] ss:$12 sps:$4 sm:$0xff]  }
0x134b   :  { %5389 = vpow2.f32 %v4302_v5  ;;  %v5469_v5 = vld [vmem:[#allocation14 + $0x38] ss:$12 sps:$4 sm:$0xff]  }
0x134c   :  { %5391 = vpow2.f32 %v4303_v33  ;;  %v5470_v33 = vld [vmem:[#allocation14 + $0x4c] ss:$12 sps:$4 sm:$0xff]  }
0x1355   :  { %v5390_v53 = vpop.eup %5389 }
0x1356   :  { %v3542_v1 = vadd.f32 1.0, %v5390_v53  ;;  %v5392_v10 = vpop.eup %5391  ;;  %v5472_v53 = vld [vmem:[#allocation14 + $0x50] ss:$12 sps:$4 sm:$0xff]  }
0x1357   :  { %v3551_v56 = vadd.f32 1.0, %v5392_v10  ;;  %v5474_v10 = vld [vmem:[#allocation14 + $0x60] ss:$12 sps:$4 sm:$0xff]  }
0x1358   :  { %5393 = vrcp.f32 %v3542_v1  ;;  %v5473_v1 = vld [vmem:[#allocation14 + $0x64] ss:$12 sps:$4 sm:$0xff]  }
0x1359   :  { %5395 = vrcp.f32 %v3551_v56  ;;  %v5475_v56 = vld [vmem:[#allocation14 + $0x68] ss:$12 sps:$4 sm:$0xff]  }
0x1362   :  { %v5394_v36 = vpop.eup %5393 }
0x1363   :  { %v3554_v6 = vmul.f32 %v5394_v36, %v3533_v41  ;;  %v5396_v35 = vpop.eup %5395  ;;  %v5476_v41 = vld [vmem:[#allocation14 + $0x7c] ss:$12 sps:$4 sm:$0xff]   ;;  %v5477_v36 = vld [vmem:[#allocation14 + $0x78] ss:$12 sps:$4 sm:$0xff]  }
0x1364   :  { %v3559_v24 = vsub.f32 1.0, %v5396_v35  ;;  %v3561_v4 = vmul.f32 %v5396_v35, %v7096_v9  ;;  %v5481_v35 = vld [vmem:[#allocation14 + $0x98] ss:$12 sps:$4 sm:$0xff]  }
0x1365   :  { %v3557_v60 = vadd.f32 %v3555_v54, %v3554_v6  ;;  %v5478_v6 = vld [vmem:[#allocation14 + $0x80] ss:$12 sps:$4 sm:$0xff]  }
0x1366   :  { %v5479_v54 = vld [vmem:[#allocation14 + $0x94] ss:$12 sps:$4 sm:$0xff]  }
0x1367   :  { %5397 = vtanh.f32 %v3557_v60  ;;  %v5480_v60 = vld [vmem:[#allocation14 + $0x90] ss:$12 sps:$4 sm:$0xff]  }
0x1371   :  { %v5398_v19 = vpop.eup %5397 }
0x1372   :  { %v3560_v59 = vmul.f32 %v5398_v19, %v3559_v24  ;;  %v5482_v24 = vld [vmem:[#allocation14 + $0xac] ss:$12 sps:$4 sm:$0xff]   ;;  %v5483_v19 = vld [vmem:[#allocation14 + $0xa8] ss:$12 sps:$4 sm:$0xff]  }
0x1374   :  { %v7145_v63 = vadd.f32 %v3561_v4, %v3560_v59  ;;  %v5484_v59 = vld [vmem:[#allocation14 + $0xb0] ss:$12 sps:$4 sm:$0xff]  }
0x1376   :  { %3564 = vst [vmem:[#allocation3 + $0x8] sm:$0x3] %v7145_v63  ;;  %v3565_v3 = vpack.c.bf16 %v7145_v63, %v7145_v63 }
0x1378   :  { %3599 = vmatmul.mubr.bf16.vlgmr.msra.gmra.mrb[64].mxu0 %v3565_v3  ;;  %4930 = vmatmul.mubr.bf16.vlgmr.msra.gmra.mrb[80].mxu1 %v3565_v3 }
0x1379   :  { %3676 = vmatpush1.bf16.msra.mxu0 %v6800_v43  ;;  %4934 = vmatpush3.bf16.msra.mxu1 %v6802_v16 }
0x137a   :  { %3677 = vmatprep.subr.bf16.mxu0 %v6804_v62  ;;  %4935 = vmatprep.subr.bf16.mxu1 %v5731_v0 }
0x137b   :  { %3707 = vmatprep.mubr.bf16.mxu0 %v5733_v23  ;;  %4949 = vmatprep.mubr.msk.bf16.mxu1 %vm5732_vm0, %v5731_v0 }
0x137d   :  { %3678 = vmatpush1.bf16.msra.mxu0 %v6807_v25  ;;  %4936 = vmatpush3.bf16.msra.mxu1 %v6810_v12 }
0x137e   :  { %3679 = vmatprep.subr.bf16.mxu0 %v6813_v27  ;;  %4937 = vmatprep.subr.bf16.mxu1 %v5731_v0 }
0x1381   :  { %3680 = vmatpush1.bf16.msra.mxu0 %v6820_v13  ;;  %4938 = vmatpush3.bf16.msra.mxu1 %v6823_v40  ;;  %v3654_v13 = vrot.slane %v6937_v11, 2 }
0x1382   :  { %3681 = vmatprep.subr.bf16.mxu0 %v6826_v48  ;;  %4939 = vmatprep.subr.bf16.mxu1 %v5731_v0 }
0x1385   :  { %3682 = vmatpush1.bf16.msra.mxu0 %v6830_v58  ;;  %4940 = vmatpush3.bf16.msra.mxu1 %v6833_v7 }
0x1386   :  { %3683 = vmatprep.subr.bf16.mxu0 %v6836_v28  ;;  %4941 = vmatprep.subr.bf16.mxu1 %v5731_v0 }
0x1389   :  { %3684 = vmatpush1.bf16.msra.mxu0 %v6840_v30  ;;  %4942 = vmatpush3.bf16.msra.mxu1 %v6843_v20 }
0x138a   :  { %3685 = vmatprep.subr.bf16.mxu0 %v6846_v14  ;;  %4943 = vmatprep.subr.bf16.mxu1 %v5731_v0 }
0x138d   :  { %3686 = vmatpush1.bf16.msra.mxu0 %v6850_v15  ;;  %4944 = vmatpush3.bf16.msra.mxu1 %v6853_v17 }
0x138e   :  { %3687 = vmatprep.subr.bf16.mxu0 %v6856_v42  ;;  %4945 = vmatprep.subr.bf16.mxu1 %v5731_v0 }
0x1391   :  { %3688 = vmatpush1.bf16.msra.mxu0 %v6860_v47  ;;  %4946 = vmatpush3.bf16.msra.mxu1 %v6863_v44 }
0x1392   :  { %3689 = vmatprep.subr.bf16.mxu0 %v6866_v45  ;;  %4947 = vmatprep.subr.bf16.mxu1 %v5731_v0 }
0x1395   :  { %3690 = vmatpush1.bf16.msra.mxu0 %v6870_v46  ;;  %4948 = vmatpush3.bf16.msra.mxu1 %v6873_v8  ;;  %v3664_v8 = vrot.slane %v6937_v11, 4 }
0x1396   :  { %3784 = vmatprep.subr.bf16.mxu0 %v7134_v50  ;;  %4953 = vmatprep.subr.bf16.mxu1 %v5731_v0 }
0x144b   :  { %v3600_v43 = vpop.f32.mrb[64].mxu0  ;;  %v3641_v16 = vpop.f32.mrb[80].mxu1 }
0x144c   :  { %v3601_v62 = vadd.f32 %v3600_v43, %v6944_v51  ;;  %v3602_v25 = vpop.f32.mrb[65].mxu0  ;;  %v4931_v12 = vpop.f32.mrb[81].mxu1  ;;  %v3642_v44 = vadd.f32 %v3641_v16, %v6952_v37 }
0x144d   :  { %v3603_v27 = vadd.f32 %v3602_v25, %v6947_v57  ;;  %v3604_v40 = vpop.f32.mrb[66].mxu0  ;;  %v3644_v48 = vpop.f32.mrb[82].mxu1  ;;  %v3763_v25 = vrot.slane %v6939_v52, 2 }
0x144e   :  { %v3647_v58 = vadd.f32 %v3601_v62, %v6937_v11  ;;  %v3605_v7 = vpop.f32.mrb[67].mxu0  ;;  %v4932_v28 = vpop.f32.mrb[83].mxu1  ;;  %v5463_v11 = vld [vmem:[#allocation14 + $0x8] ss:$12 sps:$4 sm:$0xff]  }
0x144f   :  { %v3656_v30 = vadd.f32 %v3654_v13, %v3603_v27 }
0x1450   :  { %v4304_v20 = vmul.f32 -1.442695, %v3647_v58 }
0x1451   :  { %v4305_v14 = vmul.f32 -1.442695, %v3656_v30 }
0x1452   :  { %5399 = vpow2.f32 %v4304_v20 }
0x1453   :  { %5401 = vpow2.f32 %v4305_v14 }
0x145c   :  { %v5400_v15 = vpop.eup %5399 }
0x145d   :  { %v3651_v17 = vadd.f32 1.0, %v5400_v15  ;;  %v5402_v42 = vpop.eup %5401 }
0x145e   :  { %v3660_v47 = vadd.f32 1.0, %v5402_v42 }
0x145f   :  { %5403 = vrcp.f32 %v3651_v17 }
0x1460   :  { %5405 = vrcp.f32 %v3660_v47 }
0x1469   :  { %v5404_v45 = vpop.eup %5403 }
0x146a   :  { %v3663_v46 = vmul.f32 %v5404_v45, %v3642_v44  ;;  %v5406_v9 = vpop.eup %5405  ;;  %v3773_v44 = vrot.slane %v6939_v52, 4 }
0x146b   :  { %v3668_v50 = vsub.f32 1.0, %v5406_v9  ;;  %v3670_v21 = vmul.f32 %v5406_v9, %v7145_v63 }
0x146c   :  { %v3666_v38 = vadd.f32 %v3664_v8, %v3663_v46 }
0x146e   :  { %5407 = vtanh.f32 %v3666_v38 }
0x1478   :  { %v5408_v29 = vpop.eup %5407 }
0x1479   :  { %v3669_v31 = vmul.f32 %v5408_v29, %v3668_v50 }
0x147b   :  { %v7192_v49 = vadd.f32 %v3670_v21, %v3669_v31  ;;  %v5169_v21 = vld [vmem:[#allocation18] sm:$0xff]  }
0x147d   :  { %3673 = vst [vmem:[#allocation3 + $0xa] sm:$0x3] %v7192_v49  ;;  %v3674_v18 = vpack.c.bf16 %v7192_v49, %v7192_v49 }
0x147f   :  { %3708 = vmatmul.mubr.bf16.vlgmr.msra.gmra.mrb[68].mxu0 %v3674_v18  ;;  %4950 = vmatmul.mubr.bf16.vlgmr.msra.gmra.mrb[84].mxu1 %v3674_v18  ;;  %v5171_v18 = vld [vmem:[#allocation18 + $0x10] sm:$0xff]  }
0x1480   :  { %3785 = vmatpush1.bf16.msra.mxu0 %v5462_v39  ;;  %4954 = vmatpush3.bf16.msra.mxu1 %v5463_v11  ;;  %v5173_v39 = vld [vmem:[#allocation18 + $0x20] sm:$0xff]   ;;  %v5174_v11 = vld [vmem:[#allocation18 + $0x28] sm:$0xff]  }
0x1481   :  { %3786 = vmatprep.subr.bf16.mxu0 %v5464_v55  ;;  %4955 = vmatprep.subr.bf16.mxu1 %v5731_v0  ;;  %v5175_v55 = vld [vmem:[#allocation18 + $0x30] sm:$0xff]  }
0x1482   :  { %3816 = vmatprep.mubr.bf16.mxu0 %v5733_v23  ;;  %4969 = vmatprep.mubr.msk.bf16.mxu1 %vm5732_vm0, %v5731_v0  ;;  %v5471_v23 = vld [vmem:[#allocation14 + $0x48] ss:$12 sps:$4 sm:$0xff]  }
0x1484   :  { %3787 = vmatpush1.bf16.msra.mxu0 %v5465_v61  ;;  %4956 = vmatpush3.bf16.msra.mxu1 %v5466_v22  ;;  %v5176_v61 = vld [vmem:[#allocation18 + $0x38] sm:$0xff]  }
0x1485   :  { %3788 = vmatprep.subr.bf16.mxu0 %v5467_v26  ;;  %4957 = vmatprep.subr.bf16.mxu1 %v5731_v0 }
0x1488   :  { %3789 = vmatpush1.bf16.msra.mxu0 %v5468_v32  ;;  %4958 = vmatpush3.bf16.msra.mxu1 %v5469_v5 }
0x1489   :  { %3790 = vmatprep.subr.bf16.mxu0 %v5470_v33  ;;  %4959 = vmatprep.subr.bf16.mxu1 %v5731_v0 }
0x148c   :  { %3791 = vmatpush1.bf16.msra.mxu0 %v5471_v23  ;;  %4960 = vmatpush3.bf16.msra.mxu1 %v5472_v53  ;;  %v3872_v53 = vrot.slane %v6941_v2, 2 }
0x148d   :  { %3792 = vmatprep.subr.bf16.mxu0 %v5473_v1  ;;  %4961 = vmatprep.subr.bf16.mxu1 %v5731_v0 }
0x1490   :  { %3793 = vmatpush1.bf16.msra.mxu0 %v5474_v10  ;;  %4962 = vmatpush3.bf16.msra.mxu1 %v5475_v56 }
0x1491   :  { %3794 = vmatprep.subr.bf16.mxu0 %v5476_v41  ;;  %4963 = vmatprep.subr.bf16.mxu1 %v5731_v0 }
0x1494   :  { %3795 = vmatpush1.bf16.msra.mxu0 %v5477_v36  ;;  %4964 = vmatpush3.bf16.msra.mxu1 %v5478_v6 }
0x1495   :  { %3796 = vmatprep.subr.bf16.mxu0 %v5479_v54  ;;  %4965 = vmatprep.subr.bf16.mxu1 %v5731_v0 }
0x1498   :  { %3797 = vmatpush1.bf16.msra.mxu0 %v5480_v60  ;;  %4966 = vmatpush3.bf16.msra.mxu1 %v5481_v35 }
0x1499   :  { %3798 = vmatprep.subr.bf16.mxu0 %v5482_v24  ;;  %4967 = vmatprep.subr.bf16.mxu1 %v5731_v0 }
0x149c   :  { %3799 = vmatpush1.bf16.msra.mxu0 %v5483_v19  ;;  %4968 = vmatpush3.bf16.msra.mxu1 %v5484_v59 }
0x149d   :  { %4973 = vmatprep.subr.bf16.mxu0 %v5731_v0 }
0x1552   :  { %v3709_v4 = vpop.f32.mrb[68].mxu0  ;;  %v3750_v63 = vpop.f32.mrb[84].mxu1 }
0x1553   :  { %v3710_v3 = vadd.f32 %v3709_v4, %v6944_v51  ;;  %v3711_v43 = vpop.f32.mrb[69].mxu0  ;;  %v4951_v16 = vpop.f32.mrb[85].mxu1  ;;  %v3751_v17 = vadd.f32 %v3750_v63, %v6952_v37  ;;  %v3882_v4 = vrot.slane %v6941_v2, 4 }
0x1554   :  { %v3712_v62 = vadd.f32 %v3711_v43, %v6947_v57  ;;  %v3713_v12 = vpop.f32.mrb[70].mxu0  ;;  %v3753_v27 = vpop.f32.mrb[86].mxu1 }
0x1555   :  { %v3756_v13 = vadd.f32 %v3710_v3, %v6939_v52  ;;  %v3714_v40 = vpop.f32.mrb[71].mxu0  ;;  %v4952_v48 = vpop.f32.mrb[87].mxu1  ;;  %v5170_v52 = vld [vmem:[#allocation18 + $0x8] sm:$0xff]   ;;  %v3895_v27 = vld [vmem:[#allocation3 + $0x6] sm:$0x3] }
0x1556   :  { %v3765_v58 = vadd.f32 %v3763_v25, %v3712_v62  ;;  %v3894_v40 = vld [vmem:[#allocation3 + $0x4] sm:$0x3]  ;;  %v3897_v48 = vld [vmem:[#allocation3 + $0xa] sm:$0x3] }
0x1557   :  { %v4306_v7 = vmul.f32 -1.442695, %v3756_v13  ;;  %v3893_v13 = vld [vmem:[#allocation3 + $0x2] sm:$0x3] }
0x1558   :  { %v4307_v28 = vmul.f32 -1.442695, %v3765_v58  ;;  %v3909_v58 = vcombine.low %v3894_v40, %v3895_v27 }
0x1559   :  { %5409 = vpow2.f32 %v4306_v7  ;;  %v3896_v7 = vld [vmem:[#allocation3 + $0x8] sm:$0x3] }
0x155a   :  { %5411 = vpow2.f32 %v4307_v28 }
0x1563   :  { %v5410_v30 = vpop.eup %5409 }
0x1564   :  { %v3760_v20 = vadd.f32 1.0, %v5410_v30  ;;  %v5412_v14 = vpop.eup %5411  ;;  %v3925_v30 = vcombine.low %v3896_v7, %v3897_v48 }
0x1565   :  { %v3769_v15 = vadd.f32 1.0, %v5412_v14  ;;  %v3923_v14 = vrot.slane %v3909_v58, %v6794_v34 }
0x1566   :  { %5413 = vrcp.f32 %v3760_v20 }
0x1567   :  { %5415 = vrcp.f32 %v3769_v15 }
0x1570   :  { %v5414_v42 = vpop.eup %5413 }
0x1571   :  { %v3772_v47 = vmul.f32 %v5414_v42, %v3751_v17  ;;  %v5416_v46 = vpop.eup %5415  ;;  %v3933_v42 = vrot.slane %v3925_v30, %v6794_v34 }
0x1572   :  { %v3777_v8 = vsub.f32 1.0, %v5416_v46  ;;  %v3779_v50 = vmul.f32 %v5416_v46, %v7192_v49  ;;  %v5172_v49 = vld [vmem:[#allocation18 + $0x18] sm:$0xff]  }
0x1573   :  { %v3775_v45 = vadd.f32 %v3773_v44, %v3772_v47 }
0x1575   :  { %5417 = vtanh.f32 %v3775_v45 }
0x157f   :  { %v5418_v38 = vpop.eup %5417 }
0x1580   :  { %v3778_v9 = vmul.f32 %v5418_v38, %v3777_v8  ;;  %v4310_v8 = vld [vmem:[%s7280_s15] ss:$0 sm:$0xff] }
0x1582   :  { %v3780_v29 = vadd.f32 %v3779_v50, %v3778_v9 }
0x1584   :  { %3782 = vst [vmem:[#allocation3 + $0xc] sm:$0x3] %v3780_v29  ;;  %v3783_v31 = vpack.c.bf16 %v3780_v29, %v3780_v29 }
0x1586   :  { %3817 = vmatmul.mubr.bf16.vlgmr.msra.gmra.mrb[72].mxu0 %v3783_v31  ;;  %4970 = vmatmul.mubr.bf16.vlgmr.msra.gmra.mrb[88].mxu1 %v3783_v31 }
0x1587   :  { %4989 = vmatprep.mubr.msk.bf16.mxu0 %vm5732_vm0, %v5731_v0  ;;  %4974 = vmatpush3.bf16.msra.mxu0 %v5169_v21 }
0x1588   :  { %4975 = vmatprep.subr.bf16.mxu0 %v5731_v0 }
0x158b   :  { %4976 = vmatpush3.bf16.msra.mxu0 %v5170_v52 }
0x158c   :  { %4977 = vmatprep.subr.bf16.mxu0 %v5731_v0 }
0x158f   :  { %4978 = vmatpush3.bf16.msra.mxu0 %v5171_v18 }
0x1590   :  { %4979 = vmatprep.subr.bf16.mxu0 %v5731_v0 }
0x1593   :  { %4980 = vmatpush3.bf16.msra.mxu0 %v5172_v49 }
0x1594   :  { %4981 = vmatprep.subr.bf16.mxu0 %v5731_v0 }
0x1597   :  { %4982 = vmatpush3.bf16.msra.mxu0 %v5173_v39 }
0x1598   :  { %4983 = vmatprep.subr.bf16.mxu0 %v5731_v0 }
0x159b   :  { %4984 = vmatpush3.bf16.msra.mxu0 %v5174_v11 }
0x159c   :  { %4985 = vmatprep.subr.bf16.mxu0 %v5731_v0 }
0x159f   :  { %4986 = vmatpush3.bf16.msra.mxu0 %v5175_v55 }
0x15a0   :  { %4987 = vmatprep.subr.bf16.mxu0 %v5731_v0 }
0x15a3   :  { %4988 = vmatpush3.bf16.msra.mxu0 %v5176_v61 }
0x1659   :  { %v3818_v22 = vpop.f32.mrb[72].mxu0  ;;  %v3859_v26 = vpop.f32.mrb[88].mxu1 }
0x165a   :  { %v3819_v32 = vadd.f32 %v3818_v22, %v6944_v51  ;;  %v3820_v5 = vpop.f32.mrb[73].mxu0  ;;  %v4971_v33 = vpop.f32.mrb[89].mxu1 }
0x165b   :  { %v3821_v23 = vadd.f32 %v3820_v5, %v6947_v57  ;;  %v3822_v1 = vpop.f32.mrb[74].mxu0  ;;  %v3862_v10 = vpop.f32.mrb[90].mxu1  ;;  %v3860_v57 = vadd.f32 %v3859_v26, %v6952_v37  ;;  %v3892_v37 = vld [vmem:[#allocation3] sm:$0x3] }
0x165c   :  { %v3865_v56 = vadd.f32 %v3819_v32, %v6941_v2  ;;  %v3823_v41 = vpop.f32.mrb[75].mxu0  ;;  %v4972_v36 = vpop.f32.mrb[91].mxu1  ;;  %v3908_v28 = vcombine.low %v3892_v37, %v3893_v13  ;;  %v3898_v2 = vld [vmem:[#allocation3 + $0xc] sm:$0x3] }
0x165d   :  { %v3874_v6 = vadd.f32 %v3872_v53, %v3821_v23 }
0x165e   :  { %v4308_v54 = vmul.f32 -1.442695, %v3865_v56  ;;  %v3916_v17 = vrot.slane %v3908_v28, %v6794_v34 }
0x165f   :  { %v4309_v0 = vmul.f32 -1.442695, %v3874_v6 }
0x1660   :  { %5419 = vpow2.f32 %v4308_v54  ;;  %v3924_v44 = vcombine.low %v3916_v17, %v3923_v14 }
0x1661   :  { %5421 = vpow2.f32 %v4309_v0 }
0x166a   :  { %v5420_v60 = vpop.eup %5419 }
0x166b   :  { %v3869_v35 = vadd.f32 1.0, %v5420_v60  ;;  %v5422_v51 = vpop.eup %5421 }
0x166c   :  { %v3878_v24 = vadd.f32 1.0, %v5422_v51 }
0x166d   :  { %5423 = vrcp.f32 %v3869_v35 }
0x166e   :  { %5425 = vrcp.f32 %v3878_v24 }
0x1677   :  { %v5424_v19 = vpop.eup %5423 }
0x1678   :  { %v3881_v59 = vmul.f32 %v5424_v19, %v3860_v57  ;;  %v5426_v3 = vpop.eup %5425 }
0x1679   :  { %v3886_v43 = vsub.f32 1.0, %v5426_v3  ;;  %v3888_v25 = vmul.f32 %v5426_v3, %v3780_v29 }
0x167a   :  { %v3884_v63 = vadd.f32 %v3882_v4, %v3881_v59 }
0x167c   :  { %5427 = vtanh.f32 %v3884_v63 }
0x1686   :  { %v5428_v16 = vpop.eup %5427 }
0x1687   :  { %v3887_v62 = vmul.f32 %v5428_v16, %v3886_v43 }
0x1689   :  { %v3889_v12 = vadd.f32 %v3888_v25, %v3887_v62 }
0x168b   :  { %3891 = vst [vmem:[#allocation3 + $0xe] sm:$0x3] %v3889_v12 }
0x1692   :  { %v3899_v20 = vld [vmem:[#allocation3 + $0xe] sm:$0x3] }
0x1693   :  { %v3926_v15 = vcombine.low %v3898_v2, %v3899_v20 }
0x1695   :  { %v3940_v47 = vrot.slane %v3926_v15, %v6794_v34 }
0x1697   :  { %v3941_v45 = vcombine.low %v3933_v42, %v3940_v47 }
0x1699   :  { %v3944_v46 = vpack.c.bf16 %v3941_v45, %v3924_v44 }
0x169b   :  { %4990 = vmatmul.mubr.bf16.vlgmr.msra.gmra.mrb[76].mxu0 %v3944_v46 }
0x176e   :  { %v4050_v38 = vpop.f32.mrb[76].mxu0 }
0x176f   :  { %v4051_v9 = vadd.f32 %v4310_v8, %v4050_v38  ;;  %v4991_v50 = vpop.f32.mrb[77].mxu0 }
0x1770   :  { %v4053_v29 = vpop.f32.mrb[78].mxu0 }
0x1771   :  { %4057 = vmax.xlane.f32.xlu1 %v4051_v9  ;;  %v4992_v31 = vpop.f32.mrb[79].mxu0  ;;  %v4054_v21 = vadd.f32 %v4310_v8, %v4053_v29 }
0x1775   :  { %4059 = vmax.xlane.f32.xlu1 %v4054_v21 }
0x17fe   :  { %v4058_v52 = vpop.xlane.xlu1 %4057 }
0x17ff   :  { %v4061_v18 = vsub.f32 %v4051_v9, %v4058_v52 }
0x1801   :  { %v4063_v49 = vmul.f32 1.442695, %v4061_v18 }
0x1802   :  { %v4060_v39 = vpop.xlane.xlu1 %4059 }
0x1803   :  { %5429 = vpow2.f32 %v4063_v49  ;;  %v4062_v11 = vsub.f32 %v4054_v21, %v4060_v39 }
0x1805   :  { %v4065_v55 = vmul.f32 1.442695, %v4062_v11 }
0x1807   :  { %5431 = vpow2.f32 %v4065_v55 }
0x180d   :  { %v5430_v61 = vpop.eup %5429 }
0x180e   :  { %4067 = vadd.xlane.f32.xlu1 %v5430_v61 }
0x1811   :  { %v5432_v22 = vpop.eup %5431 }
0x1812   :  { %4069 = vadd.xlane.f32.xlu1 %v5432_v22 }
0x189b   :  { %v4068_v26 = vpop.xlane.xlu1 %4067 }
0x189c   :  { %5433 = vlog2.f32 %v4068_v26 }
0x189f   :  { %v4070_v32 = vpop.xlane.xlu1 %4069 }
0x18a0   :  { %5435 = vlog2.f32 %v4070_v32 }
0x18a6   :  { %v5434_v5 = vpop.eup %5433 }
0x18a7   :  { %v4072_v33 = vmul.f32 0.6931472, %v5434_v5 }
0x18a9   :  { %v4075_v23 = vsub.f32 %v4061_v18, %v4072_v33 }
0x18aa   :  { %v5436_v53 = vpop.eup %5435 }
0x18ab   :  { %v4079_v1 = vcombine.high %v4075_v23, %v4075_v23  ;;  %v4086_v10 = vrot.slane %v4075_v23, %v6794_v34  ;;  %4319 = vst.sshfl [vmem:[%s7281_s16] sm:$0x3 pattern:$0x76325410] %v4075_v23  ;;  %v4074_v56 = vmul.f32 0.6931472, %v5436_v53 }
0x18ad   :  { %v4093_v41 = vrot.slane %v4079_v1, %v6794_v34  ;;  %v4094_v36 = vcombine.high %v4086_v10, %v4086_v10  ;;  %4320 = vst.sshfl [vmem:[%s7281_s16 + $0x4] sm:$0x3 pattern:$0x76325410] %v4079_v1  ;;  %v4076_v6 = vsub.f32 %v4062_v11, %v4074_v56 }
0x18af   :  { %v4095_v54 = vcombine.high %v4093_v41, %v4093_v41  ;;  %4122 = vst [vmem:[%s7281_s16 + $0x2] sm:$0x3] %v4094_v36  ;;  %v4096_v0 = vcombine.high %v4076_v6, %v4076_v6  ;;  %v4103_v60 = vrot.slane %v4076_v6, %v6794_v34  ;;  %4321 = vst.sshfl [vmem:[%s7281_s16 + $0x8] sm:$0x3 pattern:$0x76325410] %v4076_v6 }
0x18b1   :  { %4124 = vst [vmem:[%s7281_s16 + $0x6] sm:$0x3] %v4095_v54  ;;  %v4110_v35 = vrot.slane %v4096_v0, %v6794_v34  ;;  %v4111_v51 = vcombine.high %v4103_v60, %v4103_v60  ;;  %4322 = vst.sshfl [vmem:[%s7281_s16 + $0xc] sm:$0x3 pattern:$0x76325410] %v4096_v0 }
0x18b3   :  { %v4112_v24 = vcombine.high %v4110_v35, %v4110_v35  ;;  %4126 = vst [vmem:[%s7281_s16 + $0xa] sm:$0x3] %v4111_v51 }
0x18b5   :  { %4128 = vst [vmem:[%s7281_s16 + $0xe] sm:$0x3] %v4112_v24 }
0x18b6   :  { %4133 = vsyncpa [#allocation5], 1 }
0x18b7   :  { %4134 = vsyncpa [#allocation7], 1 }
0x18b8   :  { %4135 = vsyncpa [#allocation10], 1 }
0x18b9   :  { %4136 = vsyncpa [#allocation13], 1 }
0x18ba   :  { %4137 = vsyncpa [#allocation16], 1 }
0x18bb   :  { %4138 = vsyncpa [#allocation19], 1 }

</bundles_post_ra>
